<compile_context>
chip_gen: v5e
topology: v5e:2x2
jax: 0.10.0
libtpu: 0.0.40
codegen_flags: <defaults>
</compile_context>

<pallas_src>
import functools

import jax
import jax.numpy as jnp
import numpy as np
from jax import lax
from jax.experimental import pallas as pl
from jax.experimental.pallas import tpu as pltpu

LANE = 128
SUBLANE = 8


def _round_up(v, m):
    return (v + m - 1) // m * m


def _vmem_cap_bytes():
    try:
        return int(pltpu.get_tpu_info().vmem_capacity_bytes)
    except Exception:
        return 64 << 20  # conservative fallback (v7x physical VMEM)


def _elementwise_dtype():
    # bf16 VPU/EUP exists on v6e/v7x; v5e and older keep f32 elementwise math.
    try:
        kind = jax.devices()[0].device_kind.lower()
    except Exception:
        kind = ""
    if ("v6" in kind) or ("v7" in kind) or ("tpu7" in kind):
        return jnp.bfloat16
    return jnp.float32


def _pick_batch_block(n, hout, wout, per_image_bytes, vmem_cap):
    """Images per grid step: feed the MXU >=512 rows, keep >=2 grid steps (v7x),
    and stay inside a fraction of VMEM."""
    if n <= 1:
        return 1
    target_rows = 512
    b = max(1, -(-target_rows // max(1, hout * wout)))
    b = min(b, max(1, n // 2))                      # >=2 parallel steps for 2 TCs
    budget = max(vmem_cap // 4, 8 << 20)
    b = min(b, max(1, budget // max(per_image_bytes, 1)))
    b = min(b, n)
    while n % b:
        b -= 1
    return b


# ----------------------------- Pallas kernel -----------------------------
def mbconv_kernel(x_ref, w_exp_ref, b1_ref, w_dw_ref, b2_ref,
                  w_redT_ref, b_red_ref, w_sexp_ref, b_sexp_ref,
                  w_proj_ref, b3_ref, out_ref, t_pad_ref,
                  *, kernel_size, stride, pad, orig_w, has_shortcut):
    B, H, W8, Cin = x_ref.shape                  # interior only, W rounded to 8
    _, Hp, Wp, Cexp = t_pad_ref.shape            # zero-haloed scratch
    _, Hout, Wout, Cout = out_ref.shape
    K = kernel_size
    ew = t_pad_ref.dtype                         # bf16 on v6e/v7x, f32 on v5e

    # ---- 1x1 expand conv (BN folded) + SiLU : interior rows only ----
    x = x_ref[...]                                           # (B,H,W8,Cin) bf16
    m = B * H * W8
    t = jnp.dot(x.reshape(m, Cin), w_exp_ref[...],
                preferred_element_type=jnp.float32)          # MXU, f32 acc
    t = t.astype(ew) + b1_ref[...]
    t = t * jax.nn.sigmoid(t)                                # SiLU (bf16 EUP on v6e/v7x)
    t = t.reshape(B, H, W8, Cexp)
    if W8 > orig_w:
        # the W-rounding columns sit inside the depthwise halo -> must be zero
        col = lax.broadcasted_iota(jnp.int32, (1, 1, W8, 1), 2)
        t = jnp.where(col < orig_w, t, jnp.zeros((), ew))

    # ---- place interior into the zero-haloed scratch (one shifted copy) ----
    # Re-zero only the thin halo strips each step: cheap, and correct when the
    # parallel batch axis is split across TensorCores (scratch is per-core).
    if pad > 0:
        zrow = jnp.zeros((B, pad, Wp, Cexp), ew)
        t_pad_ref[:, :pad, :, :] = zrow
        t_pad_ref[:, pad + H:, :, :] = zrow
        t_pad_ref[:, :, :pad, :] = jnp.zeros((B, Hp, pad, Cexp), ew)
    if Wp > pad + W8:
        t_pad_ref[:, :, pad + W8:, :] = jnp.zeros((B, Hp, Wp - pad - W8, Cexp), ew)
    t_pad_ref[:, pad:pad + H, pad:pad + W8, :] = t

    # ---- depthwise KxK conv (BN folded) + SiLU ----
    tp = t_pad_ref[...]                                      # (B,Hp,Wp,Cexp) ew
    w_dw = w_dw_ref[...]                                     # (K*K, Cexp) ew
    span_h = (Hout - 1) * stride + 1
    span_w = (Wout - 1) * stride + 1
    acc = None
    for kw in range(K):
        # hoist the sublane (W) shift / stride out of the kh loop: K relayouts, not K*K
        t_kw = lax.slice(tp, (0, 0, kw, 0), (B, Hp, kw + span_w, Cexp),
                         (1, 1, stride, 1))                  # (B,Hp,Wout,Cexp)
        for kh in range(K):
            win = lax.slice(t_kw, (0, kh, 0, 0), (B, kh + span_h, Wout, Cexp),
                            (1, stride, 1, 1))               # (B,Hout,Wout,Cexp)
            idx = kh * K + kw
            tap = win * w_dw[idx:idx + 1, :]
            acc = tap.astype(jnp.float32) if acc is None else acc + tap
    d = acc + b2_ref[...]                                    # f32
    d = d * jax.nn.sigmoid(d)                                # f32 (feeds SE mean)

    # ---- SqueezeExcite : per-image VPU/XLU reductions (no tiny MXU matmuls) ----
    # TODO(synk): if Wout % 8 != 0 (e.g. 7/14) this reshape relayouts; pad Wout
    # to 8 with masked columns excluded from the mean for those stages.
    HW = Hout * Wout
    d2 = d.reshape(B, HW, Cexp)
    pooled = jnp.mean(d2, axis=1)                            # (B, Cexp)
    r = jnp.sum(pooled[:, None, :] * w_redT_ref[...], axis=-1) + b_red_ref[...]
    r = r * jax.nn.sigmoid(r)                                # (B, Csq)
    e = jnp.sum(r[:, :, None] * w_sexp_ref[...], axis=1) + b_sexp_ref[...]
    gate = jax.nn.sigmoid(e)[:, None, :]                     # (B, 1, Cexp)
    d2 = d2 * gate

    # ---- 1x1 project conv (BN folded, identity activation) ----
    p = jnp.dot(d2.reshape(B * HW, Cexp).astype(jnp.bfloat16), w_proj_ref[...],
                preferred_element_type=jnp.float32)          # (B*HW, Cout)
    p = p + b3_ref[...]
    p = p.reshape(B, Hout, Wout, Cout)

    if has_shortcut:
        # DropPath is identity at inference; stride==1 and Cin==Cout here.
        x_res = lax.slice(x, (0, 0, 0, 0), (B, H, orig_w, Cout))
        p = p + x_res.astype(jnp.float32)

    out_ref[...] = p.astype(out_ref.dtype)


# ----------------------------- wrapper -----------------------------
def mbconv_pallas(x_nhwc, params, *, kernel_size, stride, has_shortcut):
    (w_exp, s1, b1, w_dw, s2, b2,
     w_red, b_red, w_sexp, b_sexp, w_proj, s3, b3) = params

    N, H, W, Cin = x_nhwc.shape
    Cexp = w_exp.shape[1]
    Csq = w_red.shape[1]
    Cout = w_proj.shape[1]
    K = kernel_size
    pad = (K - 1) // 2
    Hout = (H + 2 * pad - K) // stride + 1
    Wout = (W + 2 * pad - K) // stride + 1

    ew = _elementwise_dtype()
    Cin_p = _round_up(Cin, SUBLANE)     # small multiple only: no 128-lane HBM pad
    Cexp_p = _round_up(Cexp, LANE)      # lane-dense expanded channels (MXU N / K)
    W8 = _round_up(W, SUBLANE)          # keeps (H,W)->(H*W) reshapes free
    Hp = H + 2 * pad                    # exact halo: no rounding on this untiled dim
    Wp = max(W + 2 * pad, pad + W8)     # scratch width: interior (W8 cols) + halo

    cap = _vmem_cap_bytes()
    per_img = (Hp * Wp * 2 + 5 * Hout * _round_up(Wout, SUBLANE)) * Cexp_p * 4
    B_blk = _pick_batch_block(N, Hout, Wout, per_img, cap)
    # TODO(synk): with N == 1 on v7x the batch-only parallel axis leaves one
    # TensorCore idle; a second parallel axis (e.g. Cout tiles) would be needed.

    # input: near-native Cin, bf16 -> small DMA; spatial W padded to 8 only
    x_p = jnp.pad(x_nhwc, ((0, 0), (0, 0), (0, W8 - W),
                           (0, Cin_p - Cin))).astype(jnp.bfloat16)

    # fold BN scales into conv weights (eval mode); only biases go in-kernel
    w_exp_f = jnp.pad(w_exp * s1, ((0, Cin_p - Cin),
                                   (0, Cexp_p - Cexp))).astype(jnp.bfloat16)
    b1_p = jnp.pad(b1, ((0, 0), (0, Cexp_p - Cexp))).astype(ew)
    w_dw_f = jnp.pad((w_dw * s2.reshape(1, 1, Cexp)).reshape(K * K, Cexp),
                     ((0, 0), (0, Cexp_p - Cexp))).astype(ew)
    b2_p = jnp.pad(b2, ((0, 0), (0, Cexp_p - Cexp)))
    w_redT = jnp.pad(w_red.T, ((0, 0), (0, Cexp_p - Cexp)))          # (Csq, Cexp_p)
    b_red_p = b_red.reshape(1, Csq)
    w_sexp_p = jnp.pad(w_sexp, ((0, 0), (0, Cexp_p - Cexp)))         # (Csq, Cexp_p)
    b_sexp_p = jnp.pad(b_sexp, ((0, 0), (0, Cexp_p - Cexp)))
    w_proj_f = jnp.pad(w_proj * s3, ((0, Cexp_p - Cexp), (0, 0))).astype(jnp.bfloat16)
    b3_p = b3                                                        # (1, Cout), unpadded

    def rep(shape):
        return pl.BlockSpec(shape, lambda n: (0,) * len(shape))

    kernel = functools.partial(mbconv_kernel, kernel_size=K, stride=stride,
                               pad=pad, orig_w=W, has_shortcut=has_shortcut)

    # rough VMEM working-set estimate ((sublane,lane)-padded)
    def vmem_bytes(shape, dtype):
        it = jnp.dtype(dtype).itemsize
        sub = {4: 8, 2: 16, 1: 32}.get(it, 8)
        n = 1
        for v in shape[:-2]:
            n *= v
        return n * _round_up(shape[-2], sub) * _round_up(shape[-1], LANE) * it

    blk = 2 * (vmem_bytes((B_blk, H, W8, Cin_p), jnp.bfloat16)
               + vmem_bytes((B_blk, Hout, Wout, Cout), jnp.float32))
    scr = vmem_bytes((B_blk, Hp, Wp, Cexp_p), ew)
    itm = 6 * vmem_bytes((B_blk, Hp, Wp, Cexp_p), jnp.float32)
    wts = 2 * (vmem_bytes((Cin_p, Cexp_p), jnp.bfloat16)
               + vmem_bytes((Cexp_p, Cout), jnp.bfloat16)
               + vmem_bytes((K * K, Cexp_p), ew)) + (1 << 18)
    est = blk + scr + itm + wts
    # VMEM cap derived from hardware (v5e/v6e 128 MiB, v7x 64 MiB) minus headroom
    vmem_limit = int(min(max(2 * est, 32 << 20), max(cap - (12 << 20), 16 << 20)))

    # TODO(synk): large-resolution stages (>=56x56 with Cexp>=384) need spatial
    # row tiling with a two-phase SqueezeExcite (pool pass, then gate+project).
    out = pl.pallas_call(
        kernel,
        out_shape=jax.ShapeDtypeStruct((N, Hout, Wout, Cout), jnp.float32),
        grid_spec=pltpu.PrefetchScalarGridSpec(
            num_scalar_prefetch=0,
            grid=(N // B_blk,),
            in_specs=[
                pl.BlockSpec((B_blk, H, W8, Cin_p), lambda n: (n, 0, 0, 0)),
                rep((Cin_p, Cexp_p)),
                rep((1, Cexp_p)),
                rep((K * K, Cexp_p)),
                rep((1, Cexp_p)),
                rep((Csq, Cexp_p)),
                rep((1, Csq)),
                rep((Csq, Cexp_p)),
                rep((1, Cexp_p)),
                rep((Cexp_p, Cout)),
                rep((1, Cout)),
            ],
            out_specs=pl.BlockSpec((B_blk, Hout, Wout, Cout),
                                   lambda n: (n, 0, 0, 0)),
            scratch_shapes=[pltpu.VMEM((B_blk, Hp, Wp, Cexp_p), ew)],
        ),
        compiler_params=pltpu.CompilerParams(
            dimension_semantics=("parallel",),
            vmem_limit_bytes=vmem_limit),
    )(x_p, w_exp_f, b1_p, w_dw_f, b2_p,
      w_redT, b_red_p, w_sexp_p, b_sexp_p, w_proj_f, b3_p)

    return out


# ----------------------------- pure-JAX reference -----------------------------
def mbconv_reference(x_nhwc, params, *, kernel_size, stride, has_shortcut):
    (w_exp, s1, b1, w_dw, s2, b2,
     w_red, b_red, w_sexp, b_sexp, w_proj, s3, b3) = params
    Cin, Cexp = w_exp.shape
    K = kernel_size
    pad = (K - 1) // 2
    dn = ('NHWC', 'HWIO', 'NHWC')

    t = lax.conv_general_dilated(x_nhwc, w_exp.reshape(1, 1, Cin, Cexp),
                                 (1, 1), 'VALID', dimension_numbers=dn)
    t = t * s1 + b1
    t = t * jax.nn.sigmoid(t)

    d = lax.conv_general_dilated(t, w_dw.reshape(K, K, 1, Cexp),
                                 (stride, stride), [(pad, pad), (pad, pad)],
                                 dimension_numbers=dn, feature_group_count=Cexp)
    d = d * s2 + b2
    d = d * jax.nn.sigmoid(d)

    pooled = d.mean(axis=(1, 2), keepdims=True)
    r = lax.conv_general_dilated(pooled, w_red.reshape(1, 1, Cexp, -1),
                                 (1, 1), 'VALID', dimension_numbers=dn) + b_red
    r = r * jax.nn.sigmoid(r)
    e = lax.conv_general_dilated(r, w_sexp.reshape(1, 1, -1, Cexp),
                                 (1, 1), 'VALID', dimension_numbers=dn) + b_sexp
    d = d * jax.nn.sigmoid(e)

    p = lax.conv_general_dilated(d, w_proj.reshape(1, 1, Cexp, -1),
                                 (1, 1), 'VALID', dimension_numbers=dn)
    p = p * s3 + b3
    if has_shortcut:
        p = p + x_nhwc
    return p


# ----------------------------- parameter init -----------------------------
def make_bn(key, c, eps=1e-5):
    k1, k2, k3, k4 = jax.random.split(key, 4)
    gamma = jax.random.uniform(k1, (c,), jnp.float32, 0.5, 1.5)
    beta = 0.05 * jax.random.normal(k2, (c,), jnp.float32)
    mean = 0.05 * jax.random.normal(k3, (c,), jnp.float32)
    var = jax.random.uniform(k4, (c,), jnp.float32, 0.5, 1.5)
    s = gamma * lax.rsqrt(var + eps)
    b = beta - mean * s
    return s.reshape(1, c), b.reshape(1, c)


if __name__ == "__main__":
    # MBConv config (expand_ratio must be != 1)
    N, Cin, H, W = 2, 4, 16, 16
    kernel_size = 3
    expand_ratio = 4
    stride = 1
    se_ratio = 0.25
    out_c = 4
    Cexp = Cin * expand_ratio                  # 16
    Csq = int(Cin * se_ratio)                  # 1
    has_shortcut = (stride == 1 and Cin == out_c)
    # TODO(synk): drop_rate > 0 with training=True (stochastic-depth RNG) is not
    # modeled; inference drop_path is identity, which matches eval semantics.

    key = jax.random.PRNGKey(0)
    ks = jax.random.split(key, 10)

    x_nchw = jax.random.normal(ks[0], (N, Cin, H, W), jnp.float32)  # PyTorch layout
    x_nhwc = jnp.transpose(x_nchw, (0, 2, 3, 1))                    # kernel layout

    w_exp = 0.2 * jax.random.normal(ks[1], (Cin, Cexp), jnp.float32)
    s1, b1 = make_bn(ks[2], Cexp)
    w_dw = 0.2 * jax.random.normal(ks[3], (kernel_size, kernel_size, Cexp), jnp.float32)
    s2, b2 = make_bn(ks[4], Cexp)
    w_red = 0.2 * jax.random.normal(ks[5], (Cexp, Csq), jnp.float32)
    b_red = 0.05 * jax.random.normal(ks[6], (1, Csq), jnp.float32)
    w_sexp = 0.2 * jax.random.normal(ks[7], (Csq, Cexp), jnp.float32)
    b_sexp = 0.05 * jax.random.normal(ks[8], (1, Cexp), jnp.float32)
    w_proj = 0.2 * jax.random.normal(ks[9], (Cexp, out_c), jnp.float32)
    s3, b3 = make_bn(jax.random.PRNGKey(123), out_c)

    params = (w_exp, s1, b1, w_dw, s2, b2,
              w_red, b_red, w_sexp, b_sexp, w_proj, s3, b3)

    out = mbconv_pallas(x_nhwc, params, kernel_size=kernel_size,
                        stride=stride, has_shortcut=has_shortcut)
    out = jax.block_until_ready(out)

    ref = mbconv_reference(x_nhwc, params, kernel_size=kernel_size,
                           stride=stride, has_shortcut=has_shortcut)
    ref = jax.block_until_ready(ref)

    # bf16 MXU operands (+ bf16 activations on v6e/v7x) => bf16-level tolerance
    np.testing.assert_allclose(np.asarray(out), np.asarray(ref),
                               rtol=3e-2, atol=3e-2)

    # Back to PyTorch NCHW layout for the final result (N, out_c, Hout, Wout).
    out_nchw = jnp.transpose(out, (0, 3, 1, 2))
    jax.block_until_ready(out_nchw)
    print("KERNEL_OK")
</pallas_src>

<mosaic_0001>
module attributes {stable_mosaic.version = 11 : i64} {
  func.func @mbconv_kernel(%arg0: i32, %arg1: memref<1x16x16x8xbf16, #tpu.memory_space<vmem>>, %arg2: memref<8x128xbf16, #tpu.memory_space<vmem>>, %arg3: memref<1x128xf32, #tpu.memory_space<vmem>>, %arg4: memref<9x128xf32, #tpu.memory_space<vmem>>, %arg5: memref<1x128xf32, #tpu.memory_space<vmem>>, %arg6: memref<1x128xf32, #tpu.memory_space<vmem>>, %arg7: memref<1x1xf32, #tpu.memory_space<vmem>>, %arg8: memref<1x128xf32, #tpu.memory_space<vmem>>, %arg9: memref<1x128xf32, #tpu.memory_space<vmem>>, %arg10: memref<128x4xbf16, #tpu.memory_space<vmem>>, %arg11: memref<1x4xf32, #tpu.memory_space<vmem>>, %arg12: memref<1x16x16x4xf32, #tpu.memory_space<vmem>>, %arg13: memref<1x18x18x128xf32, #tpu.memory_space<vmem>>) attributes {dimension_semantics = [#tpu.dimension_semantics<parallel>], iteration_bounds = array<i64: 2>, scalar_prefetch = 0 : i64, scratch_operands = 1 : i64, tpu.core_type = #tpu.core_type<tc>, window_params = [{transform_indices = @transform_0, window_bounds = array<i64: 1, 16, 16, 8>}, {pipeline_mode = #tpu.pipeline_mode<synchronous>, transform_indices = @transform_1, window_bounds = array<i64: 8, 128>}, {pipeline_mode = #tpu.pipeline_mode<synchronous>, transform_indices = @transform_2, window_bounds = array<i64: 1, 128>}, {pipeline_mode = #tpu.pipeline_mode<synchronous>, transform_indices = @transform_3, window_bounds = array<i64: 9, 128>}, {pipeline_mode = #tpu.pipeline_mode<synchronous>, transform_indices = @transform_4, window_bounds = array<i64: 1, 128>}, {pipeline_mode = #tpu.pipeline_mode<synchronous>, transform_indices = @transform_5, window_bounds = array<i64: 1, 128>}, {pipeline_mode = #tpu.pipeline_mode<synchronous>, transform_indices = @transform_6, window_bounds = array<i64: 1, 1>}, {pipeline_mode = #tpu.pipeline_mode<synchronous>, transform_indices = @transform_7, window_bounds = array<i64: 1, 128>}, {pipeline_mode = #tpu.pipeline_mode<synchronous>, transform_indices = @transform_8, window_bounds = array<i64: 1, 128>}, {pipeline_mode = #tpu.pipeline_mode<synchronous>, transform_indices = @transform_9, window_bounds = array<i64: 128, 4>}, {pipeline_mode = #tpu.pipeline_mode<synchronous>, transform_indices = @transform_10, window_bounds = array<i64: 1, 4>}, {transform_indices = @transform_11, window_bounds = array<i64: 1, 16, 16, 4>}]} {
    %c0 = arith.constant 0 : index
    %c0_0 = arith.constant 0 : index
    %c0_1 = arith.constant 0 : index
    %c0_2 = arith.constant 0 : index
    %0 = vector.load %arg1[%c0, %c0_0, %c0_1, %c0_2] : memref<1x16x16x8xbf16, #tpu.memory_space<vmem>>, vector<1x16x16x8xbf16>
    %1 = vector.shape_cast %0 : vector<1x16x16x8xbf16> to vector<256x8xbf16>
    %c0_3 = arith.constant 0 : index
    %c0_4 = arith.constant 0 : index
    %2 = vector.load %arg2[%c0_3, %c0_4] : memref<8x128xbf16, #tpu.memory_space<vmem>>, vector<8x128xbf16>
    %cst = arith.constant dense<0.000000e+00> : vector<256x128xf32>
    %3 = tpu.matmul %1, %2, %cst {dimension_numbers = #tpu.dot_dimension_numbers<[1], [0], [0], [1], [0, 0, 1, 1], [], []>} : vector<256x8xbf16>, vector<8x128xbf16>, vector<256x128xf32> -> vector<256x128xf32>
    %c0_5 = arith.constant 0 : index
    %c0_6 = arith.constant 0 : index
    %4 = vector.load %arg3[%c0_5, %c0_6] : memref<1x128xf32, #tpu.memory_space<vmem>>, vector<1x128xf32>
    %5 = vector.broadcast %4 : vector<1x128xf32> to vector<256x128xf32>
    %6 = arith.addf %3, %5 : vector<256x128xf32>
    %7 = arith.negf %6 : vector<256x128xf32>
    %8 = math.exp %7 : vector<256x128xf32>
    %cst_7 = arith.constant 1.000000e+00 : f32
    %9 = vector.broadcast %cst_7 : f32 to vector<256x128xf32>
    %10 = arith.addf %9, %8 : vector<256x128xf32>
    %11 = arith.divf %9, %10 : vector<256x128xf32>
    %12 = arith.mulf %6, %11 : vector<256x128xf32>
    %13 = vector.shape_cast %12 : vector<256x128xf32> to vector<1x16x16x128xf32>
    %cst_8 = arith.constant 0.000000e+00 : f32
    %14 = vector.broadcast %cst_8 : f32 to vector<1x1x18x128xf32>
    %c0_9 = arith.constant 0 : index
    %c0_10 = arith.constant 0 : index
    %c0_11 = arith.constant 0 : index
    %c0_12 = arith.constant 0 : index
    %15 = vector.load %arg13[%c0_9, %c0_10, %c0_11, %c0_12] : memref<1x18x18x128xf32, #tpu.memory_space<vmem>>, vector<1x1x18x128xf32>
    tpu.vector_store %arg13[%c0_9, %c0_10, %c0_11, %c0_12], %14 {strides = array<i32>} : memref<1x18x18x128xf32, #tpu.memory_space<vmem>>, vector<1x1x18x128xf32>,
    %c0_13 = arith.constant 0 : index
    %c17 = arith.constant 17 : index
    %c0_14 = arith.constant 0 : index
    %c0_15 = arith.constant 0 : index
    %16 = vector.load %arg13[%c0_13, %c17, %c0_14, %c0_15] : memref<1x18x18x128xf32, #tpu.memory_space<vmem>>, vector<1x1x18x128xf32>
    tpu.vector_store %arg13[%c0_13, %c17, %c0_14, %c0_15], %14 {strides = array<i32>} : memref<1x18x18x128xf32, #tpu.memory_space<vmem>>, vector<1x1x18x128xf32>,
    %cst_16 = arith.constant 0.000000e+00 : f32
    %17 = vector.broadcast %cst_16 : f32 to vector<1x18x1x128xf32>
    %c0_17 = arith.constant 0 : index
    %c0_18 = arith.constant 0 : index
    %c0_19 = arith.constant 0 : index
    %c0_20 = arith.constant 0 : index
    %18 = vector.load %arg13[%c0_17, %c0_18, %c0_19, %c0_20] : memref<1x18x18x128xf32, #tpu.memory_space<vmem>>, vector<1x18x1x128xf32>
    tpu.vector_store %arg13[%c0_17, %c0_18, %c0_19, %c0_20], %17 {strides = array<i32>} : memref<1x18x18x128xf32, #tpu.memory_space<vmem>>, vector<1x18x1x128xf32>,
    %cst_21 = arith.constant 0.000000e+00 : f32
    %19 = vector.broadcast %cst_21 : f32 to vector<1x18x1x128xf32>
    %c0_22 = arith.constant 0 : index
    %c0_23 = arith.constant 0 : index
    %c17_24 = arith.constant 17 : index
    %c0_25 = arith.constant 0 : index
    %20 = vector.load %arg13[%c0_22, %c0_23, %c17_24, %c0_25] : memref<1x18x18x128xf32, #tpu.memory_space<vmem>>, vector<1x18x1x128xf32>
    tpu.vector_store %arg13[%c0_22, %c0_23, %c17_24, %c0_25], %19 {strides = array<i32>} : memref<1x18x18x128xf32, #tpu.memory_space<vmem>>, vector<1x18x1x128xf32>,
    %c0_26 = arith.constant 0 : index
    %c1 = arith.constant 1 : index
    %c1_27 = arith.constant 1 : index
    %c0_28 = arith.constant 0 : index
    %21 = vector.load %arg13[%c0_26, %c1, %c1_27, %c0_28] : memref<1x18x18x128xf32, #tpu.memory_space<vmem>>, vector<1x16x16x128xf32>
    tpu.vector_store %arg13[%c0_26, %c1, %c1_27, %c0_28], %13 {strides = array<i32>} : memref<1x18x18x128xf32, #tpu.memory_space<vmem>>, vector<1x16x16x128xf32>,
    %c0_29 = arith.constant 0 : index
    %c0_30 = arith.constant 0 : index
    %c0_31 = arith.constant 0 : index
    %c0_32 = arith.constant 0 : index
    %22 = vector.load %arg13[%c0_29, %c0_30, %c0_31, %c0_32] : memref<1x18x18x128xf32, #tpu.memory_space<vmem>>, vector<1x18x18x128xf32>
    %c0_33 = arith.constant 0 : index
    %c0_34 = arith.constant 0 : index
    %23 = vector.load %arg4[%c0_33, %c0_34] : memref<9x128xf32, #tpu.memory_space<vmem>>, vector<9x128xf32>
    %24 = vector.extract_strided_slice %22 {offsets = [0, 0, 0, 0], sizes = [1, 18, 16, 128], strides = [1, 1, 1, 1]} : vector<1x18x18x128xf32> to vector<1x18x16x128xf32>
    %25 = vector.extract_strided_slice %24 {offsets = [0, 0, 0, 0], sizes = [1, 16, 16, 128], strides = [1, 1, 1, 1]} : vector<1x18x16x128xf32> to vector<1x16x16x128xf32>
    %26 = vector.extract_strided_slice %23 {offsets = [0, 0], sizes = [1, 128], strides = [1, 1]} : vector<9x128xf32> to vector<1x128xf32>
    %27 = vector.shape_cast %26 : vector<1x128xf32> to vector<1x1x1x128xf32>
    %28 = vector.broadcast %27 : vector<1x1x1x128xf32> to vector<1x16x16x128xf32>
    %29 = arith.mulf %25, %28 : vector<1x16x16x128xf32>
    %30 = vector.extract_strided_slice %24 {offsets = [0, 1, 0, 0], sizes = [1, 16, 16, 128], strides = [1, 1, 1, 1]} : vector<1x18x16x128xf32> to vector<1x16x16x128xf32>
    %31 = vector.extract_strided_slice %23 {offsets = [3, 0], sizes = [1, 128], strides = [1, 1]} : vector<9x128xf32> to vector<1x128xf32>
    %32 = vector.shape_cast %31 : vector<1x128xf32> to vector<1x1x1x128xf32>
    %33 = vector.broadcast %32 : vector<1x1x1x128xf32> to vector<1x16x16x128xf32>
    %34 = arith.mulf %30, %33 : vector<1x16x16x128xf32>
    %35 = arith.addf %29, %34 : vector<1x16x16x128xf32>
    %36 = vector.extract_strided_slice %24 {offsets = [0, 2, 0, 0], sizes = [1, 16, 16, 128], strides = [1, 1, 1, 1]} : vector<1x18x16x128xf32> to vector<1x16x16x128xf32>
    %37 = vector.extract_strided_slice %23 {offsets = [6, 0], sizes = [1, 128], strides = [1, 1]} : vector<9x128xf32> to vector<1x128xf32>
    %38 = vector.shape_cast %37 : vector<1x128xf32> to vector<1x1x1x128xf32>
    %39 = vector.broadcast %38 : vector<1x1x1x128xf32> to vector<1x16x16x128xf32>
    %40 = arith.mulf %36, %39 : vector<1x16x16x128xf32>
    %41 = arith.addf %35, %40 : vector<1x16x16x128xf32>
    %42 = vector.extract_strided_slice %22 {offsets = [0, 0, 1, 0], sizes = [1, 18, 16, 128], strides = [1, 1, 1, 1]} : vector<1x18x18x128xf32> to vector<1x18x16x128xf32>
    %43 = vector.extract_strided_slice %42 {offsets = [0, 0, 0, 0], sizes = [1, 16, 16, 128], strides = [1, 1, 1, 1]} : vector<1x18x16x128xf32> to vector<1x16x16x128xf32>
    %44 = vector.extract_strided_slice %23 {offsets = [1, 0], sizes = [1, 128], strides = [1, 1]} : vector<9x128xf32> to vector<1x128xf32>
    %45 = vector.shape_cast %44 : vector<1x128xf32> to vector<1x1x1x128xf32>
    %46 = vector.broadcast %45 : vector<1x1x1x128xf32> to vector<1x16x16x128xf32>
    %47 = arith.mulf %43, %46 : vector<1x16x16x128xf32>
    %48 = arith.addf %41, %47 : vector<1x16x16x128xf32>
    %49 = vector.extract_strided_slice %42 {offsets = [0, 1, 0, 0], sizes = [1, 16, 16, 128], strides = [1, 1, 1, 1]} : vector<1x18x16x128xf32> to vector<1x16x16x128xf32>
    %50 = vector.extract_strided_slice %23 {offsets = [4, 0], sizes = [1, 128], strides = [1, 1]} : vector<9x128xf32> to vector<1x128xf32>
    %51 = vector.shape_cast %50 : vector<1x128xf32> to vector<1x1x1x128xf32>
    %52 = vector.broadcast %51 : vector<1x1x1x128xf32> to vector<1x16x16x128xf32>
    %53 = arith.mulf %49, %52 : vector<1x16x16x128xf32>
    %54 = arith.addf %48, %53 : vector<1x16x16x128xf32>
    %55 = vector.extract_strided_slice %42 {offsets = [0, 2, 0, 0], sizes = [1, 16, 16, 128], strides = [1, 1, 1, 1]} : vector<1x18x16x128xf32> to vector<1x16x16x128xf32>
    %56 = vector.extract_strided_slice %23 {offsets = [7, 0], sizes = [1, 128], strides = [1, 1]} : vector<9x128xf32> to vector<1x128xf32>
    %57 = vector.shape_cast %56 : vector<1x128xf32> to vector<1x1x1x128xf32>
    %58 = vector.broadcast %57 : vector<1x1x1x128xf32> to vector<1x16x16x128xf32>
    %59 = arith.mulf %55, %58 : vector<1x16x16x128xf32>
    %60 = arith.addf %54, %59 : vector<1x16x16x128xf32>
    %61 = vector.extract_strided_slice %22 {offsets = [0, 0, 2, 0], sizes = [1, 18, 16, 128], strides = [1, 1, 1, 1]} : vector<1x18x18x128xf32> to vector<1x18x16x128xf32>
    %62 = vector.extract_strided_slice %61 {offsets = [0, 0, 0, 0], sizes = [1, 16, 16, 128], strides = [1, 1, 1, 1]} : vector<1x18x16x128xf32> to vector<1x16x16x128xf32>
    %63 = vector.extract_strided_slice %23 {offsets = [2, 0], sizes = [1, 128], strides = [1, 1]} : vector<9x128xf32> to vector<1x128xf32>
    %64 = vector.shape_cast %63 : vector<1x128xf32> to vector<1x1x1x128xf32>
    %65 = vector.broadcast %64 : vector<1x1x1x128xf32> to vector<1x16x16x128xf32>
    %66 = arith.mulf %62, %65 : vector<1x16x16x128xf32>
    %67 = arith.addf %60, %66 : vector<1x16x16x128xf32>
    %68 = vector.extract_strided_slice %61 {offsets = [0, 1, 0, 0], sizes = [1, 16, 16, 128], strides = [1, 1, 1, 1]} : vector<1x18x16x128xf32> to vector<1x16x16x128xf32>
    %69 = vector.extract_strided_slice %23 {offsets = [5, 0], sizes = [1, 128], strides = [1, 1]} : vector<9x128xf32> to vector<1x128xf32>
    %70 = vector.shape_cast %69 : vector<1x128xf32> to vector<1x1x1x128xf32>
    %71 = vector.broadcast %70 : vector<1x1x1x128xf32> to vector<1x16x16x128xf32>
    %72 = arith.mulf %68, %71 : vector<1x16x16x128xf32>
    %73 = arith.addf %67, %72 : vector<1x16x16x128xf32>
    %74 = vector.extract_strided_slice %61 {offsets = [0, 2, 0, 0], sizes = [1, 16, 16, 128], strides = [1, 1, 1, 1]} : vector<1x18x16x128xf32> to vector<1x16x16x128xf32>
    %75 = vector.extract_strided_slice %23 {offsets = [8, 0], sizes = [1, 128], strides = [1, 1]} : vector<9x128xf32> to vector<1x128xf32>
    %76 = vector.shape_cast %75 : vector<1x128xf32> to vector<1x1x1x128xf32>
    %77 = vector.broadcast %76 : vector<1x1x1x128xf32> to vector<1x16x16x128xf32>
    %78 = arith.mulf %74, %77 : vector<1x16x16x128xf32>
    %79 = arith.addf %73, %78 : vector<1x16x16x128xf32>
    %c0_35 = arith.constant 0 : index
    %c0_36 = arith.constant 0 : index
    %80 = vector.load %arg5[%c0_35, %c0_36] : memref<1x128xf32, #tpu.memory_space<vmem>>, vector<1x128xf32>
    %81 = vector.shape_cast %80 : vector<1x128xf32> to vector<1x1x1x128xf32>
    %82 = vector.broadcast %81 : vector<1x1x1x128xf32> to vector<1x16x16x128xf32>
    %83 = arith.addf %79, %82 : vector<1x16x16x128xf32>
    %84 = arith.negf %83 : vector<1x16x16x128xf32>
    %85 = math.exp %84 : vector<1x16x16x128xf32>
    %cst_37 = arith.constant 1.000000e+00 : f32
    %86 = vector.broadcast %cst_37 : f32 to vector<1x16x16x128xf32>
    %87 = arith.addf %86, %85 : vector<1x16x16x128xf32>
    %88 = arith.divf %86, %87 : vector<1x16x16x128xf32>
    %89 = arith.mulf %83, %88 : vector<1x16x16x128xf32>
    %90 = vector.shape_cast %89 : vector<1x16x16x128xf32> to vector<1x256x128xf32>
    %cst_38 = arith.constant dense<0.000000e+00> : vector<1x128xf32>
    %91 = vector.multi_reduction <add>, %90, %cst_38 [1] : vector<1x256x128xf32> to vector<1x128xf32>
    %cst_39 = arith.constant 2.560000e+02 : f32
    %92 = vector.broadcast %cst_39 : f32 to vector<1x128xf32>
    %93 = arith.divf %91, %92 : vector<1x128xf32>
    %94 = vector.shape_cast %93 : vector<1x128xf32> to vector<1x1x128xf32>
    %c0_40 = arith.constant 0 : index
    %c0_41 = arith.constant 0 : index
    %95 = vector.load %arg6[%c0_40, %c0_41] : memref<1x128xf32, #tpu.memory_space<vmem>>, vector<1x128xf32>
    %96 = vector.shape_cast %95 : vector<1x128xf32> to vector<1x1x128xf32>
    %97 = arith.mulf %94, %96 : vector<1x1x128xf32>
    %cst_42 = arith.constant dense<0.000000e+00> : vector<1x1xf32>
    %98 = vector.multi_reduction <add>, %97, %cst_42 [2] : vector<1x1x128xf32> to vector<1x1xf32>
    %c0_43 = arith.constant 0 : index
    %c0_44 = arith.constant 0 : index
    %99 = vector.load %arg7[%c0_43, %c0_44] : memref<1x1xf32, #tpu.memory_space<vmem>>, vector<1x1xf32>
    %100 = arith.addf %98, %99 : vector<1x1xf32>
    %101 = arith.negf %100 : vector<1x1xf32>
    %102 = math.exp %101 : vector<1x1xf32>
    %cst_45 = arith.constant 1.000000e+00 : f32
    %103 = vector.broadcast %cst_45 : f32 to vector<1x1xf32>
    %104 = arith.addf %103, %102 : vector<1x1xf32>
    %105 = arith.divf %103, %104 : vector<1x1xf32>
    %106 = arith.mulf %100, %105 : vector<1x1xf32>
    %107 = vector.shape_cast %106 : vector<1x1xf32> to vector<1x1x1xf32>
    %c0_46 = arith.constant 0 : index
    %c0_47 = arith.constant 0 : index
    %108 = vector.load %arg8[%c0_46, %c0_47] : memref<1x128xf32, #tpu.memory_space<vmem>>, vector<1x128xf32>
    %109 = vector.shape_cast %108 : vector<1x128xf32> to vector<1x1x128xf32>
    %110 = vector.broadcast %107 : vector<1x1x1xf32> to vector<1x1x128xf32>
    %111 = arith.mulf %110, %109 : vector<1x1x128xf32>
    %cst_48 = arith.constant dense<0.000000e+00> : vector<1x128xf32>
    %112 = vector.multi_reduction <add>, %111, %cst_48 [1] : vector<1x1x128xf32> to vector<1x128xf32>
    %c0_49 = arith.constant 0 : index
    %c0_50 = arith.constant 0 : index
    %113 = vector.load %arg9[%c0_49, %c0_50] : memref<1x128xf32, #tpu.memory_space<vmem>>, vector<1x128xf32>
    %114 = arith.addf %112, %113 : vector<1x128xf32>
    %115 = arith.negf %114 : vector<1x128xf32>
    %116 = math.exp %115 : vector<1x128xf32>
    %cst_51 = arith.constant 1.000000e+00 : f32
    %117 = vector.broadcast %cst_51 : f32 to vector<1x128xf32>
    %118 = arith.addf %117, %116 : vector<1x128xf32>
    %119 = arith.divf %117, %118 : vector<1x128xf32>
    %120 = vector.shape_cast %119 : vector<1x128xf32> to vector<1x1x128xf32>
    %121 = vector.broadcast %120 : vector<1x1x128xf32> to vector<1x256x128xf32>
    %122 = arith.mulf %90, %121 : vector<1x256x128xf32>
    %123 = vector.shape_cast %122 : vector<1x256x128xf32> to vector<256x128xf32>
    %124 = arith.truncf %123 : vector<256x128xf32> to vector<256x128xbf16>
    %c0_52 = arith.constant 0 : index
    %c0_53 = arith.constant 0 : index
    %125 = vector.load %arg10[%c0_52, %c0_53] : memref<128x4xbf16, #tpu.memory_space<vmem>>, vector<128x4xbf16>
    %cst_54 = arith.constant dense<0.000000e+00> : vector<256x4xf32>
    %126 = tpu.matmul %124, %125, %cst_54 {dimension_numbers = #tpu.dot_dimension_numbers<[1], [0], [0], [1], [0, 0, 1, 1], [], []>} : vector<256x128xbf16>, vector<128x4xbf16>, vector<256x4xf32> -> vector<256x4xf32>
    %c0_55 = arith.constant 0 : index
    %c0_56 = arith.constant 0 : index
    %127 = vector.load %arg11[%c0_55, %c0_56] : memref<1x4xf32, #tpu.memory_space<vmem>>, vector<1x4xf32>
    %128 = vector.broadcast %127 : vector<1x4xf32> to vector<256x4xf32>
    %129 = arith.addf %126, %128 : vector<256x4xf32>
    %130 = vector.shape_cast %129 : vector<256x4xf32> to vector<1x16x16x4xf32>
    %131 = vector.extract_strided_slice %0 {offsets = [0, 0, 0, 0], sizes = [1, 16, 16, 4], strides = [1, 1, 1, 1]} : vector<1x16x16x8xbf16> to vector<1x16x16x4xbf16>
    %132 = arith.extf %131 : vector<1x16x16x4xbf16> to vector<1x16x16x4xf32>
    %133 = arith.addf %130, %132 : vector<1x16x16x4xf32>
    %c0_57 = arith.constant 0 : index
    %c0_58 = arith.constant 0 : index
    %c0_59 = arith.constant 0 : index
    %c0_60 = arith.constant 0 : index
    %134 = vector.load %arg12[%c0_57, %c0_58, %c0_59, %c0_60] : memref<1x16x16x4xf32, #tpu.memory_space<vmem>>, vector<1x16x16x4xf32>
    tpu.vector_store %arg12[%c0_57, %c0_58, %c0_59, %c0_60], %133 {strides = array<i32>} : memref<1x16x16x4xf32, #tpu.memory_space<vmem>>, vector<1x16x16x4xf32>,
    return
  }
  func.func @transform_0(%arg0: i32) -> (i32, i32, i32, i32) {
    %c0_i32 = arith.constant 0 : i32
    %c0_i32_0 = arith.constant 0 : i32
    %c0_i32_1 = arith.constant 0 : i32
    %c0_i32_2 = arith.constant 0 : i32
    return %arg0, %c0_i32, %c0_i32_0, %c0_i32_1 : i32, i32, i32, i32
  }
  func.func @transform_1(%arg0: i32) -> (i32, i32) {
    %c0_i32 = arith.constant 0 : i32
    %c0_i32_0 = arith.constant 0 : i32
    %c0_i32_1 = arith.constant 0 : i32
    return %c0_i32, %c0_i32_0 : i32, i32
  }
  func.func @transform_2(%arg0: i32) -> (i32, i32) {
    %c0_i32 = arith.constant 0 : i32
    %c0_i32_0 = arith.constant 0 : i32
    %c0_i32_1 = arith.constant 0 : i32
    return %c0_i32, %c0_i32_0 : i32, i32
  }
  func.func @transform_3(%arg0: i32) -> (i32, i32) {
    %c0_i32 = arith.constant 0 : i32
    %c0_i32_0 = arith.constant 0 : i32
    %c0_i32_1 = arith.constant 0 : i32
    return %c0_i32, %c0_i32_0 : i32, i32
  }
  func.func @transform_4(%arg0: i32) -> (i32, i32) {
    %c0_i32 = arith.constant 0 : i32
    %c0_i32_0 = arith.constant 0 : i32
    %c0_i32_1 = arith.constant 0 : i32
    return %c0_i32, %c0_i32_0 : i32, i32
  }
  func.func @transform_5(%arg0: i32) -> (i32, i32) {
    %c0_i32 = arith.constant 0 : i32
    %c0_i32_0 = arith.constant 0 : i32
    %c0_i32_1 = arith.constant 0 : i32
    return %c0_i32, %c0_i32_0 : i32, i32
  }
  func.func @transform_6(%arg0: i32) -> (i32, i32) {
    %c0_i32 = arith.constant 0 : i32
    %c0_i32_0 = arith.constant 0 : i32
    %c0_i32_1 = arith.constant 0 : i32
    return %c0_i32, %c0_i32_0 : i32, i32
  }
  func.func @transform_7(%arg0: i32) -> (i32, i32) {
    %c0_i32 = arith.constant 0 : i32
    %c0_i32_0 = arith.constant 0 : i32
    %c0_i32_1 = arith.constant 0 : i32
    return %c0_i32, %c0_i32_0 : i32, i32
  }
  func.func @transform_8(%arg0: i32) -> (i32, i32) {
    %c0_i32 = arith.constant 0 : i32
    %c0_i32_0 = arith.constant 0 : i32
    %c0_i32_1 = arith.constant 0 : i32
    return %c0_i32, %c0_i32_0 : i32, i32
  }
  func.func @transform_9(%arg0: i32) -> (i32, i32) {
    %c0_i32 = arith.constant 0 : i32
    %c0_i32_0 = arith.constant 0 : i32
    %c0_i32_1 = arith.constant 0 : i32
    return %c0_i32, %c0_i32_0 : i32, i32
  }
  func.func @transform_10(%arg0: i32) -> (i32, i32) {
    %c0_i32 = arith.constant 0 : i32
    %c0_i32_0 = arith.constant 0 : i32
    %c0_i32_1 = arith.constant 0 : i32
    return %c0_i32, %c0_i32_0 : i32, i32
  }
  func.func @transform_11(%arg0: i32) -> (i32, i32, i32, i32) {
    %c0_i32 = arith.constant 0 : i32
    %c0_i32_0 = arith.constant 0 : i32
    %c0_i32_1 = arith.constant 0 : i32
    %c0_i32_2 = arith.constant 0 : i32
    return %arg0, %c0_i32, %c0_i32_0, %c0_i32_1 : i32, i32, i32, i32
  }
}

</mosaic_0001>

<bundles_post_ra>
// kernel: tpu_custom_call.1
= control target key start
LH: loop header
LB: loop body
LE: loop exit
PB: predicated region body
PF: predicated region fallthrough
CT: control target
= control target key end

     0   :  { %s4771_s19 = smov 0   ;;  %s9063_s0 = inlined_call_operand.vmem [shape: bf16[2,16,16,8], index: 0, kind: input, shape index: {}]   ;;  %s9064_s1 = inlined_call_operand.vmem [shape: bf16[8,128], index: 1, kind: input, shape index: {}]   ;;  %s9065_s2 = inlined_call_operand.vmem [shape: f32[1,128], index: 2, kind: input, shape index: {}]   ;;  %s9066_s3 = inlined_call_operand.vmem [shape: f32[9,128], index: 3, kind: input, shape index: {}]   ;;  %s9067_s4 = inlined_call_operand.vmem [shape: f32[1,128], index: 4, kind: input, shape index: {}]   ;;  %s9068_s5 = inlined_call_operand.vmem [shape: f32[1,128], index: 5, kind: input, shape index: {}]   ;;  %s9069_s6 = inlined_call_operand.<no memory space> [shape: f32[1,1], index: 6, kind: input, shape index: {}]   ;;  %s9070_s7 = inlined_call_operand.vmem [shape: f32[1,128], index: 7, kind: input, shape index: {}]   ;;  %s9071_s8 = inlined_call_operand.vmem [shape: f32[1,128], index: 8, kind: input, shape index: {}]   ;;  %s9072_s9 = inlined_call_operand.vmem [shape: bf16[128,4], index: 9, kind: input, shape index: {}]   ;;  %s9073_s10 = inlined_call_operand.vmem [shape: f32[1,4], index: 10, kind: input, shape index: {}]   ;;  %s9074_s11 = inlined_call_operand.vmem [shape: f32[2,16,16,4], index: 11, kind: output, shape index: {}]  }
   0x1   :  { %v16_v0 = vstv %s9069_s6 }
   0x2   :  { %17 = vst [vmem:[#allocation3] sm:$0x1] %v16_v0 }
   0x3 LB: > { %s4168_s20 = sadd.s32 4294967295, %s4703_s19   ;;  %p4172_p0 = scmp.ge.s32.totalorder %s4703_s19, 1  ;;  %s4703_s19 = sphi %s4771_s19, %s23_s19  }
   0x4   : > { %p339_p1 = scmp.lt.s32.totalorder %s4703_s19, 3 }
   0x6   : > { %p340_p2 = pnand %p4172_p0, %p339_p1 }
   0x8   : > { %343 = sbr.rel (%p340_p2) target bundleno = 1333 (0x535), region = 64 }
   0xd   : > { %v422_v1 = vld [vmem:[%s9064_s1] sm:$0xf]  ;;  %vm556_vm0 = vcmask 1043456   ;;  %p379_p3 = scmp.lt.s32.totalorder %s4168_s20, 1  ;;  %vm507_vm1 = vcmask 64512   ;;  %v4705_v21 = vmov 0.0  }
   0xe   : > { %v558_v2 = vsel %vm556_vm0, %v422_v1, 0  ;;  %v4823_v18 = vld [vmem:[%s9065_s2] ss:$0 sm:$0xff]  ;;  %1289 = vst [vmem:[#allocation2] sm:$0xff] %v4705_v21 }
   0xf   : > { %567 = vmatpush.bf16.msra.mxu0 %v558_v2  ;;  %4383 = vmatpush.bf16.msra.mxu3 %v558_v2  ;;  %s9783_s20 = smov (!%p379_p3, %s4168_s20), 1  ;;  %1296 = vst [vmem:[#allocation2] sm:$0x1] %v4705_v21 }
  0x10   : > { %s4357_s6 = sshll.u32 %s9783_s20, 7  ;;  %1297 = vst [vmem:[#allocation2 + $0x18] sm:$0x1] %v4705_v21  ;;  %s4358_s21 = sshll.u32 %s9783_s20, 8 }
  0x11   : > { %s4788_s25 = scalar_lea.vmem %s9063_s0, %s4357_s6  ;;  %1290 = vst [vmem:[#allocation2 + $0x8] sm:$0xff] %v4705_v21  ;;  %s8948_s23 = scalar_lea.vmem %s9074_s11, %s4358_s21 }
  0x12   : > { %v4359_v3 = vld [vmem:[%s4788_s25] sm:$0xff]  ;;  %v4368_v4 = vld [vmem:[%s4788_s25 + $0x48] sm:$0xff]  ;;  %v4369_v6 = vld [vmem:[%s4788_s25 + $0x50] sm:$0xff]  ;;  %1291 = vst [vmem:[#allocation2 + $0x10] sm:$0x3] %v4705_v21 }
  0x13   : > { %4241 = vmatmul.msk.bf16.vlgmr.msra.gmra.mxu0 %vm507_vm1, %v4359_v3  ;;  %4250 = vmatmul.msk.bf16.vlgmr.msra.gmra.mxu3 %vm507_vm1, %v4368_v4  ;;  %v4360_v5 = vld [vmem:[%s4788_s25 + $0x8] sm:$0xff]  ;;  %v4361_v7 = vld [vmem:[%s4788_s25 + $0x10] sm:$0xff]  ;;  %v4370_v8 = vld [vmem:[%s4788_s25 + $0x58] sm:$0xff]  ;;  %1293 = vst [vmem:[#allocation2 + $0x198] sm:$0xff] %v4705_v21 }
  0x14   : > { %v4362_v9 = vld [vmem:[%s4788_s25 + $0x18] sm:$0xff]  ;;  %v4371_v10 = vld [vmem:[%s4788_s25 + $0x60] sm:$0xff]  ;;  %v4372_v12 = vld [vmem:[%s4788_s25 + $0x68] sm:$0xff]  ;;  %1295 = vst [vmem:[#allocation2 + $0x1a8] sm:$0x3] %v4705_v21 }
  0x15   : > { %v4363_v11 = vld [vmem:[%s4788_s25 + $0x20] sm:$0xff]  ;;  %v4364_v13 = vld [vmem:[%s4788_s25 + $0x28] sm:$0xff]  ;;  %v4373_v14 = vld [vmem:[%s4788_s25 + $0x70] sm:$0xff]  ;;  %1298 = vst [vmem:[#allocation2 + $0x30] sm:$0x1] %v4705_v21 }
  0x16   : > { %v4365_v15 = vld [vmem:[%s4788_s25 + $0x30] sm:$0xff]  ;;  %v4374_v16 = vld [vmem:[%s4788_s25 + $0x78] sm:$0xff]  ;;  %v4367_v19 = vld [vmem:[%s4788_s25 + $0x40] sm:$0xff]  ;;  %1299 = vst [vmem:[#allocation2 + $0x48] sm:$0x1] %v4705_v21 }
  0x17   : > { %v4366_v17 = vld [vmem:[%s4788_s25 + $0x38] sm:$0xff]  ;;  %1300 = vst [vmem:[#allocation2 + $0x60] sm:$0x1] %v4705_v21 }
  0x18   : > { %1301 = vst [vmem:[#allocation2 + $0x78] sm:$0x1] %v4705_v21 }
  0x19   : > { %1302 = vst [vmem:[#allocation2 + $0x90] sm:$0x1] %v4705_v21 }
  0x1a   : > { %1303 = vst [vmem:[#allocation2 + $0xa8] sm:$0x1] %v4705_v21 }
  0x1b   : > { %1304 = vst [vmem:[#allocation2 + $0xc0] sm:$0x1] %v4705_v21 }
  0x1c   : > { %1305 = vst [vmem:[#allocation2 + $0xd8] sm:$0x1] %v4705_v21 }
  0x1d   : > { %1306 = vst [vmem:[#allocation2 + $0xf0] sm:$0x1] %v4705_v21 }
  0x1e   : > { %1307 = vst [vmem:[#allocation2 + $0x108] sm:$0x1] %v4705_v21 }
  0x1f   : > { %1308 = vst [vmem:[#allocation2 + $0x120] sm:$0x1] %v4705_v21 }
  0x20   : > { %1309 = vst [vmem:[#allocation2 + $0x138] sm:$0x1] %v4705_v21 }
  0x21   : > { %1310 = vst [vmem:[#allocation2 + $0x150] sm:$0x1] %v4705_v21 }
  0x22   : > { %1311 = vst [vmem:[#allocation2 + $0x168] sm:$0x1] %v4705_v21 }
  0x23   : > { %4242 = vmatmul.msk.bf16.gmra.mxu0 %vm507_vm1, %v4360_v5  ;;  %4251 = vmatmul.msk.bf16.gmra.mxu3 %vm507_vm1, %v4369_v6  ;;  %1312 = vst [vmem:[#allocation2 + $0x180] sm:$0x1] %v4705_v21 }
  0x24   : > { %1315 = vst [vmem:[#allocation2 + $0x29] sm:$0x1] %v4705_v21 }
  0x25   : > { %1316 = vst [vmem:[#allocation2 + $0x41] sm:$0x1] %v4705_v21 }
  0x26   : > { %1317 = vst [vmem:[#allocation2 + $0x59] sm:$0x1] %v4705_v21 }
  0x27   : > { %1318 = vst [vmem:[#allocation2 + $0x71] sm:$0x1] %v4705_v21 }
  0x28   : > { %1319 = vst [vmem:[#allocation2 + $0x89] sm:$0x1] %v4705_v21 }
  0x29   : > { %1320 = vst [vmem:[#allocation2 + $0xa1] sm:$0x1] %v4705_v21 }
  0x2a   : > { %1321 = vst [vmem:[#allocation2 + $0xb9] sm:$0x1] %v4705_v21 }
  0x2b   : > { %1322 = vst [vmem:[#allocation2 + $0xd1] sm:$0x1] %v4705_v21 }
  0x2c   : > { %1323 = vst [vmem:[#allocation2 + $0xe9] sm:$0x1] %v4705_v21 }
  0x2d   : > { %1324 = vst [vmem:[#allocation2 + $0x101] sm:$0x1] %v4705_v21 }
  0x2e   : > { %1325 = vst [vmem:[#allocation2 + $0x119] sm:$0x1] %v4705_v21 }
  0x2f   : > { %1326 = vst [vmem:[#allocation2 + $0x131] sm:$0x1] %v4705_v21 }
  0x30   : > { %1327 = vst [vmem:[#allocation2 + $0x149] sm:$0x1] %v4705_v21 }
  0x31   : > { %1328 = vst [vmem:[#allocation2 + $0x161] sm:$0x1] %v4705_v21 }
  0x32   : > { %1329 = vst [vmem:[#allocation2 + $0x179] sm:$0x1] %v4705_v21 }
  0x33   : > { %4243 = vmatmul.msk.bf16.gmra.mxu0 %vm507_vm1, %v4361_v7  ;;  %4252 = vmatmul.msk.bf16.gmra.mxu3 %vm507_vm1, %v4370_v8  ;;  %1330 = vst [vmem:[#allocation2 + $0x191] sm:$0x1] %v4705_v21 }
  0x34   : > { %1313 = vst [vmem:[#allocation2 + $0x198] sm:$0x1] %v4705_v21 }
  0x35   : > { %1314 = vst [vmem:[#allocation2 + $0x11] sm:$0x1] %v4705_v21 }
  0x36   : > { %1331 = vst [vmem:[#allocation2 + $0x1a9] sm:$0x1] %v4705_v21 }
  0x43   : > { %4244 = vmatmul.msk.bf16.gmra.mxu0 %vm507_vm1, %v4362_v9  ;;  %4253 = vmatmul.msk.bf16.gmra.mxu3 %vm507_vm1, %v4371_v10 }
  0x53   : > { %4245 = vmatmul.msk.bf16.gmra.mxu0 %vm507_vm1, %v4363_v11  ;;  %4254 = vmatmul.msk.bf16.gmra.mxu3 %vm507_vm1, %v4372_v12 }
  0x63   : > { %4246 = vmatmul.msk.bf16.gmra.mxu0 %vm507_vm1, %v4364_v13  ;;  %4255 = vmatmul.msk.bf16.gmra.mxu3 %vm507_vm1, %v4373_v14 }
  0x73   : > { %4247 = vmatmul.msk.bf16.gmra.mxu0 %vm507_vm1, %v4365_v15  ;;  %4256 = vmatmul.msk.bf16.gmra.mxu3 %vm507_vm1, %v4374_v16 }
  0x83   : > { %4248 = vmatmul.msk.bf16.gmra.mxu0 %vm507_vm1, %v4366_v17 }
  0x90   : > { %v569_v20 = vpop.f32.mrf.mxu0 }
  0x91   : > { %v4828_v22 = vadd.f32 %v4823_v18, %v569_v20 }
  0x93   : > { %v4257_v23 = vmul.f32 -1.442695, %v4828_v22  ;;  %4249 = vmatmul.msk.bf16.gmra.mxu0 %vm507_vm1, %v4367_v19 }
  0x95   : > { %4408 = vpow2.f32 %v4257_v23 }
  0x96   : > { %v614_v24 = vpop.f32.mrf.mxu3 }
  0x97   : > { %v4840_v25 = vadd.f32 %v4823_v18, %v614_v24 }
  0x98   : > { %v571_v26 = vpop.f32.mrf.mxu0 }
  0x99   : > { %v4844_v27 = vadd.f32 %v4823_v18, %v571_v26  ;;  %v4275_v28 = vmul.f32 -1.442695, %v4840_v25 }
  0x9b   : > { %v4409_v29 = vpop.eup %4408  ;;  %v4258_v30 = vmul.f32 -1.442695, %v4844_v27  ;;  %4410 = vpow2.f32 %v4275_v28 }
  0x9c   : > { %v745_v31 = vadd.f32 1.0, %v4409_v29 }
  0x9d   : > { %4412 = vpow2.f32 %v4258_v30 }
  0x9e   : > { %4414 = vrcp.f32 %v745_v31  ;;  %v616_v32 = vpop.f32.mrf.mxu3  ;;  %v788_v45 = vand.u32 2147483648, %v745_v31  ;;  %v786_v48 = vand.u32 2147483647, %v745_v31  ;;  %vm782_vm3 = vweird.f32 %v745_v31 }
  0x9f   : > { %v4855_v33 = vadd.f32 %v4823_v18, %v616_v32 }
  0xa0   : > { %v574_v34 = vpop.f32.mrf.mxu0  ;;  %v789_v53 = vor.u32 1.1754944e-38, %v788_v45  ;;  %vm787_vm5 = vcmp.eq.f32.partialorder %v786_v48, 8.507059e+37 }
  0xa1   : > { %v4276_v35 = vmul.f32 -1.442695, %v4855_v33  ;;  %v4411_v36 = vpop.eup %4410  ;;  %v4862_v37 = vadd.f32 %v4823_v18, %v574_v34 }
  0xa2   : > { %v4865_v39 = vadd.f32 1.0, %v4411_v36 }
  0xa3   : > { %v4413_v38 = vpop.eup %4412  ;;  %4416 = vpow2.f32 %v4276_v35  ;;  %v4259_v43 = vmul.f32 -1.442695, %v4862_v37 }
  0xa4   : > { %v4415_v40 = vpop.eup %4414  ;;  %v4868_v41 = vadd.f32 1.0, %v4413_v38  ;;  %4418 = vrcp.f32 %v4865_v39  ;;  %v1058_v55 = vand.u32 2147483648, %v4865_v39  ;;  %vm1052_vm6 = vweird.f32 %v4865_v39 }
  0xa5   : > { %v778_v42 = vmul.f32 %v4415_v40, %v745_v31  ;;  %vm783_vm2 = vweird.f32 %v4415_v40  ;;  %v1056_v60 = vand.u32 2147483647, %v4865_v39 }
  0xa6   : > { %4420 = vrcp.f32 %v4868_v41  ;;  %vm784_vm4 = vmor %vm782_vm3, %vm783_vm2  ;;  %v801_v63 = vand.u32 2147483647, %v4868_v41  ;;  %v1059_v2 = vor.u32 1.1754944e-38, %v1058_v55  ;;  %v803_v3 = vand.u32 2147483648, %v4868_v41  ;;  %v619_v4 = vpop.f32.mrf.mxu3 }
  0xa7   : > { %v779_v44 = vsub.f32 1.0, %v778_v42  ;;  %4422 = vpow2.f32 %v4259_v43  ;;  %v4905_v8 = vadd.f32 %v4823_v18, %v619_v4  ;;  %vm1057_vm10 = vcmp.eq.f32.partialorder %v1056_v60, 8.507059e+37 }
  0xa8   : > { %v576_v9 = vpop.f32.mrf.mxu0  ;;  %vm797_vm11 = vweird.f32 %v4868_v41  ;;  %vm802_vm12 = vcmp.eq.f32.partialorder %v801_v63, 8.507059e+37  ;;  %v804_v15 = vor.u32 1.1754944e-38, %v803_v3 }
  0xa9   : > { %v4417_v46 = vpop.eup %4416  ;;  %v780_v47 = vmul.f32 %v4415_v40, %v779_v44  ;;  %v4918_v17 = vadd.f32 %v4823_v18, %v576_v9  ;;  %v4277_v23 = vmul.f32 -1.442695, %v4905_v8 }
  0xaa   : > { %v4879_v49 = vadd.f32 1.0, %v4417_v46  ;;  %v4419_v50 = vpop.eup %4418 }
  0xab   : > { %v781_v51 = vadd.f32 %v4415_v40, %v780_v47  ;;  %v1048_v54 = vmul.f32 %v4419_v50, %v4865_v39  ;;  %vm1053_vm7 = vweird.f32 %v4419_v50  ;;  %v4260_v31 = vmul.f32 -1.442695, %v4918_v17 }
  0xac   : > { %v4421_v52 = vpop.eup %4420  ;;  %4424 = vrcp.f32 %v4879_v49  ;;  %vm4898_vm8 = vmor %vm1052_vm6, %vm1053_vm7  ;;  %v1073_v16 = vand.u32 2147483648, %v4879_v49  ;;  %vm1067_vm14 = vweird.f32 %v4879_v49  ;;  %v1071_v26 = vand.u32 2147483647, %v4879_v49 }
  0xad   : > { %v785_v56 = vsel %vm784_vm4, %v4415_v40, %v781_v51  ;;  %v793_v57 = vmul.f32 %v4421_v52, %v4868_v41  ;;  %v1049_v59 = vsub.f32 1.0, %v1048_v54  ;;  %v4423_v0 = vpop.eup %4422  ;;  %vm798_vm9 = vweird.f32 %v4421_v52 }
  0xae   : > { %v790_v58 = vsel %vm787_vm5, %v789_v53, %v785_v56  ;;  %v4902_v7 = vadd.f32 1.0, %v4423_v0  ;;  %vm799_vm13 = vmor %vm797_vm11, %vm798_vm9  ;;  %v1074_v34 = vor.u32 1.1754944e-38, %v1073_v16  ;;  %vm1072_vm1 = vcmp.eq.f32.partialorder %v1071_v26, 8.507059e+37  ;;  %v621_v41 = vpop.f32.mrf.mxu3 }
  0xaf   : > { %v1257_v61 = vmul.f32 %v790_v58, %v4828_v22  ;;  %v794_v62 = vsub.f32 1.0, %v793_v57  ;;  %v1050_v1 = vmul.f32 %v4419_v50, %v1049_v59  ;;  %v4935_v21 = vadd.f32 %v4823_v18, %v621_v41 }
  0xb0   : > { %4426 = vrcp.f32 %v4902_v7  ;;  %v579_v42 = vpop.f32.mrf.mxu0  ;;  %vm812_vm3 = vweird.f32 %v4902_v7  ;;  %v816_v51 = vand.u32 2147483647, %v4902_v7 }
  0xb1   : > { %1333 = vst [vmem:[#allocation2 + $0x19] sm:$0xff] %v1257_v61  ;;  %v795_v6 = vmul.f32 %v4421_v52, %v794_v62  ;;  %v1051_v11 = vadd.f32 %v4419_v50, %v1050_v1  ;;  %4428 = vpow2.f32 %v4277_v23  ;;  %v4938_v46 = vadd.f32 %v4823_v18, %v579_v42 }
  0xb2   : > { %v4425_v10 = vpop.eup %4424  ;;  %4430 = vpow2.f32 %v4260_v31  ;;  %v4278_v48 = vmul.f32 -1.442695, %v4935_v21  ;;  %vm817_vm5 = vcmp.eq.f32.partialorder %v816_v51, 8.507059e+37 }
  0xb3   : > { %v796_v12 = vadd.f32 %v4421_v52, %v795_v6  ;;  %v1063_v13 = vmul.f32 %v4425_v10, %v4879_v49  ;;  %v1055_v14 = vsel %vm4898_vm8, %v4419_v50, %v1051_v11  ;;  %vm1068_vm15 = vweird.f32 %v4425_v10 }
  0xb4   : > { %v1060_v19 = vsel %vm1057_vm10, %v1059_v2, %v1055_v14  ;;  %vm1069_vm0 = vmor %vm1067_vm14, %vm1068_vm15  ;;  %v818_v50 = vand.u32 2147483648, %v4902_v7 }
  0xb5   : > { %v800_v20 = vsel %vm799_vm13, %v4421_v52, %v796_v12  ;;  %v1064_v22 = vsub.f32 1.0, %v1063_v13  ;;  %v1275_v28 = vmul.f32 %v1060_v19, %v4840_v25 }
  0xb6   : > { %v805_v24 = vsel %vm802_vm12, %v804_v15, %v800_v20  ;;  %v4427_v32 = vpop.eup %4426  ;;  %v819_v54 = vor.u32 1.1754944e-38, %v818_v50  ;;  %v624_v23 = vpop.f32.mrf.mxu3 }
  0xb7   : > { %v1065_v29 = vmul.f32 %v4425_v10, %v1064_v22  ;;  %v1258_v30 = vmul.f32 %v805_v24, %v4844_v27  ;;  %1351 = vst [vmem:[#allocation2 + $0xf1] sm:$0xff] %v1275_v28  ;;  %v808_v36 = vmul.f32 %v4427_v32, %v4902_v7  ;;  %v4429_v39 = vpop.eup %4428  ;;  %vm813_vm2 = vweird.f32 %v4427_v32 }
  0xb8   : > { %v4431_v43 = vpop.eup %4430  ;;  %v765_v44 = vadd.f32 1.0, %v4429_v39  ;;  %vm814_vm4 = vmor %vm812_vm3, %vm813_vm2 }
  0xb9   : > { %v1066_v35 = vadd.f32 %v4425_v10, %v1065_v29  ;;  %1334 = vst [vmem:[#allocation2 + $0x21] sm:$0xff] %v1258_v30  ;;  %v809_v40 = vsub.f32 1.0, %v808_v36  ;;  %v748_v47 = vadd.f32 1.0, %v4431_v43  ;;  %v581_v29 = vpop.f32.mrf.mxu0  ;;  %v4953_v36 = vadd.f32 %v4823_v18, %v624_v23 }
  0xba   : > { %4432 = vrcp.f32 %v765_v44  ;;  %vm1082_vm6 = vweird.f32 %v765_v44  ;;  %v1088_v59 = vand.u32 2147483648, %v765_v44  ;;  %v1086_v62 = vand.u32 2147483647, %v765_v44 }
  0xbb   : > { %v1070_v25 = vsel %vm1069_vm0, %v4425_v10, %v1066_v35  ;;  %v810_v45 = vmul.f32 %v4427_v32, %v809_v40  ;;  %4434 = vrcp.f32 %v748_v47  ;;  %v833_v12 = vand.u32 2147483648, %v748_v47 }
  0xbc   : > { %v1075_v38 = vsel %vm1072_vm1, %v1074_v34, %v1070_v25  ;;  %4436 = vpow2.f32 %v4278_v48  ;;  %v1089_v3 = vor.u32 1.1754944e-38, %v1088_v59  ;;  %vm1087_vm9 = vcmp.eq.f32.partialorder %v1086_v62, 8.507059e+37 }
  0xbd   : > { %v1276_v27 = vmul.f32 %v1075_v38, %v4855_v33  ;;  %v811_v49 = vadd.f32 %v4427_v32, %v810_v45  ;;  %v4261_v33 = vmul.f32 -1.442695, %v4938_v46  ;;  %vm827_vm11 = vweird.f32 %v748_v47 }
  0xbe   : > { %v831_v13 = vand.u32 2147483647, %v748_v47  ;;  %v834_v16 = vor.u32 1.1754944e-38, %v833_v12  ;;  %v4279_v40 = vmul.f32 -1.442695, %v4953_v36  ;;  %v4958_v41 = vadd.f32 %v4823_v18, %v581_v29 }
  0xbf   : > { %1352 = vst [vmem:[#allocation2 + $0xf9] sm:$0xff] %v1276_v27  ;;  %v815_v53 = vsel %vm814_vm4, %v4427_v32, %v811_v49  ;;  %4438 = vpow2.f32 %v4261_v33  ;;  %v626_v27 = vpop.f32.mrf.mxu3 }
  0xc0   : > { %v4433_v52 = vpop.eup %4432  ;;  %v820_v56 = vsel %vm817_vm5, %v819_v54, %v815_v53  ;;  %vm832_vm13 = vcmp.eq.f32.partialorder %v831_v13, 8.507059e+37  ;;  %v4961_v43 = vadd.f32 %v4823_v18, %v626_v27 }
  0xc1   : > { %v4435_v55 = vpop.eup %4434  ;;  %v1078_v57 = vmul.f32 %v4433_v52, %v765_v44  ;;  %v1259_v60 = vmul.f32 %v820_v56, %v4862_v37  ;;  %vm1083_vm7 = vweird.f32 %v4433_v52  ;;  %v584_v42 = vpop.f32.mrf.mxu0  ;;  %v1365_v56 = vld [vmem:[#allocation2] sm:$0xff] }
  0xc2   : > { %v4437_v58 = vpop.eup %4436  ;;  %v823_v0 = vmul.f32 %v4435_v55, %v748_v47  ;;  %vm1084_vm8 = vmor %vm1082_vm6, %vm1083_vm7  ;;  %vm828_vm10 = vweird.f32 %v4435_v55  ;;  %v4964_v45 = vadd.f32 %v4823_v18, %v584_v42  ;;  %v4280_v49 = vmul.f32 -1.442695, %v4961_v43 }
  0xc3   : > { %v1079_v61 = vsub.f32 1.0, %v1078_v57  ;;  %1335 = vst [vmem:[#allocation2 + $0x31] sm:$0xff] %v1259_v60  ;;  %v766_v2 = vadd.f32 1.0, %v4437_v58  ;;  %vm829_vm12 = vmor %vm827_vm11, %vm828_vm10  ;;  %vm1681_vm6 = vcmask 1046528  }
  0xc4   : > { %v824_v4 = vsub.f32 1.0, %v823_v0  ;;  %v4263_v50 = vmul.f32 -1.442695, %v4964_v45  ;;  %v4990_v0 = vld [vmem:[#allocation2 + $0x18] sm:$0xff] }
  0xc5   : > { %v4439_v63 = vpop.eup %4438  ;;  %v1080_v1 = vmul.f32 %v4433_v52, %v1079_v61  ;;  %4440 = vrcp.f32 %v766_v2  ;;  %v1103_v26 = vand.u32 2147483648, %v766_v2  ;;  %vm1097_vm14 = vweird.f32 %v766_v2 }
  0xc6   : > { %v4946_v6 = vadd.f32 1.0, %v4439_v63  ;;  %v825_v7 = vmul.f32 %v4435_v55, %v824_v4  ;;  %v5001_v4 = vld [vmem:[#allocation2 + $0x20] sm:$0xff] }
  0xc7   : > { %v1081_v5 = vadd.f32 %v4433_v52, %v1080_v1  ;;  %v1104_v32 = vor.u32 1.1754944e-38, %v1103_v26 }
  0xc8   : > { %v826_v37 = vadd.f32 %v4435_v55, %v825_v7  ;;  %4442 = vrcp.f32 %v4946_v6  ;;  %v848_v47 = vand.u32 2147483648, %v4946_v6  ;;  %vm842_vm3 = vweird.f32 %v4946_v6 }
  0xc9   : > { %v1085_v9 = vsel %vm1084_vm8, %v4433_v52, %v1081_v5  ;;  %4444 = vpow2.f32 %v4279_v40  ;;  %v846_v48 = vand.u32 2147483647, %v4946_v6  ;;  %v4975_v52 = vld [vmem:[%s9066_s3] sm:$0xff] }
  0xca   : > { %v1090_v10 = vsel %vm1087_vm9, %v1089_v3, %v1085_v9  ;;  %v830_v15 = vsel %vm829_vm12, %v4435_v55, %v826_v37  ;;  %v849_v51 = vor.u32 1.1754944e-38, %v848_v47  ;;  %v4978_v55 = vperm.slane %v4975_v52, 1  ;;  %v5010_v37 = vld [vmem:[#allocation2 + $0x30] sm:$0xff] }
  0xcb   : > { %v1277_v11 = vmul.f32 %v1090_v10, %v4905_v8  ;;  %v4441_v14 = vpop.eup %4440  ;;  %v835_v20 = vsel %vm832_vm13, %v834_v16, %v830_v15  ;;  %v1101_v8 = vand.u32 2147483647, %v766_v2  ;;  %vm847_vm5 = vcmp.eq.f32.partialorder %v846_v48, 8.507059e+37  ;;  %v5008_v10 = vld [vmem:[#allocation2 + $0x28] sm:$0x3] }
  0xcc   : > { %v1093_v22 = vmul.f32 %v4441_v14, %v766_v2  ;;  %v1260_v24 = vmul.f32 %v835_v20, %v4918_v17  ;;  %vm1098_vm15 = vweird.f32 %v4441_v14  ;;  %v4981_v57 = vperm.slane %v4975_v52, 0  ;;  %v1367_v2 = vld [vmem:[#allocation2 + $0x10] sm:$0x3] }
  0xcd   : > { %1353 = vst [vmem:[#allocation2 + $0x109] sm:$0xff] %v1277_v11  ;;  %vm1099_vm0 = vmor %vm1097_vm14, %vm1098_vm15  ;;  %vm1102_vm1 = vcmp.eq.f32.partialorder %v1101_v8, 8.507059e+37  ;;  %v4987_v61 = vperm.slane %v4975_v52, 3  ;;  %v1585_v62 = vmul.f32 %v4978_v55, %v1365_v56  ;;  %v4993_v1 = vperm.slane %v4975_v52, 2 }
  0xce   : > { %v4443_v19 = vpop.eup %4442  ;;  %v1094_v28 = vsub.f32 1.0, %v1093_v22  ;;  %1336 = vst [vmem:[#allocation2 + $0x39] sm:$0xff] %v1260_v24  ;;  %v4996_v3 = vperm.slane %v4975_v52, 4  ;;  %v1586_v5 = vmul.f32 0.0, %v4978_v55  ;;  %v1422_v7 = vmul.f32 %v4981_v57, %v1365_v56 }
  0xcf   : > { %v838_v30 = vmul.f32 %v4443_v19, %v4946_v6  ;;  %vm843_vm2 = vweird.f32 %v4443_v19  ;;  %v4445_v53 = vpop.eup %4444  ;;  %9234 = vst [vmem:[#allocation4_spill] sm:$0xff] %v4981_v57  ;;  %v5006_v9 = vmul.f32 %v4993_v1, %v1365_v56  ;;  %v1455_v12 = vmul.f32 %v4987_v61, %v4990_v0 }
  0xd0   : > { %v1095_v31 = vmul.f32 %v4441_v14, %v1094_v28  ;;  %vm844_vm4 = vmor %vm842_vm3, %vm843_vm2  ;;  %v4984_v59 = vadd.f32 1.0, %v4445_v53  ;;  %9235 = vst [vmem:[#allocation5_spill] sm:$0xff] %v4987_v61  ;;  %v1682_v13 = vrot.slane %v1585_v62, 1  ;;  %v1587_v15 = vmul.f32 %v4978_v55, %v1367_v2 }
  0xd1   : > { %v839_v35 = vsub.f32 1.0, %v838_v30  ;;  %9236 = vst [vmem:[#allocation6_spill] sm:$0xff] %v4993_v1  ;;  %v1423_v20 = vmul.f32 0.0, %v4981_v57  ;;  %v1456_v22 = vmul.f32 %v4987_v61, %v5001_v4  ;;  %v1828_v23 = vmul.f32 %v4996_v3, %v5001_v4 }
  0xd2   : > { %v1096_v34 = vadd.f32 %v4441_v14, %v1095_v31  ;;  %9237 = vst [vmem:[#allocation7_spill] sm:$0xff] %v4996_v3  ;;  %v1683_v24 = vrot.slane %v1586_v5, 1  ;;  %v1829_v26 = vmul.f32 %v4996_v3, %v5008_v10  ;;  %v1827_v29 = vmul.f32 %v4996_v3, %v4990_v0 }
  0xd3   : > { %v840_v39 = vmul.f32 %v4443_v19, %v839_v35  ;;  %v1685_v35 = vrot.slane %v1587_v15, 1  ;;  %v5051_v27 = vmul.f32 0.0, %v4993_v1  ;;  %v1116_v53 = vand.u32 2147483647, %v4984_v59 }
  0xd4   : > { %v1100_v25 = vsel %vm1099_vm0, %v4441_v14, %v1096_v34  ;;  %v1684_v40 = vsel %vm1681_vm6, %v1682_v13, %v1683_v24  ;;  %v1926_v42 = vrot.slane %v1829_v26, 1  ;;  %v1923_v47 = vrot.slane %v1827_v29, 1 }
  0xd5   : > { %v1105_v17 = vsel %vm1102_vm1, %v1104_v32, %v1100_v25  ;;  %v841_v44 = vadd.f32 %v4443_v19, %v840_v39  ;;  %v5017_v14 = vld [vmem:[#allocation2 + $0x38] sm:$0xff]  ;;  %v1487_v32 = vadd.f32 %v1455_v12, %v1422_v7  ;;  %v5045_v34 = vld [vmem:[#allocation2 + $0x40] sm:$0x3]  ;;  %v2406_v56 = vrot.slane %v5006_v9, 2 }
  0xd6   : > { %v1278_v38 = vmul.f32 %v1105_v17, %v4935_v21  ;;  %v4262_v21 = vmul.f32 -1.442695, %v4958_v41  ;;  %v1488_v17 = vadd.f32 %v1456_v22, %v1423_v20  ;;  %v1118_v7 = vand.u32 2147483648, %v4984_v59 }
  0xd7   : > { %v845_v33 = vsel %vm844_vm4, %v4443_v19, %v841_v44  ;;  %v5023_v19 = vperm.slane %v4975_v52, 7  ;;  %vm1112_vm7 = vweird.f32 %v4984_v59  ;;  %vm5089_vm9 = vcmp.eq.f32.partialorder %v1116_v53, 8.507059e+37 }
  0xd8   : > { %1354 = vst [vmem:[#allocation2 + $0x111] sm:$0xff] %v1278_v38  ;;  %4446 = vpow2.f32 %v4262_v21  ;;  %v850_v54 = vsel %vm847_vm5, %v849_v51, %v845_v33  ;;  %v1924_v38 = vrot.slane %v1828_v23, 1  ;;  %v5063_v33 = vperm.slane %v4975_v52, 5 }
  0xd9   : > { %4448 = vpow2.f32 %v4280_v49  ;;  %v1261_v58 = vmul.f32 %v850_v54, %v4938_v46  ;;  %v4999_v46 = vperm.slane %v4975_v52, 6  ;;  %9239 = vst [vmem:[#allocation9_spill] sm:$0xff] %v5023_v19  ;;  %v5042_v31 = vmul.f32 %v5023_v19, %v5017_v14 }
  0xda   : > { %4450 = vpow2.f32 %v4263_v50  ;;  %v2068_v39 = vmul.f32 %v5023_v19, %v5010_v37  ;;  %v5059_v48 = vmul.f32 %v5023_v19, %v5045_v34  ;;  %9240 = vst [vmem:[#allocation10_spill] sm:$0xff] %v5063_v33  ;;  %v1686_v50 = vsel %vm1681_vm6, %v1683_v24, %v1685_v35 }
  0xdb   : > { %1337 = vst [vmem:[#allocation2 + $0x49] sm:$0xff] %v1261_v58  ;;  %4452 = vrcp.f32 %v4984_v59  ;;  %v1520_v28 = vmul.f32 %v4999_v46, %v5010_v37  ;;  %v1521_v30 = vmul.f32 %v4999_v46, %v5017_v14  ;;  %v2165_v49 = vrot.slane %v5042_v31, 1  ;;  %v5168_v31 = vld [vmem:[%s9066_s3 + $0x8] ss:$0 sm:$0xff] }
  0xdc   : > { %9238 = vst [vmem:[#allocation8_spill] sm:$0xff] %v4999_v46  ;;  %v5071_v58 = vsel %vm1681_vm6, %v1923_v47, %v1924_v38  ;;  %v2164_v62 = vrot.slane %v2068_v39, 1  ;;  %v1927_v52 = vsel %vm1681_vm6, %v1924_v38, %v1926_v42  ;;  %v2167_v15 = vrot.slane %v5059_v48, 1 }
  0xdd   : > { %v1552_v44 = vadd.f32 %v1520_v28, %v1487_v32  ;;  %v1553_v21 = vadd.f32 %v1521_v30, %v1488_v17  ;;  %v1119_v30 = vor.u32 1.1754944e-38, %v1118_v7  ;;  %vm2405_vm15 = vcmask 1045504   ;;  %v629_v7 = vpop.f32.mrf.mxu3 }
  0xde   : > { %v4447_v60 = vpop.eup %4446  ;;  %v5082_v13 = vsel %vm1681_vm6, %v2164_v62, %v2165_v49  ;;  %v5178_v9 = vmul.f32 %v4993_v1, %v4990_v0 }
  0xdf   : > { %v4449_v63 = vpop.eup %4448  ;;  %v5013_v11 = vadd.f32 1.0, %v4447_v60  ;;  %v2407_v60 = vrot.slane %v5051_v27, 2  ;;  %v1794_v5 = vadd.f32 %v1684_v40, %v1552_v44  ;;  %v1795_v12 = vadd.f32 %v1686_v50, %v1553_v21 }
  0xe0   : > { %v4451_v6 = vpop.eup %4450  ;;  %v5020_v16 = vadd.f32 1.0, %v4449_v63  ;;  %v5188_v50 = vmul.f32 %v4981_v57, %v4990_v0  ;;  %v2411_v53 = vrot.slane %v5178_v9, 2 }
  0xe1   : > { %v5034_v8 = vadd.f32 1.0, %v4451_v6  ;;  %4454 = vrcp.f32 %v5013_v11  ;;  %v5048_v25 = vpop.eup %4452  ;;  %v5076_v6 = vmul.f32 %v4993_v1, %v1367_v2  ;;  %v861_v24 = vand.u32 2147483647, %v5013_v11 }
  0xe2   : > { %4456 = vrcp.f32 %v5020_v16  ;;  %v1108_v51 = vmul.f32 %v5048_v25, %v4984_v59  ;;  %vm1113_vm8 = vweird.f32 %v5048_v25  ;;  %v863_v26 = vand.u32 2147483648, %v5013_v11 }
  0xe3   : > { %4458 = vrcp.f32 %v5034_v8  ;;  %v1131_v29 = vand.u32 2147483647, %v5020_v16  ;;  %v1133_v35 = vand.u32 2147483648, %v5020_v16  ;;  %vm5100_vm10 = vmor %vm1112_vm7, %vm1113_vm8  ;;  %vm1127_vm11 = vweird.f32 %v5020_v16 }
  0xe4   : > { %v1109_v22 = vsub.f32 1.0, %v1108_v51  ;;  %vm857_vm13 = vweird.f32 %v5013_v11  ;;  %vm5109_vm0 = vcmp.eq.f32.partialorder %v861_v24, 8.507059e+37  ;;  %v864_v47 = vor.u32 1.1754944e-38, %v863_v26 }
  0xe5   : > { %vm5113_vm1 = vcmp.eq.f32.partialorder %v1131_v29, 8.507059e+37  ;;  %v876_v24 = vand.u32 2147483647, %v5034_v8  ;;  %v878_v26 = vand.u32 2147483648, %v5034_v8  ;;  %vm872_vm5 = vweird.f32 %v5034_v8 }
  0xe6   : > { %v1110_v59 = vmul.f32 %v5048_v25, %v1109_v22 }
  0xe7   : > { %v4455_v54 = vpop.eup %4454  ;;  %vm877_vm8 = vcmp.eq.f32.partialorder %v876_v24, 8.507059e+37 }
  0xe8   : > { %v4457_v63 = vpop.eup %4456  ;;  %v853_v23 = vmul.f32 %v4455_v54, %v5013_v11  ;;  %v1111_v40 = vadd.f32 %v5048_v25, %v1110_v59  ;;  %vm858_vm14 = vweird.f32 %v4455_v54  ;;  %v1134_v11 = vor.u32 1.1754944e-38, %v1133_v35 }
  0xe9   : > { %v5086_v20 = vpop.eup %4458  ;;  %v1123_v28 = vmul.f32 %v4457_v63, %v5020_v16  ;;  %vm1128_vm12 = vweird.f32 %v4457_v63  ;;  %vm859_vm3 = vmor %vm857_vm13, %vm858_vm14  ;;  %v2036_v59 = vadd.f32 %v1927_v52, %v1795_v12  ;;  %v2035_v52 = vadd.f32 %v5071_v58, %v1794_v5 }
  0xea   : > { %v854_v32 = vsub.f32 1.0, %v853_v23  ;;  %v868_v39 = vmul.f32 %v5086_v20, %v5034_v8  ;;  %v1115_v16 = vsel %vm5100_vm10, %v5048_v25, %v1111_v40  ;;  %vm5120_vm2 = vmor %vm1127_vm11, %vm1128_vm12  ;;  %vm873_vm4 = vweird.f32 %v5086_v20  ;;  %v586_v40 = vpop.f32.mrf.mxu0 }
  0xeb   : > { %v1124_v38 = vsub.f32 1.0, %v1123_v28  ;;  %v1120_v22 = vsel %vm5089_vm9, %v1119_v30, %v1115_v16  ;;  %v5136_v30 = vadd.f32 %v4823_v18, %v629_v7  ;;  %v2409_v12 = vrot.slane %v5076_v6, 2  ;;  %vm874_vm7 = vmor %vm872_vm5, %vm873_vm4  ;;  %v1395_v16 = vld [vmem:[#allocation2 + $0xf0] sm:$0xff] }
  0xec   : > { %v855_v42 = vmul.f32 %v4455_v54, %v854_v32  ;;  %v869_v62 = vsub.f32 1.0, %v868_v39  ;;  %v1279_v28 = vmul.f32 %v1120_v22, %v4953_v36  ;;  %v2168_v8 = vsel %vm1681_vm6, %v2165_v49, %v2167_v15 }
  0xed   : > { %v1125_v21 = vmul.f32 %v4457_v63, %v1124_v38  ;;  %v2552_v38 = vmul.f32 %v5063_v33, %v5001_v4  ;;  %v4281_v5 = vmul.f32 -1.442695, %v5136_v30  ;;  %v2551_v6 = vmul.f32 %v5063_v33, %v4990_v0 }
  0xee   : > { %v856_v51 = vadd.f32 %v4455_v54, %v855_v42  ;;  %v870_v29 = vmul.f32 %v5086_v20, %v869_v62  ;;  %1355 = vst [vmem:[#allocation2 + $0x121] sm:$0xff] %v1279_v28  ;;  %v2277_v48 = vadd.f32 %v2168_v8, %v2036_v59  ;;  %v1588_v15 = vmul.f32 %v4978_v55, %v4990_v0 }
  0xef   : > { %v1126_v23 = vadd.f32 %v4457_v63, %v1125_v21  ;;  %v2793_v42 = vmul.f32 %v5168_v31, %v5017_v14  ;;  %4460 = vpow2.f32 %v4281_v5  ;;  %v2647_v27 = vrot.slane %v2551_v6, 2 }
  0xf0   : > { %v860_v25 = vsel %vm859_vm3, %v4455_v54, %v856_v51  ;;  %v871_v54 = vadd.f32 %v5086_v20, %v870_v29  ;;  %v1687_v51 = vrot.slane %v1588_v15, 1  ;;  %v1589_v7 = vmul.f32 %v4978_v55, %v5001_v4 }
  0xf1   : > { %v865_v32 = vsel %vm5109_vm0, %v864_v47, %v860_v25  ;;  %v1130_v2 = vsel %vm5120_vm2, %v4457_v63, %v1126_v23  ;;  %v879_v63 = vor.u32 1.1754944e-38, %v878_v26  ;;  %v2889_v62 = vrot.slane %v2793_v42, 2  ;;  %v631_v26 = vpop.f32.mrf.mxu3 }
  0xf2   : > { %v1262_v35 = vmul.f32 %v865_v32, %v4958_v41  ;;  %v1135_v36 = vsel %vm5113_vm1, %v1134_v11, %v1130_v2  ;;  %v2553_v41 = vmul.f32 %v5063_v33, %v5008_v10  ;;  %v875_v39 = vsel %vm874_vm7, %v5086_v20, %v871_v54  ;;  %v589_v59 = vpop.f32.mrf.mxu0 }
  0xf3   : > { %v1280_v17 = vmul.f32 %v1135_v36, %v4961_v43  ;;  %v2276_v43 = vadd.f32 %v5082_v13, %v2035_v52  ;;  %v880_v58 = vsel %vm877_vm8, %v879_v63, %v875_v39  ;;  %v2408_v20 = vsel %vm2405_vm15, %v2406_v56, %v2407_v60  ;;  %v1397_v39 = vld [vmem:[#allocation2 + $0x100] sm:$0x3] }
  0xf4   : > { %1338 = vst [vmem:[#allocation2 + $0x51] sm:$0xff] %v1262_v35  ;;  %v1263_v49 = vmul.f32 %v880_v58, %v4964_v45  ;;  %v2410_v13 = vsel %vm2405_vm15, %v2407_v60, %v2409_v12  ;;  %v2648_v56 = vrot.slane %v2552_v38, 2  ;;  %v2650_v44 = vrot.slane %v2553_v41, 2  ;;  %v1396_v41 = vld [vmem:[#allocation2 + $0xf8] sm:$0xff] }
  0xf5   : > { %1356 = vst [vmem:[#allocation2 + $0x129] sm:$0xff] %v1280_v17  ;;  %v2518_v47 = vadd.f32 %v2408_v20, %v2276_v43  ;;  %v2794_v45 = vmul.f32 %v5168_v31, %v5045_v34  ;;  %v2792_v60 = vmul.f32 %v5168_v31, %v5010_v37  ;;  %v2519_v21 = vadd.f32 %v2410_v13, %v2277_v48  ;;  %v4461_v32 = vpop.eup %4460 }
  0xf6   : > { %1339 = vst [vmem:[#allocation2 + $0x61] sm:$0xff] %v1263_v49  ;;  %v2649_v11 = vsel %vm2405_vm15, %v2647_v27, %v2648_v56  ;;  %v2651_v22 = vsel %vm2405_vm15, %v2648_v56, %v2650_v44  ;;  %v5196_v28 = vmul.f32 %v4981_v57, %v1395_v16  ;;  %v5199_v0 = vmul.f32 %v4987_v61, %v1395_v16 }
  0xf7   : > { %v2759_v23 = vadd.f32 %v2649_v11, %v2518_v47  ;;  %v2891_v24 = vrot.slane %v2794_v45, 2  ;;  %v2888_v25 = vrot.slane %v2792_v60, 2  ;;  %v2760_v29 = vadd.f32 %v2651_v22, %v2519_v21 }
  0xf8   : > { %9251 = vst [vmem:[#allocation11_spill] sm:$0xff] %v5196_v28  ;;  %v5202_v2 = vmul.f32 %v4999_v46, %v1395_v16  ;;  %v1590_v35 = vmul.f32 %v4978_v55, %v5008_v10  ;;  %v2313_v36 = vmul.f32 %v4993_v1, %v5001_v4  ;;  %v5209_v54 = vadd.f32 %v4823_v18, %v586_v40  ;;  %v5225_v40 = vld [vmem:[%s9067_s4] ss:$0 sm:$0xff] }
  0xf9   : > { %9252 = vst [vmem:[#allocation12_spill] sm:$0xff] %v5199_v0  ;;  %v5212_v52 = vmul.f32 %v4996_v3, %v1395_v16  ;;  %v5215_v12 = vmul.f32 %v5023_v19, %v1395_v16  ;;  %v2890_v17 = vsel %vm2405_vm15, %v2888_v25, %v2889_v62  ;;  %v5219_v63 = vadd.f32 %v4823_v18, %v631_v26 }
  0xfa   : > { %9253 = vst [vmem:[#allocation13_spill] sm:$0xff] %v5202_v2  ;;  %v1688_v38 = vrot.slane %v1589_v7, 1  ;;  %v2892_v8 = vsel %vm2405_vm15, %v2889_v62, %v2891_v24  ;;  %v3000_v43 = vadd.f32 %v2890_v17, %v2759_v23  ;;  %v5228_v58 = vadd.f32 %v4823_v18, %v589_v59 }
  0xfb   : > { %9254 = vst [vmem:[#allocation14_spill] sm:$0xff] %v5212_v52  ;;  %v5231_v5 = vmul.f32 %v4978_v55, %v1395_v16  ;;  %v5235_v6 = vmul.f32 %v4981_v57, %v5001_v4  ;;  %v3001_v20 = vadd.f32 %v2892_v8, %v2760_v29  ;;  %v5237_v48 = vadd.f32 1.0, %v4461_v32 }
  0xfc   : > { %9255 = vst [vmem:[#allocation15_spill] sm:$0xff] %v5215_v12  ;;  %v1690_v49 = vrot.slane %v1590_v35, 1  ;;  %v2314_v13 = vmul.f32 %v4993_v1, %v5008_v10  ;;  %v2412_v15 = vrot.slane %v2313_v36, 2  ;;  %v4264_v9 = vmul.f32 -1.442695, %v5209_v54 }
  0xfd   : > { %9256 = vst [vmem:[#allocation16_spill] sm:$0xff] %v5231_v5  ;;  %v5244_v56 = vmul.f32 %v4996_v3, %v1396_v41  ;;  %v1856_v42 = vmul.f32 %v4996_v3, %v1397_v39  ;;  %v4282_v4 = vmul.f32 -1.442695, %v5219_v63  ;;  %v5250_v47 = vsel %vm1681_vm6, %v1687_v51, %v1688_v38 }
  0xfe   : > { %v5253_v45 = vadd.f32 %v5225_v40, %v3000_v43  ;;  %v4265_v10 = vmul.f32 -1.442695, %v5228_v58  ;;  %v5257_v27 = vmul.f32 %v5023_v19, %v1396_v41  ;;  %v2094_v60 = vmul.f32 %v5023_v19, %v1397_v39 }
  0xff   : > { %9257 = vst [vmem:[#allocation17_spill] sm:$0xff] %v5244_v56  ;;  %v5261_v21 = vadd.f32 %v5225_v40, %v3001_v20  ;;  %4462 = vrcp.f32 %v5237_v48  ;;  %v5265_v16 = vsel %vm1681_vm6, %v1688_v38, %v1690_v49  ;;  %v5268_v51 = vsel %vm2405_vm15, %v2411_v53, %v2412_v15 }
 0x100   : > { %9258 = vst [vmem:[#allocation18_spill] sm:$0xff] %v5253_v45  ;;  %v2414_v11 = vrot.slane %v2314_v13, 2  ;;  %4464 = vpow2.f32 %v4264_v9  ;;  %v5271_v62 = vmul.f32 %v4978_v55, %v1397_v39  ;;  %v9076_v7 = vrot.slane %v5244_v56, 1  ;;  %v1398_v9 = vld [vmem:[#allocation2 + $0x108] sm:$0xff] }
 0x101   : > { %9259 = vst [vmem:[#allocation19_spill] sm:$0xff] %v5257_v27  ;;  %v1971_v22 = vrot.slane %v1856_v42, 1  ;;  %4466 = vpow2.f32 %v4282_v4  ;;  %v5275_v23 = vmul.f32 %v4993_v1, %v1397_v39  ;;  %v5278_v24 = vmul.f32 %v5063_v33, %v1397_v39 }
 0x102   : > { %9260 = vst [vmem:[#allocation20_spill] sm:$0xff] %v5261_v21  ;;  %v4289_v26 = vmul.f32 -1.442695, %v5253_v45  ;;  %4468 = vpow2.f32 %v4265_v10  ;;  %v9075_v53 = vrot.slane %v5257_v27, 1  ;;  %v2207_v25 = vrot.slane %v2094_v60, 1 }
 0x103   : > { %9261 = vst [vmem:[#allocation21_spill] sm:$0xff] %v5271_v62  ;;  %v5283_v29 = vmul.f32 %v5168_v31, %v1397_v39  ;;  %v4290_v59 = vmul.f32 -1.442695, %v5261_v21  ;;  %v5287_v32 = vmul.f32 %v4987_v61, %v1396_v41  ;;  %v5290_v35 = vmul.f32 %v4999_v46, %v1396_v41 }
 0x104   : > { %9262 = vst [vmem:[#allocation22_spill] sm:$0xff] %v5275_v23  ;;  %v1457_v36 = vmul.f32 %v4987_v61, %v5010_v37  ;;  %v5296_v17 = vmul.f32 %v4978_v55, %v5010_v37  ;;  %v5301_v39 = vsel %vm2405_vm15, %v2412_v15, %v2414_v11  ;;  %v5305_v8 = vmul.f32 %v4996_v3, %v5010_v37 }
 0x105   : > { %9263 = vst [vmem:[#allocation23_spill] sm:$0xff] %v5278_v24  ;;  %v5298_v38 = vpop.eup %4462  ;;  %v5309_v41 = vmul.f32 %v4993_v1, %v5010_v37  ;;  %v5313_v43 = vmul.f32 %v5063_v33, %v5010_v37  ;;  %v5319_v13 = vsel %vm1681_vm6, %v9076_v7, %v1971_v22  ;;  %4470 = vpow2.f32 %v4289_v26 }
 0x106   : > { %9264 = vst [vmem:[#allocation24_spill] sm:$0xff] %v5283_v29  ;;  %v4465_v20 = vpop.eup %4464  ;;  %v5325_v4 = vsel %vm1681_vm6, %v9075_v53, %v2207_v25  ;;  %4472 = vpow2.f32 %v4290_v59  ;;  %v5331_v22 = vmul.f32 %v4981_v57, %v5010_v37  ;;  %v1489_v15 = vadd.f32 %v1457_v36, %v5188_v50  ;;  %v5358_v53 = vld [vmem:[#allocation2 + $0x48] sm:$0xff] }
 0x107   : > { %9265 = vst [vmem:[#allocation25_spill] sm:$0xff] %v5287_v32  ;;  %v4467_v42 = vpop.eup %4466  ;;  %v1138_v44 = vmul.f32 %v5298_v38, %v5237_v48  ;;  %v5341_v59 = vmul.f32 %v4987_v61, %v1398_v9  ;;  %v1458_v37 = vmul.f32 %v4987_v61, %v5017_v14  ;;  %vm1142_vm9 = vweird.f32 %v5237_v48 }
 0x108   : > { %9266 = vst [vmem:[#allocation26_spill] sm:$0xff] %v5290_v35  ;;  %v4469_v11 = vpop.eup %4468  ;;  %v5346_v50 = vadd.f32 1.0, %v4465_v20  ;;  %vm1143_vm10 = vweird.f32 %v5298_v38  ;;  %v1148_v36 = vand.u32 2147483648, %v5237_v48  ;;  %v5350_v18 = vadd.f32 1.0, %v4467_v42 }
 0x109   : > { %9267 = vst [vmem:[#allocation27_spill] sm:$0xff] %v5319_v13  ;;  %v1139_v60 = vsub.f32 1.0, %v1138_v44  ;;  %v5352_v7 = vadd.f32 1.0, %v4469_v11  ;;  %v5356_v10 = vmul.f32 %v4978_v55, %v5017_v14  ;;  %v1146_v20 = vand.u32 2147483647, %v5237_v48  ;;  %vm5391_vm11 = vmor %vm1142_vm9, %vm1143_vm10 }
 0x10a   : > { %9268 = vst [vmem:[#allocation28_spill] sm:$0xff] %v5325_v4  ;;  %4474 = vrcp.f32 %v5346_v50  ;;  %v5365_v42 = vmul.f32 %v4978_v55, %v5045_v34  ;;  %v5369_v11 = vmul.f32 %v4996_v3, %v5017_v14  ;;  %v5373_v26 = vmul.f32 %v4996_v3, %v5045_v34 }
 0x10b   : > { %9269 = vst [vmem:[#allocation29_spill] sm:$0xff] %v5341_v59  ;;  %v4471_v49 = vpop.eup %4470  ;;  %v1140_v44 = vmul.f32 %v5298_v38, %v1139_v60  ;;  %4476 = vrcp.f32 %v5350_v18  ;;  %v5377_v60 = vmul.f32 %v4999_v46, %v1398_v9  ;;  %v5380_v29 = vmul.f32 %v5023_v19, %v1398_v9 }
 0x10c   : > { %v4473_v25 = vpop.eup %4472  ;;  %v5384_v24 = vmul.f32 %v4981_v57, %v5017_v14  ;;  %v5395_v12 = vadd.f32 1.0, %v4471_v49  ;;  %v1522_v9 = vmul.f32 %v4999_v46, %v5358_v53  ;;  %4478 = vrcp.f32 %v5352_v7  ;;  %v5428_v49 = vld [vmem:[#allocation2 + $0x50] sm:$0xff] }
 0x10d   : > { %9270 = vst [vmem:[#allocation30_spill] sm:$0xff] %v5377_v60  ;;  %v1141_v23 = vadd.f32 %v5298_v38, %v1140_v44  ;;  %v5401_v27 = vadd.f32 %v1458_v37, %v5235_v6  ;;  %v5404_v13 = vadd.f32 1.0, %v4473_v25  ;;  %vm1147_vm12 = vcmp.eq.f32.partialorder %v1146_v20, 8.507059e+37 }
 0x10e   : > { %9271 = vst [vmem:[#allocation31_spill] sm:$0xff] %v5380_v29  ;;  %v1149_v29 = vor.u32 1.1754944e-38, %v1148_v36  ;;  %v5414_v6 = vmul.f32 %v4993_v1, %v5017_v14  ;;  %v5418_v25 = vmul.f32 %v4993_v1, %v5045_v34  ;;  %v5422_v37 = vmul.f32 %v5063_v33, %v5017_v14 }
 0x10f   : > { %v1145_v36 = vsel %vm5391_vm11, %v5298_v38, %v1141_v23  ;;  %v5426_v20 = vmul.f32 %v5063_v33, %v5045_v34  ;;  %4480 = vrcp.f32 %v5395_v12  ;;  %v5431_v38 = vadd.f32 %v1522_v9, %v1489_v15 }
 0x110   : > { %v4475_v56 = vpop.eup %4474  ;;  %v1150_v4 = vsel %vm1147_vm12, %v1149_v29, %v1145_v36  ;;  %4482 = vrcp.f32 %v5404_v13  ;;  %v893_v14 = vand.u32 2147483648, %v5346_v50  ;;  %v1523_v35 = vmul.f32 %v4999_v46, %v5428_v49  ;;  %v5486_v46 = vld [vmem:[#allocation2 + $0x58] sm:$0x3] }
 0x111   : > { %v4477_v23 = vpop.eup %4476  ;;  %v883_v52 = vmul.f32 %v4475_v56, %v5346_v50  ;;  %v1281_v48 = vmul.f32 %v1150_v4, %v5136_v30  ;;  %v1161_v62 = vand.u32 2147483647, %v5350_v18  ;;  %v1163_v15 = vand.u32 2147483648, %v5350_v18 }
 0x112   : > { %v1153_v44 = vmul.f32 %v4477_v23, %v5350_v18  ;;  %v4479_v34 = vpop.eup %4478  ;;  %vm1157_vm13 = vweird.f32 %v5350_v18  ;;  %vm1158_vm14 = vweird.f32 %v4477_v23  ;;  %v5446_v9 = vmul.f32 %v5023_v19, %v5428_v49 }
 0x113   : > { %v884_v32 = vsub.f32 1.0, %v883_v52  ;;  %1357 = vst [vmem:[#allocation2 + $0x139] sm:$0xff] %v1281_v48  ;;  %v898_v30 = vmul.f32 %v4479_v34, %v5352_v7  ;;  %vm888_vm0 = vweird.f32 %v4475_v56  ;;  %v891_v4 = vand.u32 2147483647, %v5346_v50  ;;  %v634_v48 = vpop.f32.mrf.mxu3  ;;  %vm5454_vm2 = vmor %vm1157_vm13, %vm1158_vm14 }
 0x114   : > { %v1154_v29 = vsub.f32 1.0, %v1153_v44  ;;  %vm887_vm1 = vweird.f32 %v5346_v50  ;;  %v894_v52 = vor.u32 1.1754944e-38, %v893_v14  ;;  %v591_v44 = vpop.f32.mrf.mxu0  ;;  %vm5458_vm3 = vcmp.eq.f32.partialorder %v1161_v62, 8.507059e+37  ;;  %v5470_v62 = vld [vmem:[%s9065_s2] ss:$0 sm:$0xff] }
 0x115   : > { %v885_v36 = vmul.f32 %v4475_v56, %v884_v32  ;;  %v899_v60 = vsub.f32 1.0, %v898_v30  ;;  %v5450_v2 = vpop.eup %4480  ;;  %v1164_v28 = vor.u32 1.1754944e-38, %v1163_v15  ;;  %v908_v50 = vand.u32 2147483648, %v5352_v7  ;;  %vm889_vm4 = vmor %vm887_vm1, %vm888_vm0 }
 0x116   : > { %v1155_v5 = vmul.f32 %v4477_v23, %v1154_v29  ;;  %v5463_v14 = vpop.eup %4482  ;;  %vm903_vm5 = vweird.f32 %v4479_v34  ;;  %v906_v18 = vand.u32 2147483647, %v5352_v7  ;;  %vm892_vm7 = vcmp.eq.f32.partialorder %v891_v4, 8.507059e+37 }
 0x117   : > { %v886_v0 = vadd.f32 %v4475_v56, %v885_v36  ;;  %v900_v30 = vmul.f32 %v4479_v34, %v899_v60  ;;  %v5473_v15 = vadd.f32 %v5470_v62, %v634_v48  ;;  %v5476_v21 = vadd.f32 %v5470_v62, %v591_v44 }
 0x118   : > { %v1156_v29 = vadd.f32 %v4477_v23, %v1155_v5  ;;  %vm902_vm8 = vweird.f32 %v5352_v7  ;;  %v909_v48 = vor.u32 1.1754944e-38, %v908_v50  ;;  %vm907_vm10 = vcmp.eq.f32.partialorder %v906_v18, 8.507059e+37 }
 0x119   : > { %v890_v36 = vsel %vm889_vm4, %v4475_v56, %v886_v0  ;;  %v901_v60 = vadd.f32 %v4479_v34, %v900_v30  ;;  %v2071_v0 = vmul.f32 %v5023_v19, %v5358_v53  ;;  %vm904_vm9 = vmor %vm902_vm8, %vm903_vm5  ;;  %v9278_v7 = vrot.slane %v5356_v10, 1 }
 0x11a   : > { %v895_v45 = vsel %vm892_vm7, %v894_v52, %v890_v36  ;;  %v1160_v5 = vsel %vm5454_vm2, %v4477_v23, %v1156_v29  ;;  %v1555_v52 = vadd.f32 %v1523_v35, %v5401_v27  ;;  %v9279_v44 = vrot.slane %v5296_v17, 1  ;;  %v1400_v35 = vld [vmem:[#allocation2 + $0x118] sm:$0x3] }
 0x11b   : > { %v1264_v56 = vmul.f32 %v895_v45, %v5209_v54  ;;  %v1165_v4 = vsel %vm5458_vm3, %v1164_v28, %v1160_v5  ;;  %v905_v23 = vsel %vm904_vm9, %v4479_v34, %v901_v60  ;;  %v2170_v54 = vrot.slane %v5446_v9, 1 }
 0x11c   : > { %v1282_v59 = vmul.f32 %v1165_v4, %v5219_v63  ;;  %v5495_v29 = vsel %vm1681_vm6, %v9279_v44, %v9278_v7  ;;  %v910_v28 = vsel %vm907_vm10, %v909_v48, %v905_v23  ;;  %v4283_v45 = vmul.f32 -1.442695, %v5473_v15 }
 0x11d   : > { %1340 = vst [vmem:[#allocation2 + $0x69] sm:$0xff] %v1264_v56  ;;  %v9280_v32 = vrot.slane %v5365_v42, 1  ;;  %v9281_v27 = vmov %v9278_v7  ;;  %v1796_v17 = vadd.f32 %v5250_v47, %v5431_v38  ;;  %v1265_v34 = vmul.f32 %v910_v28, %v5228_v58 }
 0x11e   : > { %1358 = vst [vmem:[#allocation2 + $0x141] sm:$0xff] %v1282_v59  ;;  %v4266_v9 = vmul.f32 -1.442695, %v5476_v21  ;;  %v9282_v50 = vrot.slane %v5369_v11, 1  ;;  %v9283_v30 = vrot.slane %v5305_v8, 1  ;;  %v2417_v10 = vrot.slane %v5414_v6, 2 }
 0x11f   : > { %v5504_v63 = vsel %vm1681_vm6, %v9281_v27, %v9280_v32  ;;  %v2169_v18 = vrot.slane %v2071_v0, 1  ;;  %v2073_v36 = vmul.f32 %v5023_v19, %v5486_v46  ;;  %v2419_v5 = vrot.slane %v5418_v25, 2  ;;  %1341 = vst [vmem:[#allocation2 + $0x79] sm:$0xff] %v1265_v34 }
 0x120   : > { %v1930_v42 = vsel %vm1681_vm6, %v9283_v30, %v9282_v50  ;;  %v2653_v47 = vrot.slane %v5422_v37, 2  ;;  %v2655_v58 = vrot.slane %v5426_v20, 2  ;;  %v1797_v38 = vadd.f32 %v5265_v16, %v1555_v52  ;;  %v636_v20 = vpop.f32.mrf.mxu3 }
 0x121   : > { %v5523_v60 = vmul.f32 %v4978_v55, %v1400_v35  ;;  %v5526_v8 = vmul.f32 %v4996_v3, %v1400_v35  ;;  %v2171_v6 = vsel %vm1681_vm6, %v2169_v18, %v2170_v54  ;;  %4484 = vpow2.f32 %v4283_v45  ;;  %v594_v18 = vpop.f32.mrf.mxu0 }
 0x122   : > { %v3197_v0 = vmul.f32 %v5450_v2, %v5395_v12  ;;  %v5532_v25 = vmul.f32 %v5023_v19, %v1400_v35  ;;  %v2037_v37 = vadd.f32 %v1930_v42, %v1796_v17  ;;  %4486 = vpow2.f32 %v4266_v9 }
 0x123   : > { %9284 = vst [vmem:[#allocation32_spill] sm:$0xff] %v5523_v60  ;;  %v9287_v16 = vrot.slane %v5373_v26, 1  ;;  %v9288_v56 = vmov %v9282_v50  ;;  %v3212_v48 = vmul.f32 %v5463_v14, %v5404_v13  ;;  %v5542_v52 = vmul.f32 %v5063_v33, %v1400_v35 }
 0x124   : > { %9285 = vst [vmem:[#allocation33_spill] sm:$0xff] %v5526_v8  ;;  %v2172_v59 = vrot.slane %v2073_v36, 1  ;;  %v9290_v23 = vrot.slane %v5309_v41, 2  ;;  %v5550_v44 = vmul.f32 %v5168_v31, %v1400_v35  ;;  %v2278_v28 = vadd.f32 %v2171_v6, %v2037_v37 }
 0x125   : > { %9286 = vst [vmem:[#allocation34_spill] sm:$0xff] %v5532_v25  ;;  %v1932_v4 = vsel %vm1681_vm6, %v9288_v56, %v9287_v16  ;;  %v5553_v11 = vsel %vm2405_vm15, %v2417_v10, %v2419_v5  ;;  %v9292_v45 = vrot.slane %v5313_v43, 2  ;;  %v2656_v27 = vsel %vm2405_vm15, %v2653_v47, %v2655_v58 }
 0x126   : > { %9289 = vst [vmem:[#allocation35_spill] sm:$0xff] %v5542_v52  ;;  %v5547_v7 = vsel %vm2405_vm15, %v9290_v23, %v2417_v10  ;;  %v2038_v26 = vadd.f32 %v1932_v4, %v1797_v38  ;;  %v5560_v17 = vadd.f32 %v5470_v62, %v636_v20  ;;  %v3198_v41 = vsub.f32 1.0, %v3197_v0 }
 0x127   : > { %9291 = vst [vmem:[#allocation36_spill] sm:$0xff] %v5550_v44  ;;  %v2654_v32 = vsel %vm2405_vm15, %v9292_v45, %v2653_v47  ;;  %v4485_v50 = vpop.eup %4484  ;;  %v3213_v30 = vsub.f32 1.0, %v3212_v48  ;;  %v2173_v43 = vsel %vm1681_vm6, %v2170_v54, %v2172_v59  ;;  %v2796_v10 = vmul.f32 %v5168_v31, %v5428_v49  ;;  %v5721_v44 = vld [vmem:[#allocation2 + $0x70] sm:$0x3] }
 0x128   : > { %v4487_v36 = vpop.eup %4486  ;;  %v1459_v47 = vmul.f32 %v4987_v61, %v5358_v53  ;;  %v2279_v58 = vadd.f32 %v2173_v43, %v2038_v26  ;;  %v2520_v38 = vadd.f32 %v5268_v51, %v2278_v28  ;;  %v5575_v6 = vmul.f32 %v4981_v57, %v5358_v53 }
 0x129   : > { %v5579_v54 = vmul.f32 %v4978_v55, %v5358_v53  ;;  %v2795_v0 = vmul.f32 %v5168_v31, %v5358_v53  ;;  %v4284_v37 = vmul.f32 -1.442695, %v5560_v17  ;;  %v3199_v20 = vmul.f32 %v5450_v2, %v3198_v41 }
 0x12a   : > { %v5587_v16 = vmul.f32 %v4996_v3, %v5358_v53  ;;  %v5589_v51 = vadd.f32 1.0, %v4485_v50  ;;  %v5592_v56 = vadd.f32 %v5470_v62, %v594_v18  ;;  %v3214_v4 = vmul.f32 %v5463_v14, %v3213_v30 }
 0x12b   : > { %v2797_v48 = vmul.f32 %v5168_v31, %v5486_v46  ;;  %v2894_v59 = vrot.slane %v2796_v10, 2  ;;  %v5597_v23 = vadd.f32 1.0, %v4487_v36  ;;  %v5600_v26 = vadd.f32 %v1459_v47, %v5331_v22 }
 0x12c   : > { %v5604_v28 = vmul.f32 %v4993_v1, %v5358_v53  ;;  %v2521_v45 = vadd.f32 %v5301_v39, %v2279_v58  ;;  %v2761_v41 = vadd.f32 %v2654_v32, %v2520_v38  ;;  %vm3201_vm11 = vweird.f32 %v5395_v12  ;;  %v5659_v58 = vld [vmem:[#allocation2 + $0x60] sm:$0xff] }
 0x12d   : > { %vm3202_vm12 = vweird.f32 %v5450_v2  ;;  %v2893_v50 = vrot.slane %v2795_v0, 2  ;;  %4488 = vpow2.f32 %v4284_v37  ;;  %v3200_v30 = vadd.f32 %v5450_v2, %v3199_v20  ;;  %v639_v20 = vpop.f32.mrf.mxu3 }
 0x12e   : > { %vm3217_vm13 = vweird.f32 %v5463_v14  ;;  %4490 = vrcp.f32 %v5589_v51  ;;  %v4267_v22 = vmul.f32 -1.442695, %v5592_v56  ;;  %v3215_v43 = vadd.f32 %v5463_v14, %v3214_v4  ;;  %vm5622_vm14 = vmor %vm3201_vm11, %vm3202_vm12 }
 0x12f   : > { %v2895_v10 = vsel %vm2405_vm15, %v2893_v50, %v2894_v59  ;;  %v2896_v39 = vrot.slane %v2797_v48, 2  ;;  %4492 = vrcp.f32 %v5597_v23  ;;  %v3207_v32 = vand.u32 2147483648, %v5395_v12 }
 0x130   : > { %v3222_v18 = vand.u32 2147483648, %v5404_v13  ;;  %v2762_v36 = vadd.f32 %v2656_v27, %v2521_v45  ;;  %v3002_v47 = vadd.f32 %v2895_v10, %v2761_v41  ;;  %v3205_v38 = vand.u32 2147483647, %v5395_v12 }
 0x131   : > { %vm3216_vm0 = vweird.f32 %v5404_v13  ;;  %v3220_v0 = vand.u32 2147483647, %v5404_v13  ;;  %v5631_v37 = vmul.f32 %v5063_v33, %v5358_v53  ;;  %v3204_v27 = vsel %vm5622_vm14, %v5450_v2, %v3200_v30 }
 0x132   : > { %vm5638_vm1 = vmor %vm3216_vm0, %vm3217_vm13  ;;  %4494 = vpow2.f32 %v4267_v22  ;;  %v1460_v48 = vmul.f32 %v4987_v61, %v5428_v49  ;;  %v5651_v2 = vmul.f32 %v4996_v3, %v5428_v49  ;;  %v2897_v45 = vsel %vm2405_vm15, %v2894_v59, %v2896_v39 }
 0x133   : > { %v4489_v13 = vpop.eup %4488  ;;  %v3219_v53 = vsel %vm5638_vm1, %v5463_v14, %v3215_v43  ;;  %v3208_v50 = vor.u32 1.1754944e-38, %v3207_v32  ;;  %v3223_v30 = vor.u32 1.1754944e-38, %v3222_v18  ;;  %v3003_v10 = vadd.f32 %v2897_v45, %v2762_v36 }
 0x134   : > { %v5654_v41 = vpop.eup %4490  ;;  %v5657_v22 = vadd.f32 %v5225_v40, %v3002_v47  ;;  %vm3206_vm2 = vcmp.eq.f32.partialorder %v3205_v38, 8.507059e+37  ;;  %vm3221_vm3 = vcmp.eq.f32.partialorder %v3220_v0, 8.507059e+37  ;;  %v5671_v39 = vmul.f32 %v4996_v3, %v5486_v46  ;;  %v9297_v47 = vld [vmem:[#allocation8_spill] sm:$0xff]  ;;  %v5679_v0 = vld [vmem:[#allocation2 + $0x68] sm:$0xff] }
 0x135   : > { %v5661_v14 = vpop.eup %4492  ;;  %v5665_v5 = vsel %vm3206_vm2, %v3208_v50, %v3204_v27  ;;  %v5667_v59 = vsel %vm3221_vm3, %v3223_v30, %v3219_v53  ;;  %v5673_v32 = vadd.f32 1.0, %v4489_v13  ;;  %v1492_v18 = vadd.f32 %v1460_v48, %v5384_v24 }
 0x136   : > { %v1524_v38 = vmul.f32 %v9297_v47, %v5659_v58  ;;  %v1168_v27 = vmul.f32 %v5654_v41, %v5589_v51  ;;  %v5684_v45 = vadd.f32 %v5225_v40, %v3003_v10  ;;  %v4291_v50 = vmul.f32 -1.442695, %v5657_v22 }
 0x137   : > { %vm1172_vm4 = vweird.f32 %v5589_v51  ;;  %v913_v24 = vmul.f32 %v5661_v14, %v5597_v23  ;;  %vm1173_vm5 = vweird.f32 %v5654_v41  ;;  %v1176_v48 = vand.u32 2147483647, %v5589_v51 }
 0x138   : > { %v4495_v53 = vpop.eup %4494  ;;  %v1169_v13 = vsub.f32 1.0, %v1168_v27  ;;  %v1178_v30 = vand.u32 2147483648, %v5589_v51  ;;  %v1525_v42 = vmul.f32 %v9297_v47, %v5679_v0  ;;  %v5697_v10 = vmul.f32 %v5023_v19, %v5679_v0  ;;  %vm5709_vm7 = vmor %vm1172_vm4, %vm1173_vm5 }
 0x139   : > { %v914_v9 = vsub.f32 1.0, %v913_v24  ;;  %4496 = vrcp.f32 %v5673_v32  ;;  %v1556_v35 = vadd.f32 %v1524_v38, %v5600_v26  ;;  %v2074_v27 = vmul.f32 %v5023_v19, %v5659_v58 }
 0x13a   : > { %v1170_v34 = vmul.f32 %v5654_v41, %v1169_v13  ;;  %v5704_v43 = vadd.f32 1.0, %v4495_v53  ;;  %4498 = vpow2.f32 %v4291_v50  ;;  %v4292_v12 = vmul.f32 -1.442695, %v5684_v45 }
 0x13b   : > { %v915_v24 = vmul.f32 %v5661_v14, %v914_v9  ;;  %v921_v26 = vand.u32 2147483647, %v5597_v23  ;;  %v1179_v4 = vor.u32 1.1754944e-38, %v1178_v30  ;;  %vm918_vm8 = vweird.f32 %v5661_v14 }
 0x13c   : > { %v1171_v38 = vadd.f32 %v5654_v41, %v1170_v34  ;;  %v923_v53 = vand.u32 2147483648, %v5597_v23  ;;  %v1557_v50 = vadd.f32 %v1525_v42, %v1492_v18  ;;  %v2175_v13 = vrot.slane %v5697_v10, 1 }
 0x13d   : > { %vm1177_vm9 = vcmp.eq.f32.partialorder %v1176_v48, 8.507059e+37  ;;  %v916_v51 = vadd.f32 %v5661_v14, %v915_v24  ;;  %v1936_v36 = vrot.slane %v5671_v39, 1  ;;  %vm917_vm10 = vweird.f32 %v5597_v23 }
 0x13e   : > { %v1175_v9 = vsel %vm5709_vm7, %v5654_v41, %v1171_v38  ;;  %4500 = vrcp.f32 %v5704_v43  ;;  %v9300_v42 = vrot.slane %v5651_v2, 1  ;;  %v9301_v18 = vrot.slane %v5587_v16, 1  ;;  %vm919_vm11 = vmor %vm917_vm10, %vm918_vm8 }
 0x13f   : > { %v4497_v34 = vpop.eup %4496  ;;  %4502 = vpow2.f32 %v4292_v12  ;;  %v1798_v39 = vadd.f32 %v5495_v29, %v1556_v35  ;;  %v2174_v30 = vrot.slane %v2074_v27, 1  ;;  %v1180_v41 = vsel %vm1177_vm9, %v1179_v4, %v1175_v9 }
 0x140   : > { %v1935_v48 = vsel %vm1681_vm6, %v9301_v18, %v9300_v42  ;;  %v920_v23 = vsel %vm919_vm11, %v5661_v14, %v916_v51  ;;  %v924_v10 = vor.u32 1.1754944e-38, %v923_v53  ;;  %v1183_v24 = vmul.f32 %v4497_v34, %v5673_v32  ;;  %v4499_v38 = vpop.eup %4498  ;;  %v596_v14 = vpop.f32.mrf.mxu0  ;;  %v9302_v51 = vld [vmem:[#allocation18_spill] sm:$0xff] }
 0x141   : > { %v1799_v52 = vadd.f32 %v5504_v63, %v1557_v50  ;;  %v2076_v16 = vmul.f32 %v5023_v19, %v5721_v44  ;;  %v2176_v12 = vsel %vm1681_vm6, %v2174_v30, %v2175_v13  ;;  %vm922_vm12 = vcmp.eq.f32.partialorder %v921_v26, 8.507059e+37  ;;  %v9304_v26 = vld [vmem:[#allocation20_spill] sm:$0xff] }
 0x142   : > { %v1283_v29 = vmul.f32 %v1180_v41, %v5473_v15  ;;  %v925_v35 = vsel %vm922_vm12, %v924_v10, %v920_v23  ;;  %vm1187_vm13 = vweird.f32 %v5673_v32  ;;  %v1193_v4 = vand.u32 2147483648, %v5673_v32 }
 0x143   : > { %v1266_v27 = vmul.f32 %v925_v35, %v5476_v21  ;;  %v1184_v53 = vsub.f32 1.0, %v1183_v24  ;;  %vm1188_vm14 = vweird.f32 %v4497_v34  ;;  %v1191_v63 = vand.u32 2147483647, %v5673_v32 }
 0x144   : > { %v5747_v50 = vpop.eup %4500  ;;  %v5751_v9 = vmul.f32 %v5665_v5, %v9302_v51  ;;  %v5755_v15 = vmul.f32 %v5667_v59, %v9304_v26  ;;  %v2558_v42 = vmul.f32 %v5063_v33, %v5428_v49  ;;  %v2039_v18 = vadd.f32 %v1935_v48, %v1798_v39  ;;  %1359 = vst [vmem:[#allocation2 + $0x151] sm:$0xff] %v1283_v29  ;;  %vm5772_vm0 = vmor %vm1187_vm13, %vm1188_vm14 }
 0x145   : > { %v4503_v21 = vpop.eup %4502  ;;  %v9306_v30 = vrot.slane %v5651_v2, 1  ;;  %v2177_v23 = vrot.slane %v2076_v16, 1  ;;  %1342 = vst [vmem:[#allocation2 + $0x81] sm:$0xff] %v1266_v27  ;;  %v1185_v10 = vmul.f32 %v4497_v34, %v1184_v53  ;;  %v5763_v5 = vadd.f32 %v5470_v62, %v639_v20  ;;  %v641_v53 = vpop.f32.mrf.mxu3 }
 0x146   : > { %9303 = vst [vmem:[#allocation18_spill] sm:$0xff] %v5751_v9  ;;  %v5767_v59 = vmul.f32 %v4978_v55, %v5428_v49  ;;  %v2280_v35 = vadd.f32 %v2176_v12, %v2039_v18  ;;  %v1194_v2 = vor.u32 1.1754944e-38, %v1193_v4  ;;  %vm1192_vm1 = vcmp.eq.f32.partialorder %v1191_v63, 8.507059e+37 }
 0x147   : > { %9305 = vst [vmem:[#allocation20_spill] sm:$0xff] %v5755_v15  ;;  %v1937_v41 = vsel %vm1681_vm6, %v9306_v30, %v1936_v36  ;;  %v5776_v36 = vadd.f32 1.0, %v4499_v38  ;;  %v1186_v39 = vadd.f32 %v4497_v34, %v1185_v10  ;;  %v928_v20 = vmul.f32 %v5747_v50, %v5704_v43 }
 0x148   : > { %v2040_v24 = vadd.f32 %v1937_v41, %v1799_v52  ;;  %v5782_v16 = vmul.f32 %v4978_v55, %v5486_v46  ;;  %v2559_v52 = vmul.f32 %v5063_v33, %v5486_v46  ;;  %v2658_v32 = vrot.slane %v2558_v42, 2 }
 0x149   : > { %v5786_v12 = vadd.f32 1.0, %v4503_v21  ;;  %v2178_v29 = vsel %vm1681_vm6, %v2175_v13, %v2177_v23  ;;  %v2799_v38 = vmul.f32 %v5168_v31, %v5679_v0  ;;  %v1190_v4 = vsel %vm5772_vm0, %v4497_v34, %v1186_v39  ;;  %v599_v23 = vpop.f32.mrf.mxu0 }
 0x14a   : > { %v4285_v27 = vmul.f32 -1.442695, %v5763_v5  ;;  %v2798_v63 = vmul.f32 %v5168_v31, %v5659_v58  ;;  %v2281_v51 = vadd.f32 %v2178_v29, %v2040_v24  ;;  %v2522_v26 = vadd.f32 %v5547_v7, %v2280_v35 }
 0x14b   : > { %v1195_v42 = vsel %vm1192_vm1, %v1194_v2, %v1190_v4  ;;  %4504 = vrcp.f32 %v5776_v36  ;;  %v929_v18 = vsub.f32 1.0, %v928_v20  ;;  %v5800_v21 = vadd.f32 %v5470_v62, %v596_v14 }
 0x14c   : > { %v1284_v13 = vmul.f32 %v1195_v42, %v5560_v17  ;;  %v1698_v34 = vrot.slane %v5767_v59, 1  ;;  %v2660_v30 = vrot.slane %v2559_v52, 2  ;;  %4506 = vrcp.f32 %v5786_v12 }
 0x14d   : > { %v5805_v41 = vadd.f32 %v5470_v62, %v641_v53  ;;  %v9309_v7 = vrot.slane %v5631_v37, 2  ;;  %v2800_v17 = vmul.f32 %v5168_v31, %v5721_v44  ;;  %v2899_v24 = vrot.slane %v2799_v38, 2 }
 0x14e   : > { %1360 = vst [vmem:[#allocation2 + $0x159] sm:$0xff] %v1284_v13  ;;  %4508 = vpow2.f32 %v4285_v27  ;;  %v2319_v14 = vmul.f32 %v4993_v1, %v5428_v49  ;;  %v2320_v59 = vmul.f32 %v4993_v1, %v5486_v46  ;;  %v2523_v35 = vadd.f32 %v5553_v11, %v2281_v51 }
 0x14f   : > { %v2659_v10 = vsel %vm2405_vm15, %v9309_v7, %v2658_v32  ;;  %v2898_v2 = vrot.slane %v2798_v63, 2  ;;  %v930_v37 = vmul.f32 %v5747_v50, %v929_v18  ;;  %v4268_v39 = vmul.f32 -1.442695, %v5800_v21  ;;  %v1403_v18 = vld [vmem:[#allocation2 + $0x130] sm:$0x3] }
 0x150   : > { %v2763_v48 = vadd.f32 %v2659_v10, %v2522_v26  ;;  %v5820_v20 = vadd.f32 %v5470_v62, %v599_v23  ;;  %v5824_v31 = vadd.f32 %v5755_v15, %v5751_v9  ;;  %v5828_v52 = vmul.f32 %v4981_v57, %v5428_v49 }
 0x151   : > { %v1700_v46 = vrot.slane %v5782_v16, 1  ;;  %v4286_v11 = vmul.f32 -1.442695, %v5805_v41  ;;  %v5832_v29 = vpop.eup %4504  ;;  %v9310_v38 = vrot.slane %v5579_v54, 1  ;;  %v2661_v27 = vsel %vm2405_vm15, %v2658_v32, %v2660_v30 }
 0x152   : > { %v2900_v53 = vsel %vm2405_vm15, %v2898_v2, %v2899_v24  ;;  %v2901_v63 = vrot.slane %v2800_v17, 2  ;;  %v5841_v51 = vpop.eup %4506  ;;  %v2422_v49 = vrot.slane %v2319_v14, 2  ;;  %v2424_v26 = vrot.slane %v2320_v59, 2 }
 0x153   : > { %v5837_v4 = vsel %vm1681_vm6, %v9310_v38, %v1698_v34  ;;  %v2764_v42 = vadd.f32 %v2661_v27, %v2523_v35  ;;  %v3004_v16 = vadd.f32 %v2900_v53, %v2763_v48  ;;  %v931_v23 = vadd.f32 %v5747_v50, %v930_v37 }
 0x154   : > { %v4509_v13 = vpop.eup %4508  ;;  %vm933_vm2 = vweird.f32 %v5747_v50  ;;  %4510 = vpow2.f32 %v4268_v39  ;;  %v4269_v54 = vmul.f32 -1.442695, %v5820_v20  ;;  %v3227_v32 = vmul.f32 %v5832_v29, %v5776_v36 }
 0x155   : > { %v5849_v30 = vmul.f32 %v4978_v55, %v1403_v18  ;;  %v938_v7 = vand.u32 2147483648, %v5704_v43  ;;  %4512 = vpow2.f32 %v4286_v11  ;;  %v3242_v10 = vmul.f32 %v5841_v51, %v5786_v12 }
 0x156   : > { %v2902_v17 = vsel %vm2405_vm15, %v2899_v24, %v2901_v63  ;;  %vm932_vm3 = vweird.f32 %v5704_v43  ;;  %v936_v14 = vand.u32 2147483647, %v5704_v43  ;;  %v5858_v59 = vsel %vm1681_vm6, %v1698_v34, %v1700_v46 }
 0x157   : > { %9311 = vst [vmem:[#allocation37_spill] sm:$0xff] %v5849_v30  ;;  %v3005_v35 = vadd.f32 %v2902_v17, %v2764_v42  ;;  %v5861_v48 = vadd.f32 %v5225_v40, %v3004_v16  ;;  %vm5863_vm4 = vmor %vm932_vm3, %vm933_vm2  ;;  %v5867_v37 = vadd.f32 1.0, %v4509_v13  ;;  %v9315_v39 = vrot.slane %v5604_v28, 2 }
 0x158   : > { %v5875_v43 = vmul.f32 %v4996_v3, %v1403_v18  ;;  %v935_v34 = vsel %vm5863_vm4, %v5747_v50, %v931_v23  ;;  %4514 = vpow2.f32 %v4269_v54  ;;  %v5881_v46 = vsel %vm2405_vm15, %v2422_v49, %v2424_v26 }
 0x159   : > { %9312 = vst [vmem:[#allocation38_spill] sm:$0xff] %v5861_v48  ;;  %v5872_v24 = vsel %vm2405_vm15, %v9315_v39, %v2422_v49  ;;  %v1461_v11 = vmul.f32 %v4987_v61, %v5659_v58  ;;  %v5887_v28 = vmul.f32 %v4996_v3, %v5659_v58  ;;  %v939_v38 = vor.u32 1.1754944e-38, %v938_v7 }
 0x15a   : > { %9316 = vst [vmem:[#allocation39_spill] sm:$0xff] %v5875_v43  ;;  %v4511_v27 = vpop.eup %4510  ;;  %v3228_v53 = vsub.f32 1.0, %v3227_v32  ;;  %v3243_v63 = vsub.f32 1.0, %v3242_v10  ;;  %vm937_vm5 = vcmp.eq.f32.partialorder %v936_v14, 8.507059e+37  ;;  %v5891_v50 = vadd.f32 %v5225_v40, %v3005_v35  ;;  %v5903_v32 = vld [vmem:[#allocation2 + $0x78] sm:$0xff]  ;;  %v5916_v14 = vld [vmem:[#allocation2 + $0x80] sm:$0xff] }
 0x15b   : > { %v4513_v16 = vpop.eup %4512  ;;  %v4293_v49 = vmul.f32 -1.442695, %v5861_v48  ;;  %v940_v26 = vsel %vm937_vm5, %v939_v38, %v935_v34  ;;  %4516 = vrcp.f32 %v5867_v37  ;;  %v5897_v23 = vmul.f32 %v5023_v19, %v1403_v18 }
 0x15c   : > { %9317 = vst [vmem:[#allocation40_spill] sm:$0xff] %v5891_v50  ;;  %v5901_v54 = vmul.f32 %v4981_v57, %v5659_v58  ;;  %v1267_v7 = vmul.f32 %v940_v26, %v5592_v56  ;;  %v1493_v40 = vadd.f32 %v1461_v11, %v5575_v6  ;;  %v5909_v10 = vmul.f32 %v4978_v55, %v5659_v58 }
 0x15d   : > { %9318 = vst [vmem:[#allocation41_spill] sm:$0xff] %v5897_v23  ;;  %v1938_v17 = vrot.slane %v5887_v28, 1  ;;  %v5914_v18 = vmul.f32 %v5063_v33, %v5659_v58  ;;  %v3229_v2 = vmul.f32 %v5832_v29, %v3228_v53  ;;  %v1462_v56 = vmul.f32 %v4987_v61, %v5679_v0 }
 0x15e   : > { %9319 = vst [vmem:[#allocation42_spill] sm:$0xff] %v5901_v54  ;;  %v4515_v35 = vpop.eup %4514  ;;  %v5921_v6 = vadd.f32 1.0, %v4511_v27  ;;  %v5923_v39 = vadd.f32 1.0, %v4513_v16  ;;  %v3244_v34 = vmul.f32 %v5841_v51, %v3243_v63  ;;  %4518 = vpow2.f32 %v4293_v49 }
 0x15f   : > { %9320 = vst [vmem:[#allocation43_spill] sm:$0xff] %v5909_v10  ;;  %v4294_v11 = vmul.f32 -1.442695, %v5891_v50  ;;  %v1526_v28 = vmul.f32 %v9297_v47, %v5903_v32  ;;  %v3237_v38 = vand.u32 2147483648, %v5776_v36  ;;  %v1837_v53 = vmul.f32 %v4996_v3, %v5679_v0 }
 0x160   : > { %1343 = vst [vmem:[#allocation2 + $0x91] sm:$0xff] %v1267_v7  ;;  %v1838_v26 = vmul.f32 %v4996_v3, %v5721_v44  ;;  %v1527_v27 = vmul.f32 %v9297_v47, %v5916_v14  ;;  %vm3232_vm7 = vweird.f32 %v5832_v29  ;;  %v3252_v63 = vand.u32 2147483648, %v5786_v12 }
 0x161   : > { %v5936_v16 = vpop.eup %4516  ;;  %4520 = vrcp.f32 %v5921_v6  ;;  %v5941_v49 = vadd.f32 1.0, %v4515_v35  ;;  %vm3247_vm8 = vweird.f32 %v5841_v51  ;;  %v1494_v7 = vadd.f32 %v1462_v56, %v5828_v52 }
 0x162   : > { %v1198_v13 = vmul.f32 %v5936_v16, %v5867_v37  ;;  %4522 = vrcp.f32 %v5923_v39  ;;  %v5949_v42 = vadd.f32 %v5832_v29, %v3229_v2  ;;  %v5952_v15 = vadd.f32 %v5841_v51, %v3244_v34 }
 0x163   : > { %4524 = vpow2.f32 %v4294_v11  ;;  %v1558_v9 = vadd.f32 %v1526_v28, %v1493_v40  ;;  %vm3231_vm9 = vweird.f32 %v5776_v36  ;;  %v1939_v35 = vrot.slane %v1837_v53, 1  ;;  %v5976_v53 = vld [vmem:[#allocation2 + $0x88] sm:$0x3] }
 0x164   : > { %v1941_v25 = vrot.slane %v1838_v26, 1  ;;  %v1559_v43 = vadd.f32 %v1527_v27, %v1494_v7  ;;  %v4519_v8 = vpop.eup %4518  ;;  %vm5957_vm10 = vmor %vm3231_vm9, %vm3232_vm7  ;;  %v3235_v2 = vand.u32 2147483647, %v5776_v36  ;;  %vm3246_vm11 = vweird.f32 %v5786_v12 }
 0x165   : > { %4526 = vrcp.f32 %v5941_v49  ;;  %v5965_v40 = vor.u32 1.1754944e-38, %v3237_v38  ;;  %vm5969_vm12 = vmor %vm3246_vm11, %vm3247_vm8  ;;  %v5973_v11 = vor.u32 1.1754944e-38, %v3252_v63  ;;  %v1199_v36 = vsub.f32 1.0, %v1198_v13 }
 0x166   : > { %v1800_v63 = vadd.f32 %v5837_v4, %v1558_v9  ;;  %v2077_v7 = vmul.f32 %v5023_v19, %v5903_v32  ;;  %v1940_v13 = vsel %vm1681_vm6, %v1938_v17, %v1939_v35  ;;  %v1942_v56 = vsel %vm1681_vm6, %v1939_v35, %v1941_v25 }
 0x167   : > { %v5978_v26 = vpop.eup %4520  ;;  %v5995_v30 = vadd.f32 1.0, %v4519_v8  ;;  %v1801_v38 = vadd.f32 %v5858_v59, %v1559_v43  ;;  %v6000_v50 = vmul.f32 %v5063_v33, %v5679_v0  ;;  %v2078_v9 = vmul.f32 %v5023_v19, %v5916_v14 }
 0x168   : > { %v5991_v28 = vpop.eup %4522  ;;  %v2079_v4 = vmul.f32 %v5023_v19, %v5976_v53  ;;  %v1208_v27 = vand.u32 2147483648, %v5867_v37  ;;  %v1200_v17 = vmul.f32 %v5936_v16, %v1199_v36  ;;  %vm1202_vm13 = vweird.f32 %v5867_v37 }
 0x169   : > { %v4525_v60 = vpop.eup %4524  ;;  %vm1203_vm14 = vweird.f32 %v5936_v16  ;;  %v1206_v8 = vand.u32 2147483647, %v5867_v37  ;;  %v2179_v59 = vrot.slane %v2077_v7, 1  ;;  %v2041_v43 = vadd.f32 %v1940_v13, %v1800_v63 }
 0x16a   : > { %v943_v35 = vmul.f32 %v5978_v26, %v5921_v6  ;;  %v1213_v48 = vmul.f32 %v5991_v28, %v5923_v39  ;;  %v6017_v47 = vadd.f32 1.0, %v4525_v60  ;;  %4528 = vrcp.f32 %v5995_v30  ;;  %vm6021_vm0 = vmor %vm1202_vm13, %vm1203_vm14 }
 0x16b   : > { %v6011_v25 = vpop.eup %4526  ;;  %v2042_v36 = vadd.f32 %v1942_v56, %v1801_v38  ;;  %v1201_v54 = vadd.f32 %v5936_v16, %v1200_v17  ;;  %v2180_v3 = vrot.slane %v2078_v9, 1  ;;  %v1209_v7 = vor.u32 1.1754944e-38, %v1208_v27 }
 0x16c   : > { %v944_v63 = vsub.f32 1.0, %v943_v35  ;;  %v1214_v13 = vsub.f32 1.0, %v1213_v48  ;;  %v2182_v61 = vrot.slane %v2079_v4, 1  ;;  %vm1207_vm1 = vcmp.eq.f32.partialorder %v1206_v8, 8.507059e+37  ;;  %v644_v4 = vpop.f32.mrf.mxu3 }
 0x16d   : > { %v1223_v57 = vand.u32 2147483648, %v5923_v39  ;;  %v958_v60 = vmul.f32 %v6011_v25, %v5941_v49  ;;  %v953_v19 = vand.u32 2147483648, %v5921_v6  ;;  %vm1217_vm2 = vweird.f32 %v5923_v39 }
 0x16e   : > { %vm1218_vm3 = vweird.f32 %v5991_v28  ;;  %v1221_v56 = vand.u32 2147483647, %v5923_v39  ;;  %vm6032_vm4 = vcmp.eq.f32.partialorder %v3235_v2, 8.507059e+37  ;;  %v1205_v48 = vsel %vm6021_vm0, %v5936_v16, %v1201_v54 }
 0x16f   : > { %v945_v27 = vmul.f32 %v5978_v26, %v944_v63  ;;  %vm948_vm5 = vweird.f32 %v5978_v26  ;;  %v951_v9 = vand.u32 2147483647, %v5921_v6  ;;  %v2181_v17 = vsel %vm1681_vm6, %v2179_v59, %v2180_v3  ;;  %vm6053_vm8 = vmor %vm1217_vm2, %vm1218_vm3 }
 0x170   : > { %v1210_v8 = vsel %vm1207_vm1, %v1209_v7, %v1205_v48  ;;  %vm947_vm7 = vweird.f32 %v5921_v6  ;;  %v1215_v2 = vmul.f32 %v5991_v28, %v1214_v13  ;;  %v6045_v35 = vpop.eup %4528  ;;  %v1224_v59 = vor.u32 1.1754944e-38, %v1223_v57 }
 0x171   : > { %v1285_v10 = vmul.f32 %v1210_v8, %v5763_v5  ;;  %v946_v54 = vadd.f32 %v5978_v26, %v945_v27  ;;  %v959_v37 = vsub.f32 1.0, %v958_v60  ;;  %vm949_vm9 = vmor %vm947_vm7, %vm948_vm5  ;;  %v954_v6 = vor.u32 1.1754944e-38, %v953_v19 }
 0x172   : > { %v1216_v7 = vadd.f32 %v5991_v28, %v1215_v2  ;;  %vm1222_vm11 = vcmp.eq.f32.partialorder %v1221_v56, 8.507059e+37  ;;  %v6059_v63 = vadd.f32 %v5470_v62, %v644_v4  ;;  %vm952_vm13 = vcmp.eq.f32.partialorder %v951_v9, 8.507059e+37 }
 0x173   : > { %1361 = vst [vmem:[#allocation2 + $0x169] sm:$0xff] %v1285_v10  ;;  %v950_v5 = vsel %vm949_vm9, %v5978_v26, %v946_v54  ;;  %v960_v39 = vmul.f32 %v6011_v25, %v959_v37  ;;  %v968_v13 = vand.u32 2147483648, %v5941_v49  ;;  %vm963_vm14 = vweird.f32 %v6011_v25  ;;  %v601_v54 = vpop.f32.mrf.mxu0 }
 0x174   : > { %v955_v48 = vsel %vm952_vm13, %v954_v6, %v950_v5  ;;  %v1220_v57 = vsel %vm6053_vm8, %v5991_v28, %v1216_v7  ;;  %v966_v19 = vand.u32 2147483647, %v5941_v49  ;;  %v2562_v60 = vmul.f32 %v5063_v33, %v5721_v44 }
 0x175   : > { %v2183_v10 = vsel %vm1681_vm6, %v2180_v3, %v2182_v61  ;;  %v1268_v26 = vmul.f32 %v955_v48, %v5800_v21  ;;  %v1225_v56 = vsel %vm1222_vm11, %v1224_v59, %v1220_v57  ;;  %v2282_v27 = vadd.f32 %v2181_v17, %v2041_v43  ;;  %v9337_v57 = vld [vmem:[#allocation43_spill] sm:$0xff] }
 0x176   : > { %v1286_v9 = vmul.f32 %v1225_v56, %v5805_v41  ;;  %v961_v4 = vadd.f32 %v6011_v25, %v960_v39  ;;  %vm962_vm0 = vweird.f32 %v5941_v49  ;;  %4530 = vrcp.f32 %v6017_v47 }
 0x177   : > { %v2283_v28 = vadd.f32 %v2183_v10, %v2042_v36  ;;  %1344 = vst [vmem:[#allocation2 + $0x99] sm:$0xff] %v1268_v26  ;;  %vm964_vm1 = vmor %vm962_vm0, %vm963_vm14  ;;  %v969_v8 = vor.u32 1.1754944e-38, %v968_v13  ;;  %v4287_v2 = vmul.f32 -1.442695, %v6059_v63  ;;  %v9331_v61 = vsel %vm5957_vm10, %v5832_v29, %v5949_v42  ;;  %v6099_v42 = vld [vmem:[%s9066_s3 + $0x8] ss:$0 sm:$0xff]  ;;  %v646_v10 = vpop.f32.mrf.mxu3 }
 0x178   : > { %v3239_v3 = vsel %vm6032_vm4, %v5965_v40, %v9331_v61  ;;  %v9332_v21 = vand.u32 2147483647, %v5786_v12  ;;  %1362 = vst [vmem:[#allocation2 + $0x171] sm:$0xff] %v1286_v9  ;;  %v965_v41 = vsel %vm964_vm1, %v6011_v25, %v961_v4  ;;  %vm967_vm3 = vcmp.eq.f32.partialorder %v966_v19, 8.507059e+37  ;;  %v1406_v4 = vld [vmem:[#allocation2 + $0x148] sm:$0x3] }
 0x179   : > { %v9333_v49 = vsel %vm5969_vm12, %v5841_v51, %v5952_v15  ;;  %v2663_v29 = vrot.slane %v6000_v50, 2  ;;  %v2802_v12 = vmul.f32 %v6099_v42, %v5916_v14  ;;  %v970_v40 = vsel %vm967_vm3, %v969_v8, %v965_v41 }
 0x17a   : > { %vm3251_vm2 = vcmp.eq.f32.partialorder %v9332_v21, 8.507059e+37  ;;  %v2665_v25 = vrot.slane %v2562_v60, 2  ;;  %v2524_v43 = vadd.f32 %v5872_v24, %v2282_v27  ;;  %v2803_v34 = vmul.f32 %v6099_v42, %v5976_v53 }
 0x17b   : > { %v3254_v52 = vsel %vm3251_vm2, %v5973_v11, %v9333_v49  ;;  %v1269_v15 = vmul.f32 %v970_v40, %v5820_v20  ;;  %v6108_v51 = vmul.f32 %v3239_v3, %v5657_v22  ;;  %v2801_v50 = vmul.f32 %v6099_v42, %v5903_v32 }
 0x17c   : > { %v2525_v11 = vadd.f32 %v5881_v46, %v2283_v28  ;;  %4532 = vpow2.f32 %v4287_v2  ;;  %v6114_v36 = vmul.f32 %v3254_v52, %v5684_v45  ;;  %v2321_v24 = vmul.f32 %v4993_v1, %v5659_v58  ;;  %v6122_v22 = vpop.eup %4530  ;;  %v604_v28 = vpop.f32.mrf.mxu0 }
 0x17d   : > { %9334 = vst [vmem:[#allocation44_spill] sm:$0xff] %v6108_v51  ;;  %v1598_v38 = vmul.f32 %v4978_v55, %v5679_v0  ;;  %v1599_v20 = vmul.f32 %v4978_v55, %v5721_v44  ;;  %v2322_v17 = vmul.f32 %v4993_v1, %v5679_v0  ;;  %v9336_v46 = vrot.slane %v5914_v18, 2 }
 0x17e   : > { %9335 = vst [vmem:[#allocation45_spill] sm:$0xff] %v6114_v36  ;;  %v3257_v16 = vmul.f32 %v6045_v35, %v5995_v30  ;;  %v2904_v58 = vrot.slane %v2802_v12, 2  ;;  %v2323_v59 = vmul.f32 %v4993_v1, %v5721_v44  ;;  %v2666_v37 = vsel %vm2405_vm15, %v2663_v29, %v2665_v25 }
 0x17f   : > { %1345 = vst [vmem:[#allocation2 + $0xa9] sm:$0xff] %v1269_v15  ;;  %v2664_v45 = vsel %vm2405_vm15, %v9336_v46, %v2663_v29  ;;  %v2906_v7 = vrot.slane %v2803_v34, 2  ;;  %v3709_v5 = vadd.f32 %v5824_v31, %v6108_v51  ;;  %v2903_v39 = vrot.slane %v2801_v50, 2  ;;  %v9338_v29 = vld [vmem:[#allocation9_spill] sm:$0xff] }
 0x180   : > { %v2765_v6 = vadd.f32 %v2664_v45, %v2524_v43  ;;  %v2766_v13 = vadd.f32 %v2666_v37, %v2525_v11  ;;  %v6137_v18 = vadd.f32 %v5470_v62, %v601_v54  ;;  %v1702_v19 = vrot.slane %v9337_v57, 1  ;;  %v9340_v43 = vld [vmem:[#allocation4_spill] sm:$0xff]  ;;  %v9346_v57 = vld [vmem:[#allocation42_spill] sm:$0xff] }
 0x181   : > { %v2426_v60 = vrot.slane %v2321_v24, 2  ;;  %v3272_v44 = vmul.f32 %v6122_v22, %v6017_v47  ;;  %v1703_v56 = vrot.slane %v1598_v38, 1  ;;  %v1705_v27 = vrot.slane %v1599_v20, 1 }
 0x182   : > { %v4533_v26 = vpop.eup %4532  ;;  %v3258_v9 = vsub.f32 1.0, %v3257_v16  ;;  %v2905_v31 = vsel %vm2405_vm15, %v2903_v39, %v2904_v58  ;;  %v2427_v8 = vrot.slane %v2322_v17, 2  ;;  %v2429_v2 = vrot.slane %v2323_v59, 2 }
 0x183   : > { %v2907_v54 = vsel %vm2405_vm15, %v2904_v58, %v2906_v7  ;;  %v3006_v61 = vadd.f32 %v2905_v31, %v2765_v6  ;;  %v6146_v3 = vadd.f32 %v3709_v5, %v6114_v36  ;;  %v4270_v41 = vmul.f32 -1.442695, %v6137_v18  ;;  %v9345_v5 = vld [vmem:[#allocation7_spill] sm:$0xff]  ;;  %v6301_v36 = vld [vmem:[%s9065_s2] ss:$0 sm:$0xff] }
 0x184   : > { %v3007_v21 = vadd.f32 %v2907_v54, %v2766_v13  ;;  %v6150_v49 = vadd.f32 %v5470_v62, %v646_v10  ;;  %v3273_v52 = vsub.f32 1.0, %v3272_v44  ;;  %v6153_v12 = vmul.f32 %v9338_v29, %v1406_v4 }
 0x185   : > { %v6155_v40 = vadd.f32 1.0, %v4533_v26  ;;  %v6158_v25 = vadd.f32 %v5470_v62, %v604_v28  ;;  %v1431_v34 = vmul.f32 %v9340_v43, %v5679_v0  ;;  %v6163_v15 = vsel %vm1681_vm6, %v1702_v19, %v1703_v56  ;;  %v9342_v62 = vld [vmem:[#allocation5_spill] sm:$0xff] }
 0x186   : > { %9339 = vst [vmem:[#allocation43_spill] sm:$0xff] %v6153_v12  ;;  %v6166_v50 = vsel %vm1681_vm6, %v1703_v56, %v1705_v27  ;;  %v3259_v11 = vmul.f32 %v6045_v35, %v3258_v9  ;;  %v6170_v24 = vsel %vm2405_vm15, %v2426_v60, %v2427_v8  ;;  %v6173_v38 = vsel %vm2405_vm15, %v2427_v8, %v2429_v2  ;;  %v6180_v0 = vld [vmem:[%s9067_s4] ss:$0 sm:$0xff]  ;;  %v6238_v2 = vld [vmem:[#allocation2 + $0x98] sm:$0xff]  ;;  %v606_v56 = vpop.f32.mrf.mxu0 }
 0x187   : > { %9341 = vst [vmem:[#allocation4_spill] sm:$0xff] %v6170_v24  ;;  %v1463_v20 = vmul.f32 %v9342_v62, %v5903_v32  ;;  %v6183_v17 = vadd.f32 %v6180_v0, %v3006_v61  ;;  %v6187_v46 = vmul.f32 %v9340_v43, %v5903_v32  ;;  %v6190_v45 = vadd.f32 %v6180_v0, %v3007_v21 }
 0x188   : > { %4534 = vpow2.f32 %v4270_v41  ;;  %v4288_v16 = vmul.f32 -1.442695, %v6150_v49  ;;  %v3274_v58 = vmul.f32 %v6122_v22, %v3273_v52  ;;  %v4271_v37 = vmul.f32 -1.442695, %v6158_v25  ;;  %9349 = vst [vmem:[#allocation7_spill] sm:$0xff] %v6238_v2 }
 0x189   : > { %9343 = vst [vmem:[#allocation5_spill] sm:$0xff] %v6183_v17  ;;  %4536 = vrcp.f32 %v6155_v40  ;;  %v3260_v6 = vadd.f32 %v6045_v35, %v3259_v11  ;;  %vm3262_vm10 = vweird.f32 %v6045_v35  ;;  %v6201_v7 = vmul.f32 %v4978_v55, %v5903_v32 }
 0x18a   : > { %9344 = vst [vmem:[#allocation46_spill] sm:$0xff] %v6190_v45  ;;  %v6205_v39 = vmul.f32 %v9345_v5, %v5903_v32  ;;  %vm3261_vm12 = vweird.f32 %v5995_v30  ;;  %v3267_v13 = vand.u32 2147483648, %v5995_v30  ;;  %v6210_v19 = vadd.f32 %v1463_v20, %v9346_v57  ;;  %v9352_v20 = vld [vmem:[#allocation8_spill] sm:$0xff]  ;;  %v6270_v57 = vld [vmem:[#allocation2 + $0xa0] sm:$0x3] }
 0x18b   : > { %v4295_v60 = vmul.f32 -1.442695, %v6183_v17  ;;  %v3265_v44 = vand.u32 2147483647, %v5995_v30  ;;  %v3282_v10 = vand.u32 2147483648, %v6017_v47  ;;  %4538 = vpow2.f32 %v4288_v16  ;;  %vm6216_vm4 = vmor %vm3261_vm12, %vm3262_vm10 }
 0x18c   : > { %v4296_v26 = vmul.f32 -1.442695, %v6190_v45  ;;  %v6221_v27 = vadd.f32 %v6122_v22, %v3274_v58  ;;  %vm3277_vm5 = vweird.f32 %v6122_v22  ;;  %v1464_v9 = vmul.f32 %v9342_v62, %v5916_v14 }
 0x18d   : > { %4540 = vpow2.f32 %v4271_v37  ;;  %v3264_v30 = vsel %vm6216_vm4, %v6045_v35, %v3260_v6  ;;  %v3280_v31 = vand.u32 2147483647, %v6017_v47  ;;  %v6232_v28 = vmul.f32 %v4993_v1, %v5903_v32 }
 0x18e   : > { %v4535_v4 = vpop.eup %4534  ;;  %v6236_v8 = vmul.f32 %v9345_v5, %v5916_v14  ;;  %v3268_v61 = vor.u32 1.1754944e-38, %v3267_v13  ;;  %vm3276_vm7 = vweird.f32 %v6017_v47  ;;  %v6245_v35 = vmul.f32 %v5063_v33, %v5903_v32 }
 0x18f   : > { %v6240_v54 = vpop.eup %4536  ;;  %4542 = vpow2.f32 %v4295_v60  ;;  %vm3266_vm8 = vcmp.eq.f32.partialorder %v3265_v44, 8.507059e+37  ;;  %vm6249_vm9 = vmor %vm3276_vm7, %vm3277_vm5  ;;  %v3283_v41 = vor.u32 1.1754944e-38, %v3282_v10  ;;  %v6255_v52 = vmul.f32 %v4978_v55, %v5916_v14 }
 0x190   : > { %4544 = vpow2.f32 %v4296_v26  ;;  %v3269_v11 = vsel %vm3266_vm8, %v3268_v61, %v3264_v30  ;;  %v3279_v47 = vsel %vm6249_vm9, %v6122_v22, %v6221_v27  ;;  %v1496_v32 = vadd.f32 %v1464_v9, %v1431_v34 }
 0x191   : > { %v1529_v16 = vmul.f32 %v9352_v20, %v6238_v2  ;;  %v4539_v58 = vpop.eup %4538  ;;  %vm6263_vm11 = vcmp.eq.f32.partialorder %v3280_v31, 8.507059e+37  ;;  %v1841_v6 = vmul.f32 %v9345_v5, %v5976_v53  ;;  %v1228_v60 = vmul.f32 %v6240_v54, %v6155_v40 }
 0x192   : > { %v6274_v22 = vadd.f32 1.0, %v4535_v4  ;;  %v6278_v44 = vmul.f32 %v5063_v33, %v5916_v14  ;;  %v2565_v10 = vmul.f32 %v5063_v33, %v5976_v53  ;;  %vm1232_vm13 = vweird.f32 %v6155_v40 }
 0x193   : > { %v4541_v34 = vpop.eup %4540  ;;  %v1238_v26 = vand.u32 2147483648, %v6155_v40  ;;  %v1229_v27 = vsub.f32 1.0, %v1228_v60  ;;  %vm1233_vm14 = vweird.f32 %v6240_v54  ;;  %v1236_v9 = vand.u32 2147483647, %v6155_v40 }
 0x194   : > { %4546 = vrcp.f32 %v6274_v22  ;;  %v1561_v30 = vadd.f32 %v1529_v16, %v1496_v32  ;;  %v6289_v31 = vmul.f32 %v9338_v29, %v6238_v2  ;;  %v2082_v61 = vmul.f32 %v9338_v29, %v6270_v57  ;;  %vm6311_vm0 = vmor %vm1232_vm13, %vm1233_vm14 }
 0x195   : > { %v4543_v4 = vpop.eup %4542  ;;  %v6293_v21 = vadd.f32 1.0, %v4539_v58  ;;  %v1946_v48 = vrot.slane %v1841_v6, 1  ;;  %v1230_v60 = vmul.f32 %v6240_v54, %v1229_v27  ;;  %v6296_v13 = vadd.f32 1.0, %v4541_v34 }
 0x196   : > { %v4545_v59 = vpop.eup %4544  ;;  %v6304_v32 = vadd.f32 %v6301_v36, %v606_v56  ;;  %v2670_v51 = vrot.slane %v2565_v10, 2  ;;  %v1239_v6 = vor.u32 1.1754944e-38, %v1238_v26  ;;  %v6316_v34 = vadd.f32 1.0, %v4543_v4  ;;  %v6322_v10 = vld [vmem:[#allocation2 + $0x90] sm:$0xff]  ;;  %v9358_v26 = vld [vmem:[#allocation38_spill] sm:$0xff] }
 0x197   : > { %4548 = vrcp.f32 %v6293_v21  ;;  %v1231_v27 = vadd.f32 %v6240_v54, %v1230_v60  ;;  %vm1237_vm1 = vcmp.eq.f32.partialorder %v1236_v9, 8.507059e+37  ;;  %v6320_v56 = vadd.f32 1.0, %v4545_v59 }
 0x198   : > { %9355 = vst [vmem:[#allocation42_spill] sm:$0xff] %v6304_v32  ;;  %4550 = vrcp.f32 %v6296_v13  ;;  %v1803_v40 = vadd.f32 %v6166_v50, %v1561_v30  ;;  %v2187_v12 = vrot.slane %v2082_v61, 1  ;;  %v6327_v45 = vmul.f32 %v3269_v11, %v9358_v26 }
 0x199   : > { %v6331_v4 = vmul.f32 %v4978_v55, %v5976_v53  ;;  %v1235_v59 = vsel %vm6311_vm0, %v6240_v54, %v1231_v27  ;;  %v4272_v9 = vmul.f32 -1.442695, %v6304_v32  ;;  %v6339_v50 = vsel %vm6263_vm11, %v3283_v41, %v3279_v47 }
 0x19a   : > { %v4547_v23 = vpop.eup %4546  ;;  %9359 = vst [vmem:[#allocation38_spill] sm:$0xff] %v6327_v45  ;;  %v9360_v30 = vrot.slane %v6236_v8, 1  ;;  %v1240_v11 = vsel %vm1237_vm1, %v1239_v6, %v1235_v59  ;;  %v9361_v26 = vrot.slane %v6278_v44, 2  ;;  %4552 = vrcp.f32 %v6316_v34 }
 0x19b   : > { %v973_v60 = vmul.f32 %v4547_v23, %v6274_v22  ;;  %v1528_v54 = vmul.f32 %v9352_v20, %v6322_v10  ;;  %v1287_v41 = vmul.f32 %v1240_v11, %v6059_v63  ;;  %4554 = vrcp.f32 %v6320_v56  ;;  %v609_v11 = vpop.f32.mrf.mxu0 }
 0x19c   : > { %v1947_v61 = vsel %vm1681_vm6, %v9360_v30, %v1946_v48  ;;  %v6348_v16 = vsel %vm2405_vm15, %v9361_v26, %v2670_v51  ;;  %v9362_v48 = vrot.slane %v6289_v31, 1  ;;  %v6360_v51 = vmul.f32 %v6099_v42, %v6238_v2 }
 0x19d   : > { %v4549_v47 = vpop.eup %4548  ;;  %v2044_v37 = vadd.f32 %v1947_v61, %v1803_v40  ;;  %v974_v6 = vsub.f32 1.0, %v973_v60  ;;  %1363 = vst [vmem:[#allocation2 + $0x181] sm:$0xff] %v1287_v41  ;;  %v981_v59 = vand.u32 2147483647, %v6274_v22  ;;  %v983_v30 = vand.u32 2147483648, %v6274_v22 }
 0x19e   : > { %v2188_v58 = vsel %vm1681_vm6, %v9362_v48, %v2187_v12  ;;  %v4551_v27 = vpop.eup %4550  ;;  %4556 = vpow2.f32 %v4272_v9  ;;  %vm978_vm2 = vweird.f32 %v4547_v23  ;;  %v1243_v40 = vmul.f32 %v4549_v47, %v6293_v21 }
 0x19f   : > { %v975_v63 = vmul.f32 %v4547_v23, %v974_v6  ;;  %v988_v61 = vmul.f32 %v4551_v27, %v6296_v13  ;;  %vm977_vm3 = vweird.f32 %v6274_v22  ;;  %vm1247_vm10 = vweird.f32 %v6293_v21 }
 0x1a0   : > { %v1251_v12 = vand.u32 2147483647, %v6293_v21  ;;  %v1253_v60 = vand.u32 2147483648, %v6293_v21  ;;  %v1244_v41 = vsub.f32 1.0, %v1243_v40  ;;  %vm1248_vm12 = vweird.f32 %v4549_v47  ;;  %v6370_v9 = vpop.eup %4552  ;;  %vm979_vm4 = vmor %vm977_vm3, %vm978_vm2 }
 0x1a1   : > { %v976_v26 = vadd.f32 %v4547_v23, %v975_v63  ;;  %v989_v48 = vsub.f32 1.0, %v988_v61  ;;  %v2285_v6 = vadd.f32 %v2188_v58, %v2044_v37  ;;  %vm982_vm5 = vcmp.eq.f32.partialorder %v981_v59, 8.507059e+37  ;;  %v6375_v22 = vpop.eup %4554  ;;  %vm6381_vm7 = vmor %vm1247_vm10, %vm1248_vm12 }
 0x1a2   : > { %v984_v17 = vor.u32 1.1754944e-38, %v983_v30  ;;  %v6373_v32 = vadd.f32 %v6301_v36, %v609_v11  ;;  %v1245_v2 = vmul.f32 %v4549_v47, %v1244_v41  ;;  %v998_v33 = vand.u32 2147483648, %v6296_v13 }
 0x1a3   : > { %v980_v20 = vsel %vm979_vm4, %v4547_v23, %v976_v26  ;;  %v990_v24 = vmul.f32 %v4551_v27, %v989_v48  ;;  %v1254_v58 = vor.u32 1.1754944e-38, %v1253_v60  ;;  %vm993_vm8 = vweird.f32 %v4551_v27 }
 0x1a4   : > { %v4557_v63 = vpop.eup %4556  ;;  %v985_v40 = vsel %vm982_vm5, %v984_v17, %v980_v20  ;;  %v996_v59 = vand.u32 2147483647, %v6296_v13  ;;  %v2806_v23 = vmul.f32 %v6099_v42, %v6270_v57  ;;  %v1246_v61 = vadd.f32 %v4549_v47, %v1245_v2 }
 0x1a5   : > { %v1270_v30 = vmul.f32 %v985_v40, %v6137_v18  ;;  %vm1252_vm9 = vcmp.eq.f32.partialorder %v1251_v12, 8.507059e+37  ;;  %v2527_v17 = vadd.f32 %v6173_v38, %v2285_v6  ;;  %v991_v20 = vadd.f32 %v4551_v27, %v990_v24  ;;  %v9365_v40 = vld [vmem:[#allocation40_spill] sm:$0xff] }
 0x1a6   : > { %vm992_vm11 = vweird.f32 %v6296_v13  ;;  %v4273_v21 = vmul.f32 -1.442695, %v6373_v32  ;;  %v2080_v11 = vmul.f32 %v9338_v29, %v6322_v10  ;;  %v1250_v60 = vsel %vm6381_vm7, %v4549_v47, %v1246_v61 }
 0x1a7   : > { %1346 = vst [vmem:[#allocation2 + $0xb1] sm:$0xff] %v1270_v30  ;;  %vm994_vm13 = vmor %vm992_vm11, %vm993_vm8  ;;  %v999_v26 = vor.u32 1.1754944e-38, %v998_v33  ;;  %v6396_v41 = vadd.f32 1.0, %v4557_v63  ;;  %v1560_v18 = vadd.f32 %v1528_v54, %v6210_v19  ;;  %v1255_v2 = vsel %vm1252_vm9, %v1254_v58, %v1250_v60 }
 0x1a8   : > { %v995_v38 = vsel %vm994_vm13, %v4551_v27, %v991_v20  ;;  %vm997_vm14 = vcmp.eq.f32.partialorder %v996_v59, 8.507059e+37  ;;  %v2909_v24 = vrot.slane %v6360_v51, 2  ;;  %v2911_v13 = vrot.slane %v2806_v23, 2 }
 0x1a9   : > { %v1288_v12 = vmul.f32 %v1255_v2, %v6150_v49  ;;  %v1000_v48 = vsel %vm997_vm14, %v999_v26, %v995_v38  ;;  %v2325_v6 = vmul.f32 %v4993_v1, %v5916_v14  ;;  %v2768_v47 = vadd.f32 %v6348_v16, %v2527_v17 }
 0x1aa   : > { %v1271_v33 = vmul.f32 %v1000_v48, %v6158_v25  ;;  %4558 = vpow2.f32 %v4273_v21  ;;  %v1707_v63 = vrot.slane %v6201_v7, 1  ;;  %v1943_v19 = vrot.slane %v6205_v39, 1 }
 0x1ab   : > { %v2326_v54 = vmul.f32 %v4993_v1, %v5976_v53  ;;  %1364 = vst [vmem:[#allocation2 + $0x189] sm:$0xff] %v1288_v12  ;;  %4560 = vrcp.f32 %v6396_v41  ;;  %v1708_v49 = vrot.slane %v6255_v52, 1  ;;  %v1710_v27 = vrot.slane %v6331_v4, 1 }
 0x1ac   : > { %v3287_v16 = vmul.f32 %v6370_v9, %v6316_v34  ;;  %v1802_v25 = vadd.f32 %v6163_v15, %v1560_v18  ;;  %1347 = vst [vmem:[#allocation2 + $0xc1] sm:$0xff] %v1271_v33  ;;  %v6417_v7 = vmul.f32 %v6339_v50, %v9365_v40  ;;  %v3711_v53 = vadd.f32 %v6146_v3, %v6327_v45 }
 0x1ad   : > { %v2184_v39 = vrot.slane %v2080_v11, 1  ;;  %v2912_v52 = vsel %vm2405_vm15, %v2909_v24, %v2911_v13  ;;  %v2431_v4 = vrot.slane %v6232_v28, 2  ;;  %v2667_v37 = vrot.slane %v6245_v35, 2 }
 0x1ae   : > { %9366 = vst [vmem:[#allocation40_spill] sm:$0xff] %v6417_v7  ;;  %v2432_v58 = vrot.slane %v2325_v6, 2  ;;  %v3009_v59 = vadd.f32 %v2912_v52, %v2768_v47  ;;  %v9367_v15 = vrot.slane %v6236_v8, 1  ;;  %v2434_v50 = vrot.slane %v2326_v54, 2  ;;  %v9373_v52 = vld [vmem:[#allocation4_spill] sm:$0xff] }
 0x1af   : > { %v3302_v30 = vmul.f32 %v6375_v22, %v6320_v56  ;;  %v9368_v3 = vrot.slane %v6289_v31, 1  ;;  %v6436_v28 = vmul.f32 %v9340_v43, %v5916_v14  ;;  %v6439_v35 = vsel %vm1681_vm6, %v1707_v63, %v1708_v49 }
 0x1b0   : > { %v1945_v23 = vsel %vm1681_vm6, %v1943_v19, %v9367_v15  ;;  %v4559_v17 = vpop.eup %4558  ;;  %v3288_v20 = vsub.f32 1.0, %v3287_v16  ;;  %v6444_v11 = vadd.f32 %v3711_v53, %v6417_v7  ;;  %v6447_v60 = vsel %vm1681_vm6, %v1708_v49, %v1710_v27  ;;  %v611_v49 = vpop.f32.mrf.mxu0  ;;  %v9372_v16 = vld [vmem:[#allocation10_spill] sm:$0xff] }
 0x1b1   : > { %v2186_v61 = vsel %vm1681_vm6, %v2184_v39, %v9368_v3  ;;  %v2043_v8 = vadd.f32 %v1945_v23, %v1802_v25  ;;  %v6441_v21 = vpop.eup %4560  ;;  %v1465_v31 = vmul.f32 %v9342_v62, %v6322_v10  ;;  %v6453_v14 = vmul.f32 %v4978_v55, %v6322_v10 }
 0x1b2   : > { %9369 = vst [vmem:[#allocation47_spill] sm:$0xff] %v6444_v11  ;;  %v6456_v26 = vsel %vm2405_vm15, %v2431_v4, %v2432_v58  ;;  %v6460_v18 = vmul.f32 %v9345_v5, %v6322_v10  ;;  %v6463_v38 = vadd.f32 %v6180_v0, %v3009_v59  ;;  %v6466_v13 = vsel %vm2405_vm15, %v2432_v58, %v2434_v50 }
 0x1b3   : > { %v2284_v2 = vadd.f32 %v2186_v61, %v2043_v8  ;;  %v9371_v12 = vrot.slane %v6278_v44, 2  ;;  %v3303_v6 = vsub.f32 1.0, %v3302_v30  ;;  %v6471_v47 = vadd.f32 1.0, %v4559_v17  ;;  %v9389_v30 = vld [vmem:[#allocation42_spill] sm:$0xff] }
 0x1b4   : > { %9370 = vst [vmem:[#allocation48_spill] sm:$0xff] %v6463_v38  ;;  %v3289_v33 = vmul.f32 %v6370_v9, %v3288_v20  ;;  %v6476_v63 = vmul.f32 %v9340_v43, %v6322_v10  ;;  %v6480_v19 = vmul.f32 %v4993_v1, %v6322_v10  ;;  %v1003_v54 = vmul.f32 %v6441_v21, %v6396_v41 }
 0x1b5   : > { %v2669_v48 = vsel %vm2405_vm15, %v2667_v37, %v9371_v12  ;;  %v6485_v44 = vadd.f32 %v1465_v31, %v6187_v46  ;;  %v6490_v25 = vmul.f32 %v9372_v16, %v6322_v10  ;;  %v2804_v40 = vmul.f32 %v6099_v42, %v6322_v10  ;;  %v6525_v31 = vld [vmem:[#allocation2 + $0x110] sm:$0xff] }
 0x1b6   : > { %v3295_v53 = vand.u32 2147483647, %v6316_v34  ;;  %v2526_v4 = vadd.f32 %v9373_v52, %v2284_v2  ;;  %v4298_v37 = vmul.f32 -1.442695, %v6463_v38  ;;  %v3297_v46 = vand.u32 2147483648, %v6316_v34  ;;  %9378 = vst [vmem:[#allocation4_spill] sm:$0xff] %v6525_v31 }
 0x1b7   : > { %v3304_v58 = vmul.f32 %v6375_v22, %v3303_v6  ;;  %4562 = vrcp.f32 %v6471_v47  ;;  %v6502_v59 = vadd.f32 %v6301_v36, %v611_v49  ;;  %v3290_v15 = vadd.f32 %v6370_v9, %v3289_v33  ;;  %v6541_v52 = vld [vmem:[#allocation2 + $0xf8] sm:$0xff] }
 0x1b8   : > { %vm3292_vm0 = vweird.f32 %v6370_v9  ;;  %v3312_v10 = vand.u32 2147483648, %v6320_v56  ;;  %v1004_v23 = vsub.f32 1.0, %v1003_v54  ;;  %vm3291_vm1 = vweird.f32 %v6316_v34  ;;  %v9379_v54 = vld [vmem:[#allocation7_spill] sm:$0xff] }
 0x1b9   : > { %v2908_v3 = vrot.slane %v2804_v40, 2  ;;  %vm3306_vm2 = vweird.f32 %v6320_v56  ;;  %v3310_v61 = vand.u32 2147483647, %v6320_v56  ;;  %v2767_v36 = vadd.f32 %v2669_v48, %v2526_v4  ;;  %vm6512_vm3 = vmor %vm3291_vm1, %vm3292_vm0  ;;  %9380 = vst [vmem:[#allocation7_spill] sm:$0xff] %v6541_v52 }
 0x1ba   : > { %4564 = vpow2.f32 %v4298_v37  ;;  %vm6516_vm10 = vcmp.eq.f32.partialorder %v3295_v53, 8.507059e+37  ;;  %v6521_v34 = vadd.f32 %v6375_v22, %v3304_v58  ;;  %vm3307_vm12 = vweird.f32 %v6375_v22 }
 0x1bb   : > { %v4274_v8 = vmul.f32 -1.442695, %v6502_v59  ;;  %v3294_v2 = vsel %vm6512_vm3, %v6370_v9, %v3290_v15  ;;  %v3298_v12 = vor.u32 1.1754944e-38, %v3297_v46  ;;  %v6530_v48 = vor.u32 1.1754944e-38, %v3312_v10  ;;  %vm6549_vm4 = vmor %vm3306_vm2, %vm3307_vm12  ;;  %v6553_v46 = vld [vmem:[#allocation2 + $0xb0] sm:$0xff] }
 0x1bc   : > { %v1005_v6 = vmul.f32 %v6441_v21, %v1004_v23  ;;  %v1466_v49 = vmul.f32 %v9342_v62, %v9379_v54  ;;  %v2910_v40 = vsel %vm2405_vm15, %v2908_v3, %v2909_v24  ;;  %v1013_v53 = vand.u32 2147483648, %v6396_v41  ;;  %v9383_v24 = vld [vmem:[#allocation8_spill] sm:$0xff] }
 0x1bd   : > { %v6533_v33 = vpop.eup %4562  ;;  %v6545_v9 = vmul.f32 %v6541_v52, %v9340_v43  ;;  %v3008_v37 = vadd.f32 %v2910_v40, %v2767_v36  ;;  %vm1008_vm5 = vweird.f32 %v6441_v21  ;;  %v1011_v51 = vand.u32 2147483647, %v6396_v41 }
 0x1be   : > { %v6559_v58 = vmul.f32 %v9383_v24, %v6525_v31  ;;  %v6563_v15 = vsel %vm6516_vm10, %v3298_v12, %v3294_v2  ;;  %v3309_v56 = vsel %vm6549_vm4, %v6375_v22, %v6521_v34  ;;  %4566 = vpow2.f32 %v4274_v8 }
 0x1bf   : > { %v6571_v10 = vmul.f32 %v9342_v62, %v6525_v31  ;;  %vm6573_vm7 = vcmp.eq.f32.partialorder %v3310_v61, 8.507059e+37  ;;  %v6579_v36 = vmul.f32 %v9345_v5, %v9379_v54  ;;  %v1006_v17 = vadd.f32 %v6441_v21, %v1005_v6 }
 0x1c0   : > { %9384 = vst [vmem:[#allocation8_spill] sm:$0xff] %v6559_v58  ;;  %v4565_v23 = vpop.eup %4564  ;;  %vm1007_vm8 = vweird.f32 %v6396_v41  ;;  %v1018_v22 = vmul.f32 %v6533_v33, %v6471_v47  ;;  %v1498_v20 = vadd.f32 %v1466_v49, %v6436_v28  ;;  %v1844_v34 = vmul.f32 %v9345_v5, %v6270_v57 }
 0x1c1   : > { %v1531_v61 = vmul.f32 %v9383_v24, %v6553_v46  ;;  %vm1009_vm9 = vmor %vm1007_vm8, %vm1008_vm5  ;;  %v1014_v8 = vor.u32 1.1754944e-38, %v1013_v53  ;;  %v6593_v2 = vadd.f32 %v6180_v0, %v3008_v37  ;;  %vm1012_vm11 = vcmp.eq.f32.partialorder %v1011_v51, 8.507059e+37 }
 0x1c2   : > { %v1010_v41 = vsel %vm1009_vm9, %v6441_v21, %v1006_v17  ;;  %v1019_v12 = vsub.f32 1.0, %v1018_v22  ;;  %v6596_v6 = vadd.f32 1.0, %v4565_v23  ;;  %v1026_v49 = vand.u32 2147483647, %v6471_v47  ;;  %v6608_v17 = vld [vmem:[#allocation2 + $0xb8] sm:$0x3] }
 0x1c3   : > { %9387 = vst [vmem:[#allocation49_spill] sm:$0xff] %v6593_v2  ;;  %v1015_v28 = vsel %vm1012_vm11, %v1014_v8, %v1010_v41  ;;  %v1028_v40 = vand.u32 2147483648, %v6471_v47  ;;  %v1604_v4 = vmul.f32 %v4978_v55, %v9379_v54  ;;  %vm1023_vm13 = vweird.f32 %v6533_v33 }
 0x1c4   : > { %9388 = vst [vmem:[#allocation50_spill] sm:$0xff] %v6596_v6  ;;  %v1272_v50 = vmul.f32 %v1015_v28, %v9389_v30  ;;  %v1020_v53 = vmul.f32 %v6533_v33, %v1019_v12  ;;  %v4567_v37 = vpop.eup %4566  ;;  %v1605_v21 = vmul.f32 %v4978_v55, %v6270_v57  ;;  %v1949_v51 = vrot.slane %v6579_v36, 1 }
 0x1c5   : > { %v1951_v23 = vrot.slane %v1844_v34, 1  ;;  %v1563_v22 = vadd.f32 %v1531_v61, %v1498_v20  ;;  %v2328_v8 = vmul.f32 %v4993_v1, %v9379_v54  ;;  %v4297_v41 = vmul.f32 -1.442695, %v6593_v2  ;;  %v1386_v34 = vld [vmem:[#allocation2 + $0xa8] sm:$0xff] }
 0x1c6   : > { %1348 = vst [vmem:[#allocation2 + $0xc9] sm:$0xff] %v1272_v50  ;;  %v1021_v30 = vadd.f32 %v6533_v33, %v1020_v53  ;;  %vm1022_vm14 = vweird.f32 %v6471_v47  ;;  %v2329_v12 = vmul.f32 %v4993_v1, %v6270_v57  ;;  %4568 = vrcp.f32 %v6596_v6 }
 0x1c7   : > { %vm1024_vm0 = vmor %vm1022_vm14, %vm1023_vm13  ;;  %vm1027_vm1 = vcmp.eq.f32.partialorder %v1026_v49, 8.507059e+37  ;;  %v1029_v36 = vor.u32 1.1754944e-38, %v1028_v40  ;;  %v6620_v20 = vmul.f32 %v9338_v29, %v6553_v46  ;;  %v2085_v50 = vmul.f32 %v9338_v29, %v6608_v17 }
 0x1c8   : > { %v1025_v61 = vsel %vm1024_vm0, %v6533_v33, %v1021_v30  ;;  %v6625_v28 = vadd.f32 1.0, %v4567_v37  ;;  %v3314_v47 = vsel %vm6573_vm7, %v6530_v48, %v3309_v56  ;;  %v1713_v53 = vrot.slane %v1604_v4, 1 }
 0x1c9   : > { %v1805_v49 = vadd.f32 %v6447_v60, %v1563_v22  ;;  %v1030_v40 = vsel %vm1027_vm1, %v1029_v36, %v1025_v61  ;;  %v1715_v39 = vrot.slane %v1605_v21, 1  ;;  %v2567_v27 = vmul.f32 %v9372_v16, %v9379_v54  ;;  %v9391_v21 = vld [vmem:[#allocation5_spill] sm:$0xff]  ;;  %v6646_v22 = vld [vmem:[#allocation2 + $0x108] sm:$0xff] }
 0x1ca   : > { %4570 = vpow2.f32 %v4297_v41  ;;  %v1273_v7 = vmul.f32 %v1030_v40, %v6373_v32  ;;  %v1952_v45 = vsel %vm1681_vm6, %v1949_v51, %v1951_v23  ;;  %v2437_v33 = vrot.slane %v2328_v8, 2  ;;  %9393 = vst [vmem:[#allocation51_spill] sm:$0xff] %v6646_v22  ;;  %v9394_v8 = vld [vmem:[#allocation11_spill] sm:$0xff]  ;;  %v9395_v41 = vld [vmem:[#allocation29_spill] sm:$0xff] }
 0x1cb   : > { %v2568_v37 = vmul.f32 %v9372_v16, %v6270_v57  ;;  %v1530_v3 = vmul.f32 %v9383_v24, %v1386_v34  ;;  %v2439_v48 = vrot.slane %v2329_v12, 2  ;;  %v9123_v56 = vrot.slane %v6620_v20, 1 }
 0x1cc   : > { %v2192_v60 = vrot.slane %v2085_v50, 1  ;;  %1349 = vst [vmem:[#allocation2 + $0xd9] sm:$0xff] %v1273_v7  ;;  %4572 = vrcp.f32 %v6625_v28  ;;  %v6640_v4 = vpop.eup %4568  ;;  %v6644_v32 = vmul.f32 %v6563_v15, %v9391_v21  ;;  %v2046_v23 = vadd.f32 %v1952_v45, %v1805_v49  ;;  %v9397_v7 = vld [vmem:[#allocation46_spill] sm:$0xff] }
 0x1cd   : > { %9390 = vst [vmem:[#allocation42_spill] sm:$0xff] %v6640_v4  ;;  %v6650_v57 = vmul.f32 %v6646_v22, %v9340_v43  ;;  %v6654_v30 = vadd.f32 %v9395_v41, %v9394_v8  ;;  %v6657_v12 = vmul.f32 %v3314_v47, %v9397_v7  ;;  %v6661_v36 = vmul.f32 %v9340_v43, %v9379_v54 }
 0x1ce   : > { %9392 = vst [vmem:[#allocation5_spill] sm:$0xff] %v6644_v32  ;;  %v9399_v15 = vrot.slane %v6453_v14, 1  ;;  %v2673_v50 = vrot.slane %v2567_v27, 2  ;;  %v6669_v61 = vsel %vm1681_vm6, %v1713_v53, %v1715_v39  ;;  %v9400_v49 = vrot.slane %v6460_v18, 1 }
 0x1cf   : > { %9396 = vst [vmem:[#allocation11_spill] sm:$0xff] %v6654_v30  ;;  %v9401_v47 = vrot.slane %v6480_v19, 2  ;;  %v1562_v54 = vadd.f32 %v1530_v3, %v6485_v44  ;;  %v6681_v14 = vsel %vm2405_vm15, %v2437_v33, %v2439_v48  ;;  %v2675_v41 = vrot.slane %v2568_v37, 2 }
 0x1d0   : > { %9398 = vst [vmem:[#allocation29_spill] sm:$0xff] %v6657_v12  ;;  %v6666_v45 = vsel %vm1681_vm6, %v9399_v15, %v1713_v53  ;;  %v1950_v40 = vsel %vm1681_vm6, %v9400_v49, %v1949_v51  ;;  %v4571_v8 = vpop.eup %4570  ;;  %v3332_v27 = vmul.f32 %v6640_v4, %v6596_v6  ;;  %v2193_v18 = vsel %vm1681_vm6, %v9123_v56, %v2192_v60 }
 0x1d1   : > { %v6677_v21 = vsel %vm2405_vm15, %v9401_v47, %v2437_v33  ;;  %9403 = vst [vmem:[#allocation52_spill] sm:$0xff] %v6681_v14  ;;  %v6689_v39 = vmul.f32 %v9340_v43, %v1386_v34  ;;  %v1467_v19 = vmul.f32 %v9342_v62, %v1386_v34  ;;  %v6693_v51 = vmul.f32 %v4978_v55, %v1386_v34 }
 0x1d2   : > { %9402 = vst [vmem:[#allocation46_spill] sm:$0xff] %v6677_v21  ;;  %v2287_v44 = vadd.f32 %v2193_v18, %v2046_v23  ;;  %v6695_v53 = vpop.eup %4572  ;;  %v9404_v33 = vrot.slane %v6490_v25, 2  ;;  %v6703_v3 = vmul.f32 %v9345_v5, %v1386_v34  ;;  %v2083_v48 = vmul.f32 %v9338_v29, %v1386_v34 }
 0x1d3   : > { %v6707_v60 = vmul.f32 %v4993_v1, %v1386_v34  ;;  %v6709_v7 = vadd.f32 1.0, %v4571_v8  ;;  %v1804_v15 = vadd.f32 %v6439_v35, %v1562_v54  ;;  %v6713_v23 = vmul.f32 %v9372_v16, %v1386_v34  ;;  %v6738_v35 = vld [vmem:[#allocation2 + $0x120] sm:$0xff] }
 0x1d4   : > { %v6700_v37 = vsel %vm2405_vm15, %v9404_v33, %v2673_v50  ;;  %v6716_v25 = vmul.f32 %v6099_v42, %v1386_v34  ;;  %v2676_v49 = vsel %vm2405_vm15, %v2673_v50, %v2675_v41  ;;  %v3333_v47 = vsub.f32 1.0, %v3332_v27  ;;  %9407 = vst [vmem:[#allocation55_spill] sm:$0xff] %v6738_v35 }
 0x1d5   : > { %9405 = vst [vmem:[#allocation53_spill] sm:$0xff] %v6707_v60  ;;  %v6721_v18 = vmul.f32 %v6099_v42, %v6553_v46  ;;  %v2809_v33 = vmul.f32 %v6099_v42, %v6608_v17  ;;  %v6726_v8 = vadd.f32 %v1467_v19, %v6476_v63  ;;  %v2529_v54 = vadd.f32 %v6466_v13, %v2287_v44  ;;  %v6797_v60 = vld [vmem:[#allocation2 + $0x150] sm:$0xff] }
 0x1d6   : > { %9406 = vst [vmem:[#allocation54_spill] sm:$0xff] %v6709_v7  ;;  %v1033_v34 = vmul.f32 %v6695_v53, %v6625_v28  ;;  %v3342_v50 = vand.u32 2147483648, %v6596_v6  ;;  %v2189_v27 = vrot.slane %v2083_v48, 1  ;;  %4574 = vrcp.f32 %v6709_v7  ;;  %v6746_v48 = vld [vmem:[#allocation2 + $0x128] sm:$0xff] }
 0x1d7   : > { %v2045_v19 = vadd.f32 %v1950_v40, %v1804_v15  ;;  %v3334_v13 = vmul.f32 %v6640_v4, %v3333_v47  ;;  %v2916_v2 = vrot.slane %v2809_v33, 2  ;;  %v6744_v41 = vmul.f32 %v9340_v43, %v6525_v31  ;;  %9408 = vst [vmem:[#allocation56_spill] sm:$0xff] %v6746_v48  ;;  %v6753_v15 = vld [vmem:[#allocation2 + $0x138] sm:$0xff]  ;;  %v6755_v47 = vld [vmem:[#allocation2 + $0x140] sm:$0xff] }
 0x1d8   : > { %vm3336_vm2 = vweird.f32 %v6596_v6  ;;  %v2770_v56 = vadd.f32 %v2676_v49, %v2529_v54  ;;  %v1034_v42 = vsub.f32 1.0, %v1033_v34  ;;  %v6751_v40 = vmul.f32 %v9340_v43, %v6738_v35  ;;  %9409 = vst [vmem:[#allocation57_spill] sm:$0xff] %v6753_v15  ;;  %v1389_v31 = vld [vmem:[#allocation2 + $0xc0] sm:$0xff] }
 0x1d9   : > { %9410 = vst [vmem:[#allocation58_spill] sm:$0xff] %v6755_v47  ;;  %vm3337_vm3 = vweird.f32 %v6640_v4  ;;  %v6759_v63 = vor.u32 1.1754944e-38, %v3342_v50  ;;  %v6763_v44 = vmul.f32 %v9340_v43, %v6746_v48  ;;  %v6767_v49 = vmul.f32 %v9340_v43, %v6753_v15 }
 0x1da   : > { %v6771_v54 = vmul.f32 %v9340_v43, %v6755_v47  ;;  %v6775_v34 = vmul.f32 %v9342_v62, %v6738_v35  ;;  %v6779_v50 = vmul.f32 %v9342_v62, %v6746_v48  ;;  %v6782_v33 = vadd.f32 %v6640_v4, %v3334_v13  ;;  %9416 = vst [vmem:[#allocation63_spill] sm:$0xff] %v6797_v60  ;;  %vm6816_vm12 = vmor %vm3336_vm2, %vm3337_vm3 }
 0x1db   : > { %9411 = vst [vmem:[#allocation59_spill] sm:$0xff] %v6759_v63  ;;  %v9414_v38 = vrot.slane %v6721_v18, 2  ;;  %v1043_v63 = vand.u32 2147483648, %v6625_v28  ;;  %v6790_v11 = vmul.f32 %v9342_v62, %v6753_v15  ;;  %v1035_v21 = vmul.f32 %v6695_v53, %v1034_v42 }
 0x1dc   : > { %9412 = vst [vmem:[#allocation60_spill] sm:$0xff] %v6771_v54  ;;  %v6792_v32 = vpop.eup %4574  ;;  %vm1038_vm10 = vweird.f32 %v6695_v53  ;;  %v1041_v13 = vand.u32 2147483647, %v6625_v28  ;;  %v9417_v58 = vrot.slane %v6620_v20, 1  ;;  %v9419_v42 = vmov 0 }
 0x1dd   : > { %9413 = vst [vmem:[#allocation61_spill] sm:$0xff] %v6782_v33  ;;  %v2917_v12 = vsel %vm2405_vm15, %v9414_v38, %v2916_v2  ;;  %v1607_v38 = vmul.f32 %v4978_v55, %v6553_v46  ;;  %v1608_v2 = vmul.f32 %v4978_v55, %v6608_v17  ;;  %v9420_v42 = vsel %vm6816_vm12, 4294967295, %v9419_v42 }
 0x1de   : > { %9415 = vst [vmem:[#allocation62_spill] sm:$0xff] %v6792_v32  ;;  %v3011_v7 = vadd.f32 %v2917_v12, %v2770_v56  ;;  %v2191_v14 = vsel %vm1681_vm6, %v2189_v27, %v9417_v58  ;;  %v6808_v56 = vmul.f32 %v9342_v62, %v6755_v47  ;;  %v6810_v12 = vld [vmem:[#allocation2 + $0x158] sm:$0xff]  ;;  %v1846_v32 = vmul.f32 %v9345_v5, %v6553_v46 }
 0x1df   : > { %9418 = vst [vmem:[#allocation64_spill] sm:$0xff] %v6810_v12  ;;  %v1036_v20 = vadd.f32 %v6695_v53, %v1035_v21  ;;  %vm1037_vm4 = vweird.f32 %v6625_v28  ;;  %v6826_v58 = vmul.f32 %v9342_v62, %v6797_v60  ;;  %v1468_v6 = vmul.f32 %v9342_v62, %v6553_v46 }
 0x1e0   : > { %9421 = vst [vmem:[#allocation65_spill] sm:$0xff] %v9420_v42  ;;  %vm1039_vm5 = vmor %vm1037_vm4, %vm1038_vm10  ;;  %v1044_v22 = vor.u32 1.1754944e-38, %v1043_v63  ;;  %v6838_v28 = vmul.f32 %v9342_v62, %v6810_v12  ;;  %v2286_v21 = vadd.f32 %v2191_v14, %v2045_v19  ;;  %v6841_v52 = vadd.f32 %v6180_v0, %v3011_v7  ;;  %v6864_v19 = vld [vmem:[#allocation2 + $0xc8] sm:$0xff] }
 0x1e1   : > { %v1040_v30 = vsel %vm1039_vm5, %v6695_v53, %v1036_v20  ;;  %vm1042_vm7 = vcmp.eq.f32.partialorder %v1041_v13, 8.507059e+37  ;;  %v1718_v27 = vrot.slane %v1607_v38, 1  ;;  %v1720_v33 = vrot.slane %v1608_v2, 1 }
 0x1e2   : > { %9422 = vst [vmem:[#allocation66_spill] sm:$0xff] %v6838_v28  ;;  %v1847_v4 = vmul.f32 %v9345_v5, %v6608_v17  ;;  %v1045_v42 = vsel %vm1042_vm7, %v1044_v22, %v1040_v30  ;;  %v1954_v54 = vrot.slane %v1846_v32, 1  ;;  %v6848_v63 = vmul.f32 %v4993_v1, %v6553_v46 }
 0x1e3   : > { %9423 = vst [vmem:[#allocation67_spill] sm:$0xff] %v6841_v52  ;;  %v1532_v28 = vmul.f32 %v9383_v24, %v1389_v31  ;;  %v1274_v14 = vmul.f32 %v1045_v42, %v6502_v59  ;;  %v2332_v0 = vmul.f32 %v4993_v1, %v6608_v17  ;;  %v2570_v53 = vmul.f32 %v9372_v16, %v6553_v46 }
 0x1e4   : > { %9424 = vst [vmem:[#allocation68_spill] sm:$0xff] %v6848_v63  ;;  %v2571_v7 = vmul.f32 %v9372_v16, %v6608_v17  ;;  %v6860_v32 = vmul.f32 %v9340_v43, %v6797_v60  ;;  %v2528_v22 = vadd.f32 %v6456_v26, %v2286_v21  ;;  %v4300_v30 = vmul.f32 -1.442695, %v6841_v52 }
 0x1e5   : > { %1350 = vst [vmem:[#allocation2 + $0xe1] sm:$0xff] %v1274_v14  ;;  %v6868_v59 = vmul.f32 %v9340_v43, %v6810_v12  ;;  %v6872_v13 = vadd.f32 %v6571_v10, %v6545_v9  ;;  %v6876_v17 = vmul.f32 %v9340_v43, %v6553_v46  ;;  %v1500_v38 = vadd.f32 %v1468_v6, %v6661_v36 }
 0x1e6   : > { %v9425_v26 = vrot.slane %v6693_v51, 1  ;;  %v1956_v42 = vrot.slane %v1847_v4, 1  ;;  %v6885_v20 = vsel %vm1681_vm6, %v1718_v27, %v1720_v33  ;;  %v9428_v21 = vrot.slane %v6703_v3, 1 }
 0x1e7   : > { %9427 = vst [vmem:[#allocation70_spill] sm:$0xff] %v6885_v20  ;;  %v9143_v10 = vrot.slane %v6848_v63, 2  ;;  %v1564_v46 = vadd.f32 %v1532_v28, %v6726_v8  ;;  %v2444_v14 = vrot.slane %v2332_v0, 2  ;;  %v2678_v52 = vrot.slane %v2570_v53, 2 }
 0x1e8   : > { %v6882_v2 = vsel %vm1681_vm6, %v9425_v26, %v1718_v27  ;;  %v1955_v9 = vsel %vm1681_vm6, %v9428_v21, %v1954_v54  ;;  %v2680_v6 = vrot.slane %v2571_v7, 2  ;;  %v1533_v36 = vmul.f32 %v9383_v24, %v6864_v19  ;;  %v6919_v7 = vld [vmem:[%s9066_s3 + $0x8] ss:$0 sm:$0xff] }
 0x1e9   : > { %9426 = vst [vmem:[#allocation69_spill] sm:$0xff] %v6882_v2  ;;  %v2769_v51 = vadd.f32 %v6700_v37, %v2528_v22  ;;  %4576 = vpow2.f32 %v4300_v30  ;;  %v1469_v4 = vmul.f32 %v9342_v62, %v1389_v31  ;;  %v6897_v33 = vmul.f32 %v4978_v55, %v1389_v31 }
 0x1ea   : > { %v6900_v3 = vmul.f32 %v9345_v5, %v1389_v31  ;;  %v6903_v27 = vmul.f32 %v9338_v29, %v1389_v31  ;;  %v6906_v8 = vmul.f32 %v4993_v1, %v1389_v31  ;;  %v6909_v28 = vmul.f32 %v9372_v16, %v1389_v31  ;;  %9431 = vst [vmem:[#allocation73_spill] sm:$0xff] %v6919_v7 }
 0x1eb   : > { %v1957_v37 = vsel %vm1681_vm6, %v1954_v54, %v1956_v42  ;;  %v6913_v0 = vmul.f32 %v9340_v43, %v1389_v31  ;;  %v1806_v53 = vadd.f32 %v6666_v45, %v1564_v46  ;;  %v6922_v22 = vmul.f32 %v6919_v7, %v1389_v31  ;;  %v6939_v46 = vld [vmem:[#allocation2 + $0xd0] sm:$0x3] }
 0x1ec   : > { %9429 = vst [vmem:[#allocation71_spill] sm:$0xff] %v6906_v8  ;;  %v6927_v30 = vsel %vm2405_vm15, %v9143_v10, %v2444_v14  ;;  %v9434_v54 = vrot.slane %v6713_v23, 2  ;;  %v9436_v45 = vrot.slane %v6721_v18, 2  ;;  %v9437_v42 = vrot.slane %v6716_v25, 2 }
 0x1ed   : > { %9430 = vst [vmem:[#allocation72_spill] sm:$0xff] %v6909_v28  ;;  %v1565_v31 = vadd.f32 %v1533_v36, %v1500_v38  ;;  %v6942_v20 = vsel %vm2405_vm15, %v2678_v52, %v2680_v6  ;;  %v6947_v14 = vadd.f32 %v1469_v4, %v6689_v39  ;;  %v6954_v38 = vld [vmem:[#allocation2 + $0x168] sm:$0xff]  ;;  %v6959_v36 = vadd.f32 %v1955_v9, %v1806_v53  ;;  %v6965_v4 = vld [vmem:[#allocation2 + $0x180] sm:$0xff] }
 0x1ee   : > { %9432 = vst [vmem:[#allocation74_spill] sm:$0xff] %v6922_v22  ;;  %v6932_v26 = vsel %vm2405_vm15, %v9434_v54, %v2678_v52  ;;  %v2915_v21 = vsel %vm2405_vm15, %v9437_v42, %v9436_v45  ;;  %v6956_v52 = vld [vmem:[#allocation2 + $0x170] sm:$0xff]  ;;  %v2087_v39 = vmul.f32 %v9338_v29, %v6864_v19  ;;  %v6968_v45 = vld [vmem:[#allocation2 + $0x188] sm:$0xff]  ;;  %v6972_v25 = vmul.f32 %v9340_v43, %v6954_v38 }
 0x1ef   : > { %9433 = vst [vmem:[#allocation75_spill] sm:$0xff] %v6927_v30  ;;  %v6944_v63 = vadd.f32 %v2915_v21, %v2769_v51  ;;  %v4577_v42 = vpop.eup %4576  ;;  %v2088_v51 = vmul.f32 %v9338_v29, %v6939_v46  ;;  %v1807_v21 = vadd.f32 %v6669_v61, %v1565_v31  ;;  %v6976_v9 = vmul.f32 %v9340_v43, %v6956_v52 }
 0x1f0   : > { %9435 = vst [vmem:[#allocation76_spill] sm:$0xff] %v6932_v26  ;;  %v6980_v53 = vmul.f32 %v9342_v62, %v6954_v38  ;;  %v6984_v6 = vmul.f32 %v9342_v62, %v6956_v52  ;;  %v6988_v61 = vmul.f32 %v9342_v62, %v6965_v4  ;;  %v1540_v31 = vmul.f32 %v9383_v24, %v6738_v35 }
 0x1f1   : > { %9438 = vst [vmem:[#allocation77_spill] sm:$0xff] %v6944_v63  ;;  %v1541_v10 = vmul.f32 %v9383_v24, %v6746_v48  ;;  %v6994_v54 = vadd.f32 1.0, %v4577_v42  ;;  %v1542_v23 = vmul.f32 %v9383_v24, %v6753_v15  ;;  %v1543_v18 = vmul.f32 %v9383_v24, %v6755_v47 }
 0x1f2   : > { %9439 = vst [vmem:[#allocation78_spill] sm:$0xff] %v6954_v38  ;;  %v1544_v63 = vmul.f32 %v9383_v24, %v6797_v60  ;;  %v2195_v22 = vrot.slane %v2087_v39, 1  ;;  %v2197_v26 = vrot.slane %v2088_v51, 1  ;;  %v7004_v28 = vmul.f32 %v9342_v62, %v6968_v45  ;;  %v9444_v51 = vld [vmem:[#allocation60_spill] sm:$0xff]  ;;  %v9445_v60 = vld [vmem:[#allocation66_spill] sm:$0xff] }
 0x1f3   : > { %9440 = vst [vmem:[#allocation79_spill] sm:$0xff] %v6956_v52  ;;  %v1509_v8 = vadd.f32 %v6775_v34, %v6650_v57  ;;  %v2048_v42 = vadd.f32 %v1957_v37, %v1807_v21  ;;  %v1510_v30 = vadd.f32 %v6779_v50, %v6744_v41  ;;  %v1511_v15 = vadd.f32 %v6790_v11, %v6751_v40  ;;  %v9446_v57 = vld [vmem:[#allocation11_spill] sm:$0xff]  ;;  %v7054_v37 = vld [vmem:[#allocation2 + $0xd8] sm:$0xff] }
 0x1f4   : > { %9441 = vst [vmem:[#allocation80_spill] sm:$0xff] %v6965_v4  ;;  %v7014_v47 = vadd.f32 %v6808_v56, %v6763_v44  ;;  %v7018_v39 = vadd.f32 %v6826_v58, %v6767_v49  ;;  %v7022_v2 = vadd.f32 %v9445_v60, %v9444_v51  ;;  %v7025_v34 = vadd.f32 %v1540_v31, %v9446_v57  ;;  %v9452_v50 = vld [vmem:[#allocation7_spill] sm:$0xff] }
 0x1f5   : > { %9442 = vst [vmem:[#allocation81_spill] sm:$0xff] %v6968_v45  ;;  %v7028_v41 = vadd.f32 %v1541_v10, %v6872_v13  ;;  %4578 = vrcp.f32 %v6994_v54  ;;  %v7031_v11 = vadd.f32 %v1542_v23, %v1509_v8  ;;  %v7033_v44 = vadd.f32 %v1543_v18, %v1510_v30  ;;  %v9453_v58 = vld [vmem:[#allocation51_spill] sm:$0xff]  ;;  %v9456_v23 = vld [vmem:[#allocation4_spill] sm:$0xff] }
 0x1f6   : > { %9443 = vst [vmem:[#allocation82_spill] sm:$0xff] %v6994_v54  ;;  %v7035_v40 = vadd.f32 %v1544_v63, %v1511_v15  ;;  %v1610_v49 = vmul.f32 %v4978_v55, %v6864_v19  ;;  %v2198_v60 = vsel %vm1681_vm6, %v2195_v22, %v2197_v26  ;;  %v7042_v56 = vmul.f32 %v9452_v50, %v4978_v55 }
 0x1f7   : > { %9447 = vst [vmem:[#allocation60_spill] sm:$0xff] %v7025_v34  ;;  %v7046_v13 = vmul.f32 %v9453_v58, %v4978_v55  ;;  %v1611_v10 = vmul.f32 %v4978_v55, %v6939_v46  ;;  %v1849_v15 = vmul.f32 %v9345_v5, %v6864_v19  ;;  %v1850_v63 = vmul.f32 %v9345_v5, %v6939_v46 }
 0x1f8   : > { %9448 = vst [vmem:[#allocation66_spill] sm:$0xff] %v7028_v41  ;;  %v2289_v8 = vadd.f32 %v2198_v60, %v2048_v42  ;;  %v7058_v30 = vmul.f32 %v4993_v1, %v6864_v19  ;;  %v2335_v26 = vmul.f32 %v4993_v1, %v6939_v46  ;;  %v7064_v18 = vmul.f32 %v4978_v55, %v9456_v23 }
 0x1f9   : > { %9449 = vst [vmem:[#allocation11_spill] sm:$0xff] %v7031_v11  ;;  %v7068_v21 = vmul.f32 %v4978_v55, %v6738_v35  ;;  %v7072_v31 = vmul.f32 %v9372_v16, %v6864_v19  ;;  %v2574_v42 = vmul.f32 %v9372_v16, %v6939_v46  ;;  %v7078_v51 = vmul.f32 %v6919_v7, %v6864_v19  ;;  %v9462_v11 = vld [vmem:[#allocation52_spill] sm:$0xff] }
 0x1fa   : > { %9450 = vst [vmem:[#allocation83_spill] sm:$0xff] %v7033_v44  ;;  %v2812_v57 = vmul.f32 %v6919_v7, %v6939_v46  ;;  %v1470_v60 = vmul.f32 %v9342_v62, %v6864_v19  ;;  %v1723_v50 = vrot.slane %v1610_v49, 1  ;;  %v1471_v54 = vmul.f32 %v9342_v62, %v7054_v37 }
 0x1fb   : > { %9451 = vst [vmem:[#allocation84_spill] sm:$0xff] %v7035_v40  ;;  %v7088_v35 = vmul.f32 %v4978_v55, %v6746_v48  ;;  %v7090_v23 = vpop.eup %4578  ;;  %v1725_v58 = vrot.slane %v1611_v10, 1  ;;  %v1959_v40 = vrot.slane %v1849_v15, 1  ;;  %v1961_v44 = vrot.slane %v1850_v63, 1 }
 0x1fc   : > { %9454 = vst [vmem:[#allocation7_spill] sm:$0xff] %v7054_v37  ;;  %v2531_v41 = vadd.f32 %v9462_v11, %v2289_v8  ;;  %v9463_v46 = vrot.slane %v6903_v27, 1  ;;  %v9164_v49 = vrot.slane %v7058_v30, 2  ;;  %v2449_v1 = vrot.slane %v2335_v26, 2 }
 0x1fd   : > { %9455 = vst [vmem:[#allocation85_spill] sm:$0xff] %v7058_v30  ;;  %v9163_v48 = vrot.slane %v7072_v31, 2  ;;  %v2921_v10 = vrot.slane %v2812_v57, 2  ;;  %v7103_v15 = vmul.f32 %v9340_v43, %v6864_v19  ;;  %v1503_v27 = vadd.f32 %v1471_v54, %v6913_v0 }
 0x1fe   : > { %9457 = vst [vmem:[#allocation86_spill] sm:$0xff] %v7068_v21  ;;  %v2196_v34 = vsel %vm1681_vm6, %v9463_v46, %v2195_v22  ;;  %v1440_v21 = vmul.f32 %v9340_v43, %v7054_v37  ;;  %v1534_v22 = vmul.f32 %v9383_v24, %v7054_v37  ;;  %v7110_v11 = vmul.f32 %v4978_v55, %v7054_v37 }
 0x1ff   : > { %9458 = vst [vmem:[#allocation87_spill] sm:$0xff] %v7072_v31  ;;  %v7113_v63 = vadd.f32 %v1470_v60, %v6876_v17  ;;  %v9464_v8 = vrot.slane %v6897_v33, 1  ;;  %v7121_v19 = vsel %vm1681_vm6, %v1723_v50, %v1725_v58  ;;  %v2772_v0 = vadd.f32 %v6942_v20, %v2531_v41  ;;  %v9470_v41 = vld [vmem:[#allocation12_spill] sm:$0xff] }
 0x200   : > { %9459 = vst [vmem:[#allocation88_spill] sm:$0xff] %v7078_v51  ;;  %v9465_v54 = vrot.slane %v6900_v3, 1  ;;  %v7130_v57 = vsel %vm1681_vm6, %v1959_v40, %v1961_v44  ;;  %v7133_v17 = vadd.f32 %v2196_v34, %v6959_v36  ;;  %v7138_v33 = vsel %vm2405_vm15, %v9164_v49, %v2449_v1  ;;  %v7162_v60 = vld [vmem:[#allocation2 + $0x198] sm:$0xff]  ;;  %v7196_v49 = vld [vmem:[#allocation2 + $0xe0] sm:$0xff] }
 0x201   : > { %9460 = vst [vmem:[#allocation89_spill] sm:$0xff] %v7088_v35  ;;  %v2685_v35 = vrot.slane %v2574_v42, 2  ;;  %v7118_v26 = vsel %vm1681_vm6, %v9464_v8, %v1723_v50  ;;  %v1505_v44 = vadd.f32 %v9470_v41, %v1440_v21  ;;  %v7151_v36 = vmul.f32 %v9345_v5, %v7054_v37  ;;  %v7190_v41 = vld [vmem:[#allocation2 + $0x8] sm:$0xff] }
 0x202   : > { %9461 = vst [vmem:[#allocation90_spill] sm:$0xff] %v7090_v23  ;;  %v9162_v23 = vrot.slane %v7078_v51, 2  ;;  %v7127_v42 = vsel %vm1681_vm6, %v9465_v54, %v1959_v40  ;;  %v1566_v34 = vadd.f32 %v1534_v22, %v6947_v14  ;;  %v9472_v40 = vld [vmem:[#allocation13_spill] sm:$0xff]  ;;  %v7168_v21 = vmul.f32 %v9372_v16, %v7054_v37 }
 0x203   : > { %9466 = vst [vmem:[#allocation52_spill] sm:$0xff] %v7127_v42  ;;  %v7143_v20 = vsel %vm2405_vm15, %v9163_v48, %v2685_v35  ;;  %v7155_v1 = vadd.f32 %v9472_v40, %v1503_v27  ;;  %v7160_v35 = vmul.f32 %v9338_v29, %v7054_v37  ;;  %v7172_v14 = vmul.f32 %v6919_v7, %v7054_v37 }
 0x204   : > { %9467 = vst [vmem:[#allocation91_spill] sm:$0xff] %v7133_v17  ;;  %v2922_v3 = vsel %vm2405_vm15, %v9162_v23, %v2921_v10  ;;  %v1545_v46 = vmul.f32 %v9383_v24, %v6810_v12  ;;  %v1546_v10 = vmul.f32 %v9383_v24, %v6954_v38  ;;  %v1547_v27 = vmul.f32 %v9383_v24, %v6956_v52 }
 0x205   : > { %9468 = vst [vmem:[#allocation92_spill] sm:$0xff] %v7138_v33  ;;  %v7164_v50 = vadd.f32 %v2922_v3, %v2772_v0  ;;  %v1548_v22 = vmul.f32 %v9383_v24, %v6965_v4  ;;  %v1549_v8 = vmul.f32 %v9383_v24, %v6968_v45  ;;  %v1517_v0 = vadd.f32 %v6988_v61, %v6972_v25  ;;  %v9489_v31 = vld [vmem:[#allocation86_spill] sm:$0xff] }
 0x206   : > { %9469 = vst [vmem:[#allocation93_spill] sm:$0xff] %v7143_v20  ;;  %v1518_v54 = vadd.f32 %v7004_v28, %v6976_v9  ;;  %v1550_v3 = vmul.f32 %v9383_v24, %v7162_v60  ;;  %v1551_v40 = vmul.f32 %v7190_v41, %v9383_v24  ;;  %v1515_v25 = vadd.f32 %v6980_v53, %v6860_v32  ;;  %v9479_v9 = vld [vmem:[#allocation69_spill] sm:$0xff] }
 0x207   : > { %9471 = vst [vmem:[#allocation12_spill] sm:$0xff] %v7151_v36  ;;  %v1516_v28 = vadd.f32 %v6984_v6, %v6868_v59  ;;  %v7203_v61 = vadd.f32 %v9479_v9, %v1566_v34  ;;  %v7210_v23 = vadd.f32 %v1545_v46, %v7014_v47  ;;  %v7213_v48 = vadd.f32 %v1546_v10, %v7018_v39  ;;  %v9482_v34 = vld [vmem:[#allocation57_spill] sm:$0xff]  ;;  %v9484_v39 = vld [vmem:[#allocation58_spill] sm:$0xff] }
 0x208   : > { %9473 = vst [vmem:[#allocation13_spill] sm:$0xff] %v7162_v60  ;;  %v7216_v20 = vadd.f32 %v1547_v27, %v7022_v2  ;;  %v7218_v32 = vadd.f32 %v1548_v22, %v1515_v25  ;;  %v1535_v6 = vmul.f32 %v9383_v24, %v7196_v49  ;;  %v7224_v53 = vadd.f32 %v1550_v3, %v1517_v0  ;;  %v7234_v46 = vld [vmem:[#allocation2 + $0x148] sm:$0x3]  ;;  %v9486_v27 = vld [vmem:[#allocation16_spill] sm:$0xff]  ;;  %v9490_v17 = vld [vmem:[#allocation89_spill] sm:$0xff] }
 0x209   : > { %9474 = vst [vmem:[#allocation94_spill] sm:$0xff] %v7164_v50  ;;  %v9481_v50 = vld [vmem:[#allocation30_spill] sm:$0xff]  ;;  %v7220_v59 = vadd.f32 %v1549_v8, %v1516_v28  ;;  %v1624_v47 = vmul.f32 %v4978_v55, %v9482_v34  ;;  %v1625_v2 = vmul.f32 %v4978_v55, %v9484_v39  ;;  %v1626_v10 = vmul.f32 %v7234_v46, %v4978_v55  ;;  %v9487_v8 = vld [vmem:[#allocation63_spill] sm:$0xff]  ;;  %v7250_v25 = vld [vmem:[#allocation2 + $0x178] sm:$0x3] }
 0x20a   : > { %9475 = vst [vmem:[#allocation95_spill] sm:$0xff] %v7168_v21  ;;  %v7207_v51 = vadd.f32 %v9481_v50, %v1505_v44  ;;  %v7226_v44 = vadd.f32 %v1551_v40, %v1518_v54  ;;  %v7230_v50 = vld [vmem:[#allocation2 + $0x160] sm:$0x3]  ;;  %v1732_v22 = vrot.slane %v9486_v27, 1  ;;  %v1733_v24 = vrot.slane %v7042_v56, 1 }
 0x20b   : > { %9476 = vst [vmem:[#allocation96_spill] sm:$0xff] %v7172_v14  ;;  %v1627_v0 = vmul.f32 %v4978_v55, %v9487_v8  ;;  %v1628_v54 = vmul.f32 %v4978_v55, %v6810_v12  ;;  %v1629_v3 = vmul.f32 %v4978_v55, %v7230_v50  ;;  %v7248_v40 = vmul.f32 %v4978_v55, %v6954_v38  ;;  %v1394_v28 = vld [vmem:[#allocation2 + $0xe8] sm:$0x3] }
 0x20c   : > { %9477 = vst [vmem:[#allocation97_spill] sm:$0xff] %v7190_v41  ;;  %v1472_v9 = vmul.f32 %v9342_v62, %v7196_v49  ;;  %v7256_v56 = vmul.f32 %v4978_v55, %v6956_v52  ;;  %v1737_v27 = vrot.slane %v7046_v13, 1  ;;  %v1738_v58 = vrot.slane %v7064_v18, 1 }
 0x20d   : > { %9478 = vst [vmem:[#allocation98_spill] sm:$0xff] %v7196_v49  ;;  %v1567_v14 = vadd.f32 %v1535_v6, %v7113_v63  ;;  %v7263_v21 = vmul.f32 %v4978_v55, %v7250_v25  ;;  %v1742_v33 = vrot.slane %v9489_v31, 1  ;;  %v1743_v30 = vrot.slane %v9490_v17, 1  ;;  %v9491_v6 = vld [vmem:[#allocation21_spill] sm:$0xff] }
 0x20e   : > { %9480 = vst [vmem:[#allocation69_spill] sm:$0xff] %v7203_v61  ;;  %v1734_v62 = vsel %vm1681_vm6, %v1732_v22, %v1733_v24  ;;  %v1747_v37 = vrot.slane %v1624_v47, 1  ;;  %v1748_v41 = vrot.slane %v1625_v2, 1  ;;  %v1750_v60 = vrot.slane %v1626_v10, 1  ;;  %v9493_v10 = vld [vmem:[#allocation70_spill] sm:$0xff]  ;;  %v9494_v22 = vld [vmem:[#allocation32_spill] sm:$0xff] }
 0x20f   : > { %9483 = vst [vmem:[#allocation30_spill] sm:$0xff] %v7230_v50  ;;  %v1441_v13 = vmul.f32 %v9340_v43, %v7196_v49  ;;  %v1613_v18 = vmul.f32 %v4978_v55, %v7196_v49  ;;  %v1614_v63 = vmul.f32 %v4978_v55, %v1394_v28  ;;  %v9492_v42 = vrot.slane %v9491_v6, 1  ;;  %v9496_v6 = vld [vmem:[#allocation37_spill] sm:$0xff] }
 0x210   : > { %9485 = vst [vmem:[#allocation57_spill] sm:$0xff] %v7234_v46  ;;  %v1504_v31 = vadd.f32 %v1472_v9, %v7103_v15  ;;  %v2090_v17 = vmul.f32 %v9338_v29, %v7196_v49  ;;  %v2091_v47 = vmul.f32 %v9338_v29, %v1394_v28  ;;  %v1739_v2 = vsel %vm1681_vm6, %v1737_v27, %v1738_v58  ;;  %v9498_v27 = vld [vmem:[#allocation25_spill] sm:$0xff] }
 0x211   : > { %9488 = vst [vmem:[#allocation58_spill] sm:$0xff] %v7250_v25  ;;  %v1736_v61 = vsel %vm1681_vm6, %v1733_v24, %v9492_v42  ;;  %v1809_v43 = vadd.f32 %v9493_v10, %v1567_v14  ;;  %v9495_v36 = vrot.slane %v9494_v22, 1  ;;  %v1744_v55 = vsel %vm1681_vm6, %v1742_v33, %v1743_v30  ;;  %v9499_v33 = vld [vmem:[#allocation26_spill] sm:$0xff] }
 0x212   : > { %v9497_v4 = vrot.slane %v9496_v6, 1  ;;  %v7291_v15 = vmul.f32 %v9345_v5, %v7196_v49  ;;  %v1853_v24 = vmul.f32 %v9345_v5, %v1394_v28  ;;  %v1749_v9 = vsel %vm1681_vm6, %v1747_v37, %v1748_v41 }
 0x213   : > { %v1741_v45 = vsel %vm1681_vm6, %v1738_v58, %v9495_v36  ;;  %v1751_v14 = vsel %vm1681_vm6, %v1748_v41, %v1750_v60  ;;  %v1506_v10 = vadd.f32 %v9498_v27, %v1441_v13  ;;  %v1728_v22 = vrot.slane %v1613_v18, 1  ;;  %v9500_v13 = vld [vmem:[#allocation8_spill] sm:$0xff]  ;;  %v9508_v27 = vld [vmem:[#allocation11_spill] sm:$0xff] }
 0x214   : > { %v1746_v42 = vsel %vm1681_vm6, %v1743_v30, %v9497_v4  ;;  %v1730_v36 = vrot.slane %v1614_v63, 1  ;;  %v1752_v58 = vrot.slane %v1627_v0, 1  ;;  %v1569_v29 = vadd.f32 %v9499_v33, %v1504_v31  ;;  %v9502_v63 = vld [vmem:[#allocation6_spill] sm:$0xff] }
 0x215   : > { %v2200_v6 = vrot.slane %v2090_v17, 1  ;;  %v2202_v25 = vrot.slane %v2091_v47, 1  ;;  %v1753_v4 = vrot.slane %v1628_v54, 1  ;;  %v2050_v30 = vadd.f32 %v7130_v57, %v1809_v43  ;;  %v9505_v47 = vld [vmem:[#allocation60_spill] sm:$0xff] }
 0x216   : > { %v1755_v52 = vrot.slane %v1629_v3, 1  ;;  %v1757_v38 = vrot.slane %v7248_v40, 1  ;;  %v1758_v50 = vrot.slane %v7256_v56, 1  ;;  %v1964_v37 = vrot.slane %v7291_v15, 1 }
 0x217   : > { %v1966_v60 = vrot.slane %v1853_v24, 1  ;;  %v1760_v41 = vrot.slane %v7263_v21, 1  ;;  %v7305_v0 = vadd.f32 %v7118_v26, %v7155_v1  ;;  %v1571_v18 = vadd.f32 %v9500_v13, %v1506_v10  ;;  %v9515_v13 = vld [vmem:[#allocation84_spill] sm:$0xff] }
 0x218   : > { %v1731_v54 = vsel %vm1681_vm6, %v1728_v22, %v1730_v36  ;;  %v7311_v57 = vmul.f32 %v6919_v7, %v7196_v49  ;;  %v2815_v3 = vmul.f32 %v6919_v7, %v1394_v28  ;;  %v1811_v40 = vadd.f32 %v7121_v19, %v1569_v29  ;;  %v9530_v49 = vld [vmem:[#allocation17_spill] sm:$0xff] }
 0x219   : > { %v2203_v56 = vsel %vm1681_vm6, %v2200_v6, %v2202_v25  ;;  %v7317_v21 = vmul.f32 %v9502_v63, %v1394_v28  ;;  %v7320_v26 = vmul.f32 %v9372_v16, %v1394_v28  ;;  %v1754_v31 = vsel %vm1681_vm6, %v1752_v58, %v1753_v4  ;;  %v9507_v25 = vld [vmem:[#allocation66_spill] sm:$0xff] }
 0x21a   : > { %9501 = vst [vmem:[#allocation16_spill] sm:$0xff] %v7311_v57  ;;  %v2291_v1 = vadd.f32 %v2203_v56, %v2050_v30  ;;  %v1756_v17 = vsel %vm1681_vm6, %v1753_v4, %v1755_v52  ;;  %v7325_v43 = vadd.f32 %v1734_v62, %v9505_v47  ;;  %v1967_v15 = vsel %vm1681_vm6, %v1964_v37, %v1966_v60 }
 0x21b   : > { %9503 = vst [vmem:[#allocation63_spill] sm:$0xff] %v7317_v21  ;;  %v9506_v29 = vrot.slane %v7110_v11, 1  ;;  %v7332_v24 = vadd.f32 %v1736_v61, %v9507_v25  ;;  %v7335_v28 = vadd.f32 %v1739_v2, %v9508_v27  ;;  %v7337_v10 = vadd.f32 %v1731_v54, %v1571_v18  ;;  %v9512_v2 = vld [vmem:[#allocation75_spill] sm:$0xff]  ;;  %v9525_v27 = vld [vmem:[#allocation58_spill] sm:$0xff] }
 0x21c   : > { %9504 = vst [vmem:[#allocation86_spill] sm:$0xff] %v7320_v26  ;;  %v9509_v36 = vrot.slane %v7160_v35, 1  ;;  %v9188_v62 = vrot.slane %v7311_v57, 2  ;;  %v2926_v58 = vrot.slane %v2815_v3, 2  ;;  %v7345_v33 = vadd.f32 %v1967_v15, %v1811_v40  ;;  %v9521_v40 = vld [vmem:[#allocation56_spill] sm:$0xff]  ;;  %v9523_v15 = vld [vmem:[#allocation78_spill] sm:$0xff] }
 0x21d   : > { %v1729_v19 = vsel %vm1681_vm6, %v9506_v29, %v1728_v22  ;;  %v1759_v22 = vsel %vm1681_vm6, %v1757_v38, %v1758_v50  ;;  %v7351_v4 = vadd.f32 %v9512_v2, %v2291_v1  ;;  %v1761_v30 = vsel %vm1681_vm6, %v1758_v50, %v1760_v41  ;;  %v9527_v2 = vld [vmem:[#allocation81_spill] sm:$0xff] }
 0x21e   : > { %v7342_v52 = vsel %vm1681_vm6, %v9509_v36, %v2200_v6  ;;  %9511 = vst [vmem:[#allocation21_spill] sm:$0xff] %v7345_v33  ;;  %v1812_v35 = vadd.f32 %v1729_v19, %v7207_v51  ;;  %v9514_v6 = vld [vmem:[#allocation83_spill] sm:$0xff]  ;;  %v7359_v18 = vadd.f32 %v1744_v55, %v9515_v13  ;;  %v7362_v54 = vadd.f32 %v1746_v42, %v7210_v23  ;;  %v9518_v42 = vld [vmem:[#allocation4_spill] sm:$0xff]  ;;  %v9532_v33 = vld [vmem:[#allocation14_spill] sm:$0xff] }
 0x21f   : > { %9510 = vst [vmem:[#allocation89_spill] sm:$0xff] %v7342_v52  ;;  %v7356_v60 = vadd.f32 %v1741_v45, %v9514_v6  ;;  %v7365_v3 = vadd.f32 %v1749_v9, %v7213_v48  ;;  %v7368_v38 = vadd.f32 %v1751_v14, %v7216_v20  ;;  %v7373_v50 = vsel %vm2405_vm15, %v9188_v62, %v2926_v58  ;;  %v9517_v20 = vld [vmem:[#allocation51_spill] sm:$0xff]  ;;  %v9526_v58 = vld [vmem:[#allocation80_spill] sm:$0xff] }
 0x220   : > { %9513 = vst [vmem:[#allocation70_spill] sm:$0xff] %v7351_v4  ;;  %v7376_v45 = vadd.f32 %v1754_v31, %v7218_v32  ;;  %v7379_v51 = vadd.f32 %v1756_v17, %v7220_v59  ;;  %v7382_v23 = vadd.f32 %v1759_v22, %v7224_v53  ;;  %v7385_v48 = vadd.f32 %v1761_v30, %v7226_v44  ;;  %v9519_v14 = vld [vmem:[#allocation55_spill] sm:$0xff]  ;;  %v9522_v17 = vld [vmem:[#allocation30_spill] sm:$0xff]  ;;  %v9528_v13 = vld [vmem:[#allocation12_spill] sm:$0xff] }
 0x221   : > { %9516 = vst [vmem:[#allocation32_spill] sm:$0xff] %v7373_v50  ;;  %v1857_v55 = vmul.f32 %v9517_v20, %v9345_v5  ;;  %v1858_v9 = vmul.f32 %v9345_v5, %v9518_v42  ;;  %v1860_v41 = vmul.f32 %v9345_v5, %v9519_v14  ;;  %v7393_v32 = vld [vmem:[#allocation2 + $0x190] sm:$0x3]  ;;  %v1861_v59 = vmul.f32 %v9345_v5, %v9521_v40 }
 0x222   : > { %9520 = vst [vmem:[#allocation37_spill] sm:$0xff] %v7393_v32  ;;  %v1863_v53 = vmul.f32 %v9345_v5, %v9482_v34  ;;  %v1864_v44 = vmul.f32 %v9345_v5, %v9484_v39  ;;  %v1865_v56 = vmul.f32 %v7234_v46, %v9345_v5  ;;  %v1866_v1 = vmul.f32 %v9345_v5, %v9487_v8  ;;  %v9524_v19 = vld [vmem:[#allocation79_spill] sm:$0xff] }
 0x223   : > { %v1867_v31 = vmul.f32 %v9345_v5, %v6810_v12  ;;  %v1868_v47 = vmul.f32 %v9345_v5, %v9522_v17  ;;  %v1869_v29 = vmul.f32 %v9345_v5, %v9523_v15  ;;  %v1870_v25 = vmul.f32 %v9345_v5, %v9524_v19 }
 0x224   : > { %v1871_v36 = vmul.f32 %v9345_v5, %v9525_v27  ;;  %v1872_v22 = vmul.f32 %v9345_v5, %v9526_v58  ;;  %v1873_v30 = vmul.f32 %v9345_v5, %v9527_v2  ;;  %v1874_v6 = vmul.f32 %v9345_v5, %v7393_v32 }
 0x225   : > { %v9529_v62 = vrot.slane %v9528_v13, 1  ;;  %v1973_v11 = vrot.slane %v1857_v55, 1  ;;  %v1974_v50 = vrot.slane %v1858_v9, 1  ;;  %v1978_v57 = vrot.slane %v1860_v41, 1  ;;  %v9534_v41 = vld [vmem:[#allocation33_spill] sm:$0xff] }
 0x226   : > { %v1979_v4 = vrot.slane %v1861_v59, 1  ;;  %v1983_v26 = vrot.slane %v1863_v53, 1  ;;  %v1984_v21 = vrot.slane %v1864_v44, 1  ;;  %v1986_v7 = vrot.slane %v1865_v56, 1  ;;  %v9536_v56 = vld [vmem:[#allocation39_spill] sm:$0xff] }
 0x227   : > { %v1965_v61 = vsel %vm1681_vm6, %v9529_v62, %v1964_v37  ;;  %v1988_v46 = vrot.slane %v1866_v1, 1  ;;  %v1989_v16 = vrot.slane %v1867_v31, 1  ;;  %v1991_v20 = vrot.slane %v1868_v47, 1  ;;  %v9538_v31 = vld [vmem:[#allocation69_spill] sm:$0xff]  ;;  %v9539_v47 = vld [vmem:[#allocation52_spill] sm:$0xff] }
 0x228   : > { %v9531_v63 = vrot.slane %v9530_v49, 1  ;;  %v9533_v52 = vrot.slane %v9532_v33, 1  ;;  %v1993_v32 = vrot.slane %v1869_v29, 1  ;;  %v1994_v13 = vrot.slane %v1870_v25, 1 }
 0x229   : > { %v1996_v2 = vrot.slane %v1871_v36, 1  ;;  %v1975_v37 = vsel %vm1681_vm6, %v1973_v11, %v1974_v50  ;;  %v1998_v62 = vrot.slane %v1872_v22, 1  ;;  %v1999_v55 = vrot.slane %v1873_v30, 1 }
 0x22a   : > { %v1970_v5 = vsel %vm1681_vm6, %v9533_v52, %v9531_v63  ;;  %v2001_v9 = vrot.slane %v1874_v6, 1  ;;  %v9535_v59 = vrot.slane %v9534_v41, 1  ;;  %v1980_v44 = vsel %vm1681_vm6, %v1978_v57, %v1979_v4 }
 0x22b   : > { %v9537_v49 = vrot.slane %v9536_v56, 1  ;;  %v1985_v63 = vsel %vm1681_vm6, %v1983_v26, %v1984_v21  ;;  %v1987_v52 = vsel %vm1681_vm6, %v1984_v21, %v1986_v7  ;;  %v1990_v1 = vsel %vm1681_vm6, %v1988_v46, %v1989_v16  ;;  %v9540_v46 = vld [vmem:[#allocation27_spill] sm:$0xff] }
 0x22c   : > { %v1977_v53 = vsel %vm1681_vm6, %v1974_v50, %v9535_v59  ;;  %v1992_v11 = vsel %vm1681_vm6, %v1989_v16, %v1991_v20  ;;  %v7443_v29 = vadd.f32 %v9539_v47, %v9538_v31  ;;  %v1995_v50 = vsel %vm1681_vm6, %v1993_v32, %v1994_v13  ;;  %v9546_v59 = vld [vmem:[#allocation97_spill] sm:$0xff]  ;;  %v9547_v56 = vld [vmem:[#allocation19_spill] sm:$0xff] }
 0x22d   : > { %v1982_v33 = vsel %vm1681_vm6, %v1979_v4, %v9537_v49  ;;  %v1997_v57 = vsel %vm1681_vm6, %v1994_v13, %v1996_v2  ;;  %v7448_v25 = vadd.f32 %v1965_v61, %v7305_v0  ;;  %v7450_v4 = vadd.f32 %v1970_v5, %v1812_v35  ;;  %v9543_v13 = vld [vmem:[#allocation81_spill] sm:$0xff] }
 0x22e   : > { %v2000_v26 = vsel %vm1681_vm6, %v1998_v62, %v1999_v55  ;;  %v2002_v7 = vsel %vm1681_vm6, %v1999_v55, %v2001_v9  ;;  %v7456_v16 = vadd.f32 %v9540_v46, %v7337_v10  ;;  %v7459_v21 = vadd.f32 %v1975_v37, %v7325_v43  ;;  %v9544_v62 = vld [vmem:[#allocation37_spill] sm:$0xff] }
 0x22f   : > { %v7462_v20 = vadd.f32 %v1977_v53, %v7332_v24  ;;  %v7465_v32 = vadd.f32 %v1980_v44, %v7335_v28  ;;  %v7468_v0 = vadd.f32 %v1982_v33, %v7356_v60  ;;  %v7471_v61 = vadd.f32 %v1985_v63, %v7359_v18  ;;  %v9545_v9 = vld [vmem:[#allocation13_spill] sm:$0xff]  ;;  %v9549_v33 = vld [vmem:[#allocation15_spill] sm:$0xff] }
 0x230   : > { %v7474_v35 = vadd.f32 %v1987_v52, %v7362_v54  ;;  %v7477_v10 = vadd.f32 %v1990_v1, %v7365_v3  ;;  %v7480_v43 = vadd.f32 %v1992_v11, %v7368_v38  ;;  %v7483_v24 = vadd.f32 %v1995_v50, %v7376_v45  ;;  %v9541_v54 = vld [vmem:[#allocation9_spill] sm:$0xff]  ;;  %v7496_v3 = vld [vmem:[#allocation2 + $0x1a8] sm:$0x3] }
 0x231   : > { %v7486_v28 = vadd.f32 %v1997_v57, %v7379_v51  ;;  %v7489_v60 = vadd.f32 %v2000_v26, %v7382_v23  ;;  %v7492_v18 = vadd.f32 %v2002_v7, %v7385_v48  ;;  %v2096_v36 = vmul.f32 %v9541_v54, %v9518_v42  ;;  %9542 = vst [vmem:[#allocation25_spill] sm:$0xff] %v7496_v3  ;;  %v9551_v1 = vld [vmem:[#allocation31_spill] sm:$0xff] }
 0x232   : > { %v2098_v38 = vmul.f32 %v9541_v54, %v9519_v14  ;;  %v2099_v45 = vmul.f32 %v9541_v54, %v9521_v40  ;;  %v2101_v51 = vmul.f32 %v9541_v54, %v9482_v34  ;;  %v2102_v23 = vmul.f32 %v9541_v54, %v9484_v39 }
 0x233   : > { %v2104_v48 = vmul.f32 %v9541_v54, %v9487_v8  ;;  %v2105_v42 = vmul.f32 %v9541_v54, %v6810_v12  ;;  %v2106_v22 = vmul.f32 %v9541_v54, %v9522_v17  ;;  %v2107_v2 = vmul.f32 %v9541_v54, %v9523_v15 }
 0x234   : > { %v2108_v30 = vmul.f32 %v9541_v54, %v9524_v19  ;;  %v2109_v6 = vmul.f32 %v9541_v54, %v9525_v27  ;;  %v2110_v5 = vmul.f32 %v9541_v54, %v9526_v58  ;;  %v2111_v37 = vmul.f32 %v9541_v54, %v9543_v13 }
 0x235   : > { %v2112_v55 = vmul.f32 %v9541_v54, %v9544_v62  ;;  %v2113_v41 = vmul.f32 %v9541_v54, %v9545_v9  ;;  %v2114_v53 = vmul.f32 %v9546_v59, %v9541_v54  ;;  %v2115_v44 = vmul.f32 %v9541_v54, %v7496_v3 }
 0x236   : > { %v9548_v49 = vrot.slane %v9547_v56, 1  ;;  %v9550_v63 = vrot.slane %v9549_v33, 1  ;;  %v2209_v11 = vrot.slane %v9551_v1, 1  ;;  %v2210_v31 = vrot.slane %v2096_v36, 1  ;;  %v9552_v1 = vld [vmem:[#allocation34_spill] sm:$0xff] }
 0x237   : > { %v2214_v47 = vrot.slane %v2098_v38, 1  ;;  %v2215_v50 = vrot.slane %v2099_v45, 1  ;;  %v2219_v57 = vrot.slane %v2101_v51, 1  ;;  %v2220_v26 = vrot.slane %v2102_v23, 1  ;;  %v9554_v51 = vld [vmem:[#allocation41_spill] sm:$0xff] }
 0x238   : > { %v2206_v52 = vsel %vm1681_vm6, %v9550_v63, %v9548_v49  ;;  %v2224_v7 = vrot.slane %v2104_v48, 1  ;;  %v2225_v46 = vrot.slane %v2105_v42, 1  ;;  %v2227_v9 = vrot.slane %v2106_v22, 1  ;;  %v9556_v22 = vld [vmem:[#allocation43_spill] sm:$0xff] }
 0x239   : > { %v2229_v58 = vrot.slane %v2107_v2, 1  ;;  %v2230_v59 = vrot.slane %v2108_v30, 1  ;;  %v2232_v15 = vrot.slane %v2109_v6, 1  ;;  %v2234_v54 = vrot.slane %v2110_v5, 1 }
 0x23a   : > { %v2235_v3 = vrot.slane %v2111_v37, 1  ;;  %v2237_v56 = vrot.slane %v2112_v55, 1  ;;  %v2211_v33 = vsel %vm1681_vm6, %v2209_v11, %v2210_v31  ;;  %v2239_v13 = vrot.slane %v2113_v41, 1 }
 0x23b   : > { %v2240_v49 = vrot.slane %v2114_v53, 1  ;;  %v2242_v63 = vrot.slane %v2115_v44, 1  ;;  %v9553_v36 = vrot.slane %v9552_v1, 1  ;;  %v2216_v45 = vsel %vm1681_vm6, %v2214_v47, %v2215_v50  ;;  %v9558_v44 = vld [vmem:[#allocation89_spill] sm:$0xff] }
 0x23c   : > { %v9555_v23 = vrot.slane %v9554_v51, 1  ;;  %v2221_v42 = vsel %vm1681_vm6, %v2219_v57, %v2220_v26  ;;  %v9557_v2 = vrot.slane %v9556_v22, 1  ;;  %v2226_v6 = vsel %vm1681_vm6, %v2224_v7, %v2225_v46  ;;  %v9560_v57 = vld [vmem:[#allocation28_spill] sm:$0xff] }
 0x23d   : > { %v2213_v38 = vsel %vm1681_vm6, %v2210_v31, %v9553_v36  ;;  %v2228_v5 = vsel %vm1681_vm6, %v2225_v46, %v2227_v9  ;;  %v2231_v37 = vsel %vm1681_vm6, %v2229_v58, %v2230_v59  ;;  %v2233_v55 = vsel %vm1681_vm6, %v2230_v59, %v2232_v15  ;;  %v9559_v9 = vld [vmem:[#allocation21_spill] sm:$0xff]  ;;  %v9563_v46 = vld [vmem:[#allocation98_spill] sm:$0xff]  ;;  %v7636_v51 = vld [vmem:[#allocation2 + $0x130] sm:$0x3] }
 0x23e   : > { %v2218_v48 = vsel %vm1681_vm6, %v2215_v50, %v9555_v23  ;;  %v2223_v30 = vsel %vm1681_vm6, %v2220_v26, %v9557_v2  ;;  %v2236_v41 = vsel %vm1681_vm6, %v2234_v54, %v2235_v3  ;;  %v2238_v53 = vsel %vm1681_vm6, %v2235_v3, %v2237_v56  ;;  %v9561_v26 = vld [vmem:[#allocation7_spill] sm:$0xff]  ;;  %v4686_v1 = vld [vmem:[#allocation2 + $0x118] sm:$0x3]  ;;  %9565 = vst [vmem:[#allocation26_spill] sm:$0xff] %v7636_v51 }
 0x23f   : > { %v7556_v11 = vadd.f32 %v9558_v44, %v7443_v29  ;;  %v2241_v31 = vsel %vm1681_vm6, %v2239_v13, %v2240_v49  ;;  %v2243_v47 = vsel %vm1681_vm6, %v2240_v49, %v2242_v63  ;;  %v7561_v50 = vadd.f32 %v2206_v52, %v7448_v25  ;;  %v7611_v54 = vld [vmem:[#allocation2 + $0xf0] sm:$0xff] }
 0x240   : > { %v7565_v58 = vadd.f32 %v9560_v57, %v9559_v9  ;;  %v7568_v15 = vadd.f32 %v2211_v33, %v7450_v4  ;;  %v7571_v3 = vadd.f32 %v2213_v38, %v7456_v16  ;;  %v7574_v29 = vadd.f32 %v2216_v45, %v7459_v21  ;;  %v9564_v56 = vld [vmem:[#allocation51_spill] sm:$0xff]  ;;  %v9570_v44 = vld [vmem:[#allocation68_spill] sm:$0xff]  ;;  %v9574_v57 = vld [vmem:[#allocation85_spill] sm:$0xff] }
 0x241   : > { %v7577_v13 = vadd.f32 %v2218_v48, %v7462_v20  ;;  %v7580_v59 = vadd.f32 %v2221_v42, %v7465_v32  ;;  %v7583_v25 = vadd.f32 %v2223_v30, %v7468_v0  ;;  %v7586_v52 = vadd.f32 %v2226_v6, %v7471_v61  ;;  %v7627_v49 = vld [vmem:[#allocation2 + $0x110] sm:$0xff]  ;;  %v9566_v42 = vld [vmem:[#allocation10_spill] sm:$0xff]  ;;  %v9567_v30 = vld [vmem:[#allocation57_spill] sm:$0xff] }
 0x242   : > { %v7589_v4 = vadd.f32 %v2228_v5, %v7474_v35  ;;  %v7592_v16 = vadd.f32 %v2231_v37, %v7477_v10  ;;  %v7595_v21 = vadd.f32 %v2233_v55, %v7480_v43  ;;  %v7598_v20 = vadd.f32 %v2236_v41, %v7483_v24  ;;  %v9562_v35 = vld [vmem:[#allocation6_spill] sm:$0xff]  ;;  %v7615_v24 = vld [vmem:[#allocation2 + $0xf8] sm:$0xff] }
 0x243   : > { %v7601_v32 = vadd.f32 %v2238_v53, %v7486_v28  ;;  %v7604_v0 = vadd.f32 %v2241_v31, %v7489_v60  ;;  %v2307_v61 = vadd.f32 %v2243_v47, %v7492_v18  ;;  %v2336_v7 = vmul.f32 %v9562_v35, %v9561_v26  ;;  %v9568_v55 = vld [vmem:[#allocation81_spill] sm:$0xff] }
 0x244   : > { %v2337_v10 = vmul.f32 %v9562_v35, %v9563_v46  ;;  %v2339_v43 = vmul.f32 %v7611_v54, %v9562_v35  ;;  %v2340_v28 = vmul.f32 %v7615_v24, %v9562_v35  ;;  %v7621_v60 = vmul.f32 %v9562_v35, %v9524_v19  ;;  %v9572_v47 = vld [vmem:[#allocation53_spill] sm:$0xff] }
 0x245   : > { %v2356_v18 = vmul.f32 %v9562_v35, %v9525_v27  ;;  %v2342_v33 = vmul.f32 %v9564_v56, %v9562_v35  ;;  %v2343_v63 = vmul.f32 %v7627_v49, %v9562_v35  ;;  %v2344_v36 = vmul.f32 %v4686_v1, %v9562_v35  ;;  %v9576_v56 = vld [vmem:[#allocation71_spill] sm:$0xff] }
 0x246   : > { %v2345_v38 = vmul.f32 %v9562_v35, %v9519_v14  ;;  %v2346_v45 = vmul.f32 %v9562_v35, %v9521_v40  ;;  %v2347_v23 = vmul.f32 %v7636_v51, %v9562_v35  ;;  %v2348_v48 = vmul.f32 %v9562_v35, %v9482_v34 }
 0x247   : > { %v2598_v22 = vmul.f32 %v9566_v42, %v9544_v62  ;;  %v2349_v2 = vmul.f32 %v9562_v35, %v9484_v39  ;;  %v2350_v14 = vmul.f32 %v9567_v30, %v9562_v35  ;;  %v2351_v40 = vmul.f32 %v9562_v35, %v9487_v8  ;;  %v9569_v39 = vld [vmem:[#allocation78_spill] sm:$0xff] }
 0x248   : > { %v2352_v6 = vmul.f32 %v9562_v35, %v6810_v12  ;;  %v2353_v5 = vmul.f32 %v9562_v35, %v9522_v17  ;;  %v2482_v34 = vrot.slane %v7621_v60, 2  ;;  %v2484_v37 = vrot.slane %v2356_v18, 2 }
 0x249   : > { %v7657_v41 = vmul.f32 %v9566_v42, %v9568_v55  ;;  %v2354_v53 = vmul.f32 %v9562_v35, %v9569_v39  ;;  %v9571_v31 = vrot.slane %v9570_v44, 2  ;;  %v9573_v8 = vrot.slane %v9572_v47, 2 }
 0x24a   : > { %v9575_v26 = vrot.slane %v9574_v57, 2  ;;  %v9577_v1 = vrot.slane %v9576_v56, 2  ;;  %v2452_v18 = vrot.slane %v2337_v10, 2  ;;  %v2451_v62 = vrot.slane %v2336_v7, 2  ;;  %v9581_v56 = vld [vmem:[#allocation25_spill] sm:$0xff]  ;;  %v9582_v10 = vld [vmem:[#allocation63_spill] sm:$0xff] }
 0x24b   : > { %v2443_v9 = vsel %vm2405_vm15, %v9573_v8, %v9571_v31  ;;  %v2456_v27 = vrot.slane %v2339_v43, 2  ;;  %v2457_v55 = vrot.slane %v2340_v28, 2  ;;  %v2725_v19 = vrot.slane %v2598_v22, 2  ;;  %v9578_v31 = vld [vmem:[#allocation73_spill] sm:$0xff] }
 0x24c   : > { %v2448_v60 = vsel %vm2405_vm15, %v9577_v1, %v9575_v26  ;;  %v2461_v17 = vrot.slane %v2342_v33, 2  ;;  %v2462_v12 = vrot.slane %v2343_v63, 2  ;;  %v2464_v35 = vrot.slane %v2344_v36, 2  ;;  %v9579_v8 = vld [vmem:[#allocation97_spill] sm:$0xff] }
 0x24d   : > { %v2466_v39 = vrot.slane %v2345_v38, 2  ;;  %v2485_v44 = vsel %vm2405_vm15, %v2482_v34, %v2484_v37  ;;  %v9212_v47 = vrot.slane %v7657_v41, 2  ;;  %v7675_v57 = vmul.f32 %v9579_v8, %v9578_v31 }
 0x24e   : > { %v2839_v26 = vmul.f32 %v9578_v31, %v9581_v56  ;;  %v2453_v7 = vsel %vm2405_vm15, %v2451_v62, %v2452_v18  ;;  %v9583_v43 = vrot.slane %v9582_v10, 2  ;;  %v2467_v33 = vrot.slane %v2346_v45, 2 }
 0x24f   : > { %9580 = vst [vmem:[#allocation8_spill] sm:$0xff] %v7675_v57  ;;  %v2549_v63 = vadd.f32 %v2485_v44, %v2307_v61  ;;  %v2469_v36 = vrot.slane %v2347_v23, 2  ;;  %v2471_v38 = vrot.slane %v2348_v48, 2  ;;  %v2472_v22 = vrot.slane %v2349_v2, 2 }
 0x250   : > { %v2455_v28 = vsel %vm2405_vm15, %v2452_v18, %v9583_v43  ;;  %v2726_v37 = vsel %vm2405_vm15, %v9212_v47, %v2725_v19  ;;  %v2474_v1 = vrot.slane %v2350_v14, 2  ;;  %v2476_v8 = vrot.slane %v2351_v40, 2  ;;  %v9584_v18 = vld [vmem:[#allocation22_spill] sm:$0xff] }
 0x251   : > { %v2477_v30 = vrot.slane %v2352_v6, 2  ;;  %v2479_v51 = vrot.slane %v2353_v5, 2  ;;  %v2458_v31 = vsel %vm2405_vm15, %v2456_v27, %v2457_v55  ;;  %v2481_v62 = vrot.slane %v2354_v53, 2  ;;  %v9587_v53 = vld [vmem:[#allocation46_spill] sm:$0xff] }
 0x252   : > { %v9211_v56 = vrot.slane %v7675_v57, 2  ;;  %v2966_v10 = vrot.slane %v2839_v26, 2  ;;  %v9585_v45 = vrot.slane %v9584_v18, 2  ;;  %v2463_v23 = vsel %vm2405_vm15, %v2461_v17, %v2462_v12  ;;  %v9586_v17 = vld [vmem:[#allocation91_spill] sm:$0xff]  ;;  %v9588_v26 = vld [vmem:[#allocation92_spill] sm:$0xff] }
 0x253   : > { %v2465_v48 = vsel %vm2405_vm15, %v2462_v12, %v2464_v35  ;;  %v2790_v2 = vadd.f32 %v2726_v37, %v2549_v63  ;;  %v2468_v19 = vsel %vm2405_vm15, %v2466_v39, %v2467_v33  ;;  %v2470_v14 = vsel %vm2405_vm15, %v2467_v33, %v2469_v36  ;;  %v7780_v36 = vld [vmem:[#allocation2 + $0x138] sm:$0xff] }
 0x254   : > { %v2460_v61 = vsel %vm2405_vm15, %v2457_v55, %v9585_v45  ;;  %v2473_v40 = vsel %vm2405_vm15, %v2471_v38, %v2472_v22  ;;  %v2967_v27 = vsel %vm2405_vm15, %v9211_v56, %v2966_v10  ;;  %v2475_v6 = vsel %vm2405_vm15, %v2472_v22, %v2474_v1  ;;  %v7784_v22 = vld [vmem:[#allocation2 + $0x140] sm:$0xff]  ;;  %v9595_v10 = vld [vmem:[#allocation64_spill] sm:$0xff] }
 0x255   : > { %v2478_v5 = vsel %vm2405_vm15, %v2476_v8, %v2477_v30  ;;  %v2480_v55 = vsel %vm2405_vm15, %v2477_v30, %v2479_v51  ;;  %v7704_v12 = vadd.f32 %v9587_v53, %v9586_v17  ;;  %v2483_v39 = vsel %vm2405_vm15, %v2481_v62, %v2482_v34  ;;  %9592 = vst [vmem:[#allocation11_spill] sm:$0xff] %v7784_v22  ;;  %v9593_v1 = vld [vmem:[#allocation57_spill] sm:$0xff]  ;;  %v9596_v45 = vld [vmem:[#allocation30_spill] sm:$0xff]  ;;  %v9603_v17 = vld [vmem:[#allocation72_spill] sm:$0xff] }
 0x256   : > { %v7708_v35 = vadd.f32 %v2443_v9, %v7556_v11  ;;  %v7711_v44 = vadd.f32 %v2448_v60, %v7561_v50  ;;  %v7715_v43 = vadd.f32 %v9588_v26, %v7565_v58  ;;  %v7718_v33 = vadd.f32 %v2453_v7, %v7568_v15  ;;  %v7770_v60 = vld [vmem:[#allocation2 + $0x120] sm:$0xff]  ;;  %v9605_v26 = vld [vmem:[#allocation95_spill] sm:$0xff] }
 0x257   : > { %v7721_v51 = vadd.f32 %v2455_v28, %v7571_v3  ;;  %v7724_v30 = vadd.f32 %v2458_v31, %v7574_v29  ;;  %v7726_v34 = vadd.f32 %v2967_v27, %v2790_v2  ;;  %v7729_v11 = vadd.f32 %v2460_v61, %v7577_v13  ;;  %v9591_v28 = vld [vmem:[#allocation26_spill] sm:$0xff]  ;;  %v7790_v31 = vld [vmem:[#allocation2 + $0x150] sm:$0xff] }
 0x258   : > { %v7732_v50 = vadd.f32 %v2463_v23, %v7580_v59  ;;  %v7735_v58 = vadd.f32 %v2465_v48, %v7583_v25  ;;  %v7738_v15 = vadd.f32 %v2468_v19, %v7586_v52  ;;  %v7741_v3 = vadd.f32 %v2470_v14, %v7589_v4  ;;  %9594 = vst [vmem:[#allocation75_spill] sm:$0xff] %v7790_v31  ;;  %v9597_v23 = vld [vmem:[#allocation78_spill] sm:$0xff]  ;;  %v9598_v2 = vld [vmem:[#allocation79_spill] sm:$0xff]  ;;  %v9600_v27 = vld [vmem:[#allocation80_spill] sm:$0xff] }
 0x259   : > { %9589 = vst [vmem:[#allocation60_spill] sm:$0xff] %v7726_v34  ;;  %v7744_v29 = vadd.f32 %v2473_v40, %v7592_v16  ;;  %v7747_v9 = vadd.f32 %v2475_v6, %v7595_v21  ;;  %v7750_v13 = vadd.f32 %v2478_v5, %v7598_v20  ;;  %v7753_v59 = vadd.f32 %v2480_v55, %v7601_v32  ;;  %v7764_v21 = vld [vmem:[#allocation2 + $0x108] sm:$0xff] }
 0x25a   : > { %v7756_v25 = vadd.f32 %v2483_v39, %v7604_v0  ;;  %v2576_v52 = vmul.f32 %v9566_v42, %v9563_v46  ;;  %v2578_v4 = vmul.f32 %v7611_v54, %v9566_v42  ;;  %v2579_v16 = vmul.f32 %v7615_v24, %v9566_v42  ;;  %v7774_v46 = vld [vmem:[#allocation2 + $0x128] sm:$0xff] }
 0x25b   : > { %v2581_v20 = vmul.f32 %v7764_v21, %v9566_v42  ;;  %v2582_v32 = vmul.f32 %v7627_v49, %v9566_v42  ;;  %v2584_v0 = vmul.f32 %v7770_v60, %v9566_v42  ;;  %v2585_v7 = vmul.f32 %v7774_v46, %v9566_v42  ;;  %v9599_v14 = vld [vmem:[#allocation58_spill] sm:$0xff]  ;;  %v9601_v5 = vld [vmem:[#allocation87_spill] sm:$0xff] }
 0x25c   : > { %9590 = vst [vmem:[#allocation66_spill] sm:$0xff] %v7756_v25  ;;  %v2586_v63 = vmul.f32 %v9591_v28, %v9566_v42  ;;  %v2587_v38 = vmul.f32 %v7780_v36, %v9566_v42  ;;  %v2588_v37 = vmul.f32 %v7784_v22, %v9566_v42  ;;  %v2589_v8 = vmul.f32 %v9593_v1, %v9566_v42 }
 0x25d   : > { %v2590_v62 = vmul.f32 %v7790_v31, %v9566_v42  ;;  %v2591_v18 = vmul.f32 %v9566_v42, %v9595_v10  ;;  %v2592_v61 = vmul.f32 %v9566_v42, %v9596_v45  ;;  %v2593_v48 = vmul.f32 %v9566_v42, %v9597_v23 }
 0x25e   : > { %v2594_v19 = vmul.f32 %v9566_v42, %v9598_v2  ;;  %v2595_v40 = vmul.f32 %v9566_v42, %v9599_v14  ;;  %v2596_v6 = vmul.f32 %v9566_v42, %v9600_v27  ;;  %v9602_v55 = vrot.slane %v9601_v5, 2 }
 0x25f   : > { %v9604_v53 = vrot.slane %v9603_v17, 2  ;;  %v2687_v10 = vrot.slane %v9605_v26, 2  ;;  %v2688_v56 = vrot.slane %v2576_v52, 2  ;;  %v2692_v47 = vrot.slane %v2578_v4, 2  ;;  %v9606_v26 = vld [vmem:[#allocation86_spill] sm:$0xff] }
 0x260   : > { %v2693_v34 = vrot.slane %v2579_v16, 2  ;;  %v2697_v57 = vrot.slane %v2581_v20, 2  ;;  %v2698_v25 = vrot.slane %v2582_v32, 2  ;;  %v2702_v2 = vrot.slane %v2584_v0, 2  ;;  %v9608_v20 = vld [vmem:[#allocation23_spill] sm:$0xff] }
 0x261   : > { %v2684_v39 = vsel %vm2405_vm15, %v9604_v53, %v9602_v55  ;;  %v2703_v23 = vrot.slane %v2585_v7, 2  ;;  %v2705_v45 = vrot.slane %v2586_v63, 2  ;;  %v2707_v14 = vrot.slane %v2587_v38, 2  ;;  %v9610_v38 = vld [vmem:[#allocation35_spill] sm:$0xff] }
 0x262   : > { %v2708_v31 = vrot.slane %v2588_v37, 2  ;;  %v2710_v1 = vrot.slane %v2589_v8, 2  ;;  %v2712_v42 = vrot.slane %v2590_v62, 2  ;;  %v2713_v27 = vrot.slane %v2591_v18, 2 }
 0x263   : > { %v2715_v5 = vrot.slane %v2592_v61, 2  ;;  %v2689_v17 = vsel %vm2405_vm15, %v2687_v10, %v2688_v56  ;;  %v2717_v22 = vrot.slane %v2593_v48, 2  ;;  %v2718_v55 = vrot.slane %v2594_v19, 2  ;;  %v9612_v19 = vld [vmem:[#allocation76_spill] sm:$0xff] }
 0x264   : > { %v2720_v53 = vrot.slane %v2595_v40, 2  ;;  %v9607_v52 = vrot.slane %v9606_v26, 2  ;;  %v2694_v16 = vsel %vm2405_vm15, %v2692_v47, %v2693_v34  ;;  %v9609_v32 = vrot.slane %v9608_v20, 2  ;;  %v4695_v26 = vld [vmem:[#allocation2 + $0x158] sm:$0xff]  ;;  %v9622_v20 = vld [vmem:[#allocation58_spill] sm:$0xff] }
 0x265   : > { %v2722_v7 = vrot.slane %v2596_v6, 2  ;;  %v2699_v63 = vsel %vm2405_vm15, %v2697_v57, %v2698_v25  ;;  %v9611_v37 = vrot.slane %v9610_v38, 2  ;;  %v2704_v62 = vsel %vm2405_vm15, %v2702_v2, %v2703_v23  ;;  %v9624_v38 = vld [vmem:[#allocation81_spill] sm:$0xff] }
 0x266   : > { %v2691_v4 = vsel %vm2405_vm15, %v2688_v56, %v9607_v52  ;;  %v2696_v0 = vsel %vm2405_vm15, %v2693_v34, %v9609_v32  ;;  %v2706_v18 = vsel %vm2405_vm15, %v2703_v23, %v2705_v45  ;;  %v2709_v61 = vsel %vm2405_vm15, %v2707_v14, %v2708_v31  ;;  %v9614_v23 = vld [vmem:[#allocation70_spill] sm:$0xff] }
 0x267   : > { %v2701_v8 = vsel %vm2405_vm15, %v2698_v25, %v9611_v37  ;;  %v2711_v56 = vsel %vm2405_vm15, %v2708_v31, %v2710_v1  ;;  %v2714_v47 = vsel %vm2405_vm15, %v2712_v42, %v2713_v27  ;;  %v2716_v48 = vsel %vm2405_vm15, %v2713_v27, %v2715_v5  ;;  %v9615_v1 = vld [vmem:[#allocation93_spill] sm:$0xff]  ;;  %v9616_v42 = vld [vmem:[#allocation11_spill] sm:$0xff]  ;;  %v9619_v52 = vld [vmem:[#allocation30_spill] sm:$0xff] }
 0x268   : > { %v2719_v34 = vsel %vm2405_vm15, %v2717_v22, %v2718_v55  ;;  %v2721_v57 = vsel %vm2405_vm15, %v2718_v55, %v2720_v53  ;;  %v2771_v40 = vadd.f32 %v9612_v19, %v7704_v12  ;;  %v2773_v25 = vadd.f32 %v2684_v39, %v7708_v35  ;;  %v9618_v53 = vld [vmem:[#allocation75_spill] sm:$0xff]  ;;  %v9627_v19 = vld [vmem:[#allocation88_spill] sm:$0xff] }
 0x269   : > { %v9613_v2 = vrot.slane %v7657_v41, 2  ;;  %v7842_v31 = vadd.f32 %v9615_v1, %v9614_v23  ;;  %v7845_v14 = vadd.f32 %v2689_v17, %v7711_v44  ;;  %v7848_v22 = vadd.f32 %v2691_v4, %v7715_v43  ;;  %v9617_v17 = vld [vmem:[#allocation57_spill] sm:$0xff]  ;;  %v9620_v4 = vld [vmem:[#allocation78_spill] sm:$0xff] }
 0x26a   : > { %v7851_v27 = vadd.f32 %v2694_v16, %v7718_v33  ;;  %v7854_v12 = vadd.f32 %v2696_v0, %v7721_v51  ;;  %v7857_v41 = vadd.f32 %v2699_v63, %v7724_v30  ;;  %v7860_v35 = vadd.f32 %v2701_v8, %v7729_v11  ;;  %v9621_v16 = vld [vmem:[#allocation79_spill] sm:$0xff]  ;;  %v9629_v23 = vld [vmem:[#allocation74_spill] sm:$0xff] }
 0x26b   : > { %v7838_v45 = vsel %vm2405_vm15, %v2722_v7, %v9613_v2  ;;  %v7863_v6 = vadd.f32 %v2704_v62, %v7732_v50  ;;  %v7866_v44 = vadd.f32 %v2706_v18, %v7735_v58  ;;  %v7869_v43 = vadd.f32 %v2709_v61, %v7738_v15  ;;  %v4694_v58 = vld [vmem:[%s9066_s3 + $0x8] ss:$0 sm:$0xff]  ;;  %v9623_v7 = vld [vmem:[#allocation80_spill] sm:$0xff]  ;;  %v9625_v18 = vld [vmem:[#allocation37_spill] sm:$0xff] }
 0x26c   : > { %v7872_v33 = vadd.f32 %v2711_v56, %v7741_v3  ;;  %v7875_v51 = vadd.f32 %v2714_v47, %v7744_v29  ;;  %v7878_v30 = vadd.f32 %v2716_v48, %v7747_v9  ;;  %v7881_v11 = vadd.f32 %v2719_v34, %v7750_v13  ;;  %v9626_v34 = vld [vmem:[#allocation13_spill] sm:$0xff] }
 0x26d   : > { %v7884_v50 = vadd.f32 %v2721_v57, %v7753_v59  ;;  %v2816_v15 = vmul.f32 %v4694_v58, %v7611_v54  ;;  %v2817_v3 = vmul.f32 %v4694_v58, %v7615_v24  ;;  %v2819_v29 = vmul.f32 %v4694_v58, %v7764_v21 }
 0x26e   : > { %v2820_v39 = vmul.f32 %v4694_v58, %v7627_v49  ;;  %v2822_v9 = vmul.f32 %v4694_v58, %v7770_v60  ;;  %v2823_v13 = vmul.f32 %v4694_v58, %v7774_v46  ;;  %v2824_v10 = vmul.f32 %v4694_v58, %v9591_v28 }
 0x26f   : > { %v2825_v59 = vmul.f32 %v4694_v58, %v7780_v36  ;;  %v2826_v5 = vmul.f32 %v4694_v58, %v9616_v42  ;;  %v2827_v55 = vmul.f32 %v4694_v58, %v9617_v17  ;;  %v2828_v54 = vmul.f32 %v4694_v58, %v9618_v53 }
 0x270   : > { %v2829_v24 = vmul.f32 %v4695_v26, %v4694_v58  ;;  %v2830_v21 = vmul.f32 %v4694_v58, %v9619_v52  ;;  %v2831_v49 = vmul.f32 %v4694_v58, %v9620_v4  ;;  %v2832_v60 = vmul.f32 %v4694_v58, %v9621_v16  ;;  %v9637_v26 = vld [vmem:[#allocation36_spill] sm:$0xff] }
 0x271   : > { %v2833_v46 = vmul.f32 %v4694_v58, %v9622_v20  ;;  %v2928_v32 = vrot.slane %v2816_v15, 2  ;;  %v2929_v28 = vrot.slane %v2817_v3, 2  ;;  %v2933_v0 = vrot.slane %v2819_v29, 2  ;;  %v9631_v3 = vld [vmem:[#allocation16_spill] sm:$0xff] }
 0x272   : > { %v2934_v36 = vrot.slane %v2820_v39, 2  ;;  %v7905_v63 = vmul.f32 %v4694_v58, %v9623_v7  ;;  %v7908_v37 = vmul.f32 %v4694_v58, %v9624_v38  ;;  %v2938_v8 = vrot.slane %v2822_v9, 2  ;;  %v9633_v39 = vld [vmem:[#allocation96_spill] sm:$0xff] }
 0x273   : > { %v2939_v62 = vrot.slane %v2823_v13, 2  ;;  %v7911_v61 = vmul.f32 %v4694_v58, %v9625_v18  ;;  %v2941_v56 = vrot.slane %v2824_v10, 2  ;;  %v2943_v47 = vrot.slane %v2825_v59, 2  ;;  %v9635_v59 = vld [vmem:[#allocation24_spill] sm:$0xff] }
 0x274   : > { %v2944_v48 = vrot.slane %v2826_v5, 2  ;;  %v7914_v57 = vmul.f32 %v4694_v58, %v9626_v34  ;;  %v9628_v2 = vrot.slane %v9627_v19, 2  ;;  %v9630_v1 = vrot.slane %v9629_v23, 2 }
 0x275   : > { %v9632_v29 = vrot.slane %v9631_v3, 2  ;;  %v9634_v9 = vrot.slane %v9633_v39, 2  ;;  %v2946_v42 = vrot.slane %v2827_v55, 2  ;;  %v2930_v10 = vsel %vm2405_vm15, %v2928_v32, %v2929_v28 }
 0x276   : > { %v2920_v15 = vsel %vm2405_vm15, %v9630_v1, %v9628_v2  ;;  %v9636_v5 = vrot.slane %v9635_v59, 2  ;;  %v2935_v17 = vsel %vm2405_vm15, %v2933_v0, %v2934_v36  ;;  %v9638_v52 = vrot.slane %v9637_v26, 2  ;;  %v9639_v0 = vld [vmem:[#allocation32_spill] sm:$0xff] }
 0x277   : > { %v2925_v13 = vsel %vm2405_vm15, %v9634_v9, %v9632_v29  ;;  %v3012_v53 = vadd.f32 %v2920_v15, %v2771_v40  ;;  %v2940_v16 = vsel %vm2405_vm15, %v2938_v8, %v2939_v62  ;;  %v2948_v20 = vrot.slane %v2828_v54, 2  ;;  %v9640_v8 = vld [vmem:[#allocation77_spill] sm:$0xff] }
 0x278   : > { %v2932_v58 = vsel %vm2405_vm15, %v2929_v28, %v9636_v5  ;;  %v2937_v4 = vsel %vm2405_vm15, %v2934_v36, %v9638_v52  ;;  %v2949_v7 = vrot.slane %v2829_v24, 2  ;;  %v2942_v38 = vsel %vm2405_vm15, %v2939_v62, %v2941_v56  ;;  %v7943_v36 = vld [vmem:[%s9067_s4] ss:$0 sm:$0xff] }
 0x279   : > { %v2945_v55 = vsel %vm2405_vm15, %v2943_v47, %v2944_v48  ;;  %v2951_v32 = vrot.slane %v2830_v21, 2  ;;  %v3014_v18 = vadd.f32 %v2925_v13, %v2773_v25  ;;  %v2947_v34 = vsel %vm2405_vm15, %v2944_v48, %v2946_v42  ;;  %v9641_v47 = vld [vmem:[#allocation94_spill] sm:$0xff] }
 0x27a   : > { %v2953_v28 = vrot.slane %v2831_v49, 2  ;;  %v3015_v40 = vadd.f32 %v9639_v0, %v7842_v31  ;;  %v7947_v54 = vadd.f32 %v7943_v36, %v9640_v8  ;;  %v2954_v24 = vrot.slane %v2832_v60, 2 }
 0x27b   : > { %v2956_v62 = vrot.slane %v2833_v46, 2  ;;  %v3016_v21 = vadd.f32 %v2930_v10, %v7845_v14  ;;  %v7951_v25 = vadd.f32 %v7943_v36, %v3012_v53  ;;  %v2950_v49 = vsel %vm2405_vm15, %v2948_v20, %v2949_v7 }
 0x27c   : > { %v2958_v31 = vrot.slane %v7905_v63, 2  ;;  %v3017_v56 = vadd.f32 %v2932_v58, %v7848_v22  ;;  %v7958_v48 = vadd.f32 %v7943_v36, %v9641_v47  ;;  %v2952_v19 = vsel %vm2405_vm15, %v2949_v7, %v2951_v32 }
 0x27d   : > { %v2959_v60 = vrot.slane %v7908_v37, 2  ;;  %v3018_v46 = vadd.f32 %v2935_v17, %v7851_v27  ;;  %v7964_v14 = vadd.f32 %v7943_v36, %v3014_v18  ;;  %v2961_v2 = vrot.slane %v7911_v61, 2 }
 0x27e   : > { %v3019_v23 = vadd.f32 %v2937_v4, %v7854_v12  ;;  %v7969_v63 = vadd.f32 %v7943_v36, %v3015_v40  ;;  %v4299_v22 = vmul.f32 -1.442695, %v7947_v54  ;;  %v2955_v1 = vsel %vm2405_vm15, %v2953_v28, %v2954_v24 }
 0x27f   : > { %v3020_v15 = vadd.f32 %v2940_v16, %v7857_v41  ;;  %v7975_v37 = vadd.f32 %v7943_v36, %v3016_v21  ;;  %v4301_v27 = vmul.f32 -1.442695, %v7951_v25  ;;  %v2957_v3 = vsel %vm2405_vm15, %v2954_v24, %v2956_v62 }
 0x280   : > { %v3021_v61 = vadd.f32 %v2942_v38, %v7860_v35  ;;  %v7981_v12 = vadd.f32 %v7943_v36, %v3017_v56  ;;  %v4302_v29 = vmul.f32 -1.442695, %v7958_v48  ;;  %v2963_v39 = vrot.slane %v7914_v57, 2  ;;  %v9652_v38 = vld [vmem:[#allocation54_spill] sm:$0xff] }
 0x281   : > { %9642 = vst [vmem:[#allocation83_spill] sm:$0xff] %v7975_v37  ;;  %v3022_v9 = vadd.f32 %v2945_v55, %v7863_v6  ;;  %v7987_v41 = vadd.f32 %v7943_v36, %v3018_v46  ;;  %v4303_v13 = vmul.f32 -1.442695, %v7964_v14  ;;  %v3023_v42 = vadd.f32 %v2947_v34, %v7866_v44  ;;  %v9653_v55 = vld [vmem:[#allocation62_spill] sm:$0xff] }
 0x282   : > { %9643 = vst [vmem:[#allocation84_spill] sm:$0xff] %v7981_v12  ;;  %v7992_v10 = vadd.f32 %v7943_v36, %v3019_v23  ;;  %4580 = vpow2.f32 %v4299_v22  ;;  %v4304_v35 = vmul.f32 -1.442695, %v7969_v63  ;;  %v3024_v59 = vadd.f32 %v2950_v49, %v7869_v43  ;;  %v9654_v34 = vld [vmem:[#allocation66_spill] sm:$0xff] }
 0x283   : > { %9644 = vst [vmem:[#allocation4_spill] sm:$0xff] %v7987_v41  ;;  %v7997_v5 = vadd.f32 %v7943_v36, %v3020_v15  ;;  %4582 = vpow2.f32 %v4301_v27  ;;  %v4305_v6 = vmul.f32 -1.442695, %v7975_v37  ;;  %v3025_v57 = vadd.f32 %v2952_v19, %v7872_v33  ;;  %v9659_v23 = vld [vmem:[#allocation82_spill] sm:$0xff]  ;;  %v9661_v27 = vld [vmem:[#allocation5_spill] sm:$0xff] }
 0x284   : > { %9645 = vst [vmem:[#allocation55_spill] sm:$0xff] %v7992_v10  ;;  %v8002_v58 = vadd.f32 %v7943_v36, %v3021_v61  ;;  %4584 = vpow2.f32 %v4302_v29  ;;  %v4306_v44 = vmul.f32 -1.442695, %v7981_v12  ;;  %v3026_v17 = vadd.f32 %v2955_v1, %v7875_v51  ;;  %v9660_v22 = vld [vmem:[#allocation90_spill] sm:$0xff] }
 0x285   : > { %9646 = vst [vmem:[#allocation56_spill] sm:$0xff] %v7997_v5  ;;  %v8007_v53 = vadd.f32 %v7943_v36, %v3022_v9  ;;  %4586 = vpow2.f32 %v4303_v13  ;;  %v4307_v43 = vmul.f32 -1.442695, %v7987_v41  ;;  %v3027_v26 = vadd.f32 %v2957_v3, %v7878_v30  ;;  %v9662_v3 = vld [vmem:[#allocation47_spill] sm:$0xff]  ;;  %v9663_v29 = vld [vmem:[#allocation50_spill] sm:$0xff] }
 0x286   : > { %9647 = vst [vmem:[#allocation12_spill] sm:$0xff] %v8002_v58  ;;  %v8012_v52 = vadd.f32 %v7943_v36, %v3023_v42  ;;  %4588 = vpow2.f32 %v4304_v35  ;;  %v4308_v33 = vmul.f32 -1.442695, %v7992_v10  ;;  %v2960_v4 = vsel %vm2405_vm15, %v2958_v31, %v2959_v60  ;;  %v9657_v31 = vld [vmem:[#allocation8_spill] sm:$0xff]  ;;  %v9666_v42 = vld [vmem:[#allocation42_spill] sm:$0xff]  ;;  %v9667_v35 = vld [vmem:[#allocation61_spill] sm:$0xff] }
 0x287   : > { %9648 = vst [vmem:[#allocation17_spill] sm:$0xff] %v8007_v53  ;;  %v8017_v16 = vadd.f32 %v7943_v36, %v3024_v59  ;;  %4590 = vpow2.f32 %v4305_v6  ;;  %v4309_v51 = vmul.f32 -1.442695, %v7997_v5  ;;  %v8021_v7 = vadd.f32 %v7943_v36, %v3025_v57  ;;  %v9669_v6 = vld [vmem:[#allocation59_spill] sm:$0xff] }
 0x288   : > { %9649 = vst [vmem:[#allocation14_spill] sm:$0xff] %v8012_v52  ;;  %v4581_v20 = vpop.eup %4580  ;;  %4592 = vpow2.f32 %v4306_v44  ;;  %v4310_v30 = vmul.f32 -1.442695, %v8002_v58  ;;  %v3317_v32 = vmul.f32 %v9653_v55, %v9652_v38  ;;  %v2789_v28 = vadd.f32 %v7838_v45, %v9654_v34 }
 0x289   : > { %9650 = vst [vmem:[#allocation33_spill] sm:$0xff] %v8017_v16  ;;  %v4583_v18 = vpop.eup %4582  ;;  %v8029_v0 = vadd.f32 %v7943_v36, %v3026_v17  ;;  %4594 = vpow2.f32 %v4307_v43  ;;  %v4311_v40 = vmul.f32 -1.442695, %v8007_v53  ;;  %v2962_v24 = vsel %vm2405_vm15, %v2959_v60, %v2961_v2 }
 0x28a   : > { %9651 = vst [vmem:[#allocation39_spill] sm:$0xff] %v8021_v7  ;;  %v4585_v8 = vpop.eup %4584  ;;  %v8034_v62 = vadd.f32 %v7943_v36, %v3027_v26  ;;  %4596 = vpow2.f32 %v4308_v33  ;;  %v4312_v21 = vmul.f32 -1.442695, %v8012_v52  ;;  %v9658_v56 = vrot.slane %v9657_v31, 2  ;;  %v9672_v31 = vld [vmem:[#allocation48_spill] sm:$0xff] }
 0x28b   : > { %9655 = vst [vmem:[#allocation69_spill] sm:$0xff] %v8029_v0  ;;  %v4587_v49 = vpop.eup %4586  ;;  %v3028_v47 = vadd.f32 %v2960_v4, %v7881_v11  ;;  %4598 = vpow2.f32 %v4309_v51  ;;  %v4313_v19 = vmul.f32 -1.442695, %v8017_v16  ;;  %v4314_v60 = vmul.f32 -1.442695, %v8021_v7 }
 0x28c   : > { %9656 = vst [vmem:[#allocation52_spill] sm:$0xff] %v8034_v62  ;;  %v2965_v45 = vsel %vm2405_vm15, %v2963_v39, %v9658_v56  ;;  %v4589_v46 = vpop.eup %4588  ;;  %4600 = vpow2.f32 %v4310_v30  ;;  %v3318_v2 = vsub.f32 1.0, %v3317_v32  ;;  %v3362_v1 = vmul.f32 %v9660_v22, %v9659_v23 }
 0x28d   : > { %v4591_v15 = vpop.eup %4590  ;;  %v3713_v61 = vadd.f32 %v9662_v3, %v9661_v27  ;;  %v9664_v9 = vand.u32 2147483647, %v9663_v29  ;;  %4602 = vpow2.f32 %v4311_v40  ;;  %v4315_v11 = vmul.f32 -1.442695, %v8029_v0  ;;  %v9671_v40 = vld [vmem:[#allocation29_spill] sm:$0xff]  ;;  %v9675_v3 = vld [vmem:[#allocation60_spill] sm:$0xff] }
 0x28e   : > { %v4593_v39 = vpop.eup %4592  ;;  %v9668_v59 = vsel %vm6816_vm12, %v9666_v42, %v9667_v35  ;;  %v3029_v44 = vadd.f32 %v2962_v24, %v7884_v50  ;;  %4604 = vpow2.f32 %v4312_v21  ;;  %v4316_v17 = vmul.f32 -1.442695, %v8034_v62 }
 0x28f   : > { %vm3341_vm6 = vcmp.eq.f32.partialorder %v9664_v9, 8.507059e+37  ;;  %v8058_v43 = vpop.eup %4594  ;;  %v3030_v26 = vadd.f32 %v2965_v45, %v2789_v28  ;;  %v8061_v33 = vadd.f32 %v7943_v36, %v3028_v47  ;;  %4606 = vpow2.f32 %v4313_v19 }
 0x290   : > { %v3344_v57 = vsel %vm3341_vm6, %v9669_v6, %v9668_v59  ;;  %v8063_v4 = vadd.f32 1.0, %v4581_v20  ;;  %v8065_v51 = vpop.eup %4596  ;;  %4608 = vpow2.f32 %v4314_v60  ;;  %v8067_v30 = vadd.f32 1.0, %v4583_v18 }
 0x291   : > { %9670 = vst [vmem:[#allocation27_spill] sm:$0xff] %v8061_v33  ;;  %v3319_v32 = vmul.f32 %v9653_v55, %v3318_v2  ;;  %v3363_v50 = vsub.f32 1.0, %v3362_v1  ;;  %v4599_v34 = vpop.eup %4598  ;;  %v8071_v24 = vadd.f32 %v3713_v61, %v9671_v40  ;;  %4610 = vpow2.f32 %v4315_v11 }
 0x292   : > { %v8073_v28 = vadd.f32 1.0, %v4585_v8  ;;  %v4601_v21 = vpop.eup %4600  ;;  %v8076_v56 = vmul.f32 %v3344_v57, %v9672_v31  ;;  %v8079_v20 = vadd.f32 %v7943_v36, %v3029_v44  ;;  %4612 = vpow2.f32 %v4316_v17 }
 0x293   : > { %v8081_v18 = vadd.f32 1.0, %v4587_v49  ;;  %v4603_v45 = vpop.eup %4602  ;;  %v8084_v47 = vadd.f32 %v7943_v36, %v3030_v26  ;;  %v4317_v19 = vmul.f32 -1.442695, %v8061_v33  ;;  %v8087_v60 = vadd.f32 1.0, %v4589_v46 }
 0x294   : > { %9673 = vst [vmem:[#allocation9_spill] sm:$0xff] %v8079_v20  ;;  %4614 = vrcp.f32 %v8063_v4  ;;  %v4605_v8 = vpop.eup %4604  ;;  %v3320_v2 = vadd.f32 %v9653_v55, %v3319_v32  ;;  %vm3322_vm15 = vweird.f32 %v9653_v55  ;;  %v3364_v1 = vmul.f32 %v9660_v22, %v3363_v50 }
 0x295   : > { %9674 = vst [vmem:[#allocation19_spill] sm:$0xff] %v8084_v47  ;;  %4616 = vrcp.f32 %v8067_v30  ;;  %v4607_v49 = vpop.eup %4606  ;;  %v8096_v61 = vadd.f32 %v7943_v36, %v9675_v3  ;;  %v8098_v29 = vadd.f32 1.0, %v4591_v15  ;;  %v3327_v46 = vand.u32 2147483648, %v9652_v38 }
 0x296   : > { %4618 = vrcp.f32 %v8073_v28  ;;  %v4609_v9 = vpop.eup %4608  ;;  %v4318_v11 = vmul.f32 -1.442695, %v8079_v20  ;;  %vm3321_vm8 = vweird.f32 %v9652_v38  ;;  %v3325_v13 = vand.u32 2147483647, %v9652_v38 }
 0x297   : > { %9676 = vst [vmem:[#allocation15_spill] sm:$0xff] %v8096_v61  ;;  %4620 = vrcp.f32 %v8081_v18  ;;  %v4611_v42 = vpop.eup %4610  ;;  %v4319_v35 = vmul.f32 -1.442695, %v8084_v47  ;;  %v8107_v36 = vadd.f32 1.0, %v4593_v39  ;;  %vm8111_vm9 = vmor %vm3321_vm8, %vm3322_vm15  ;;  %v3357_v59 = vand.u32 2147483648, %v8063_v4 }
 0x298   : > { %4622 = vrcp.f32 %v8087_v60  ;;  %v4613_v6 = vpop.eup %4612  ;;  %v3324_v38 = vsel %vm8111_vm9, %v9653_v55, %v3320_v2  ;;  %v3365_v57 = vadd.f32 %v9660_v22, %v3364_v1  ;;  %vm3367_vm11 = vweird.f32 %v9660_v22 }
 0x299   : > { %4624 = vpow2.f32 %v4317_v19  ;;  %v3328_v44 = vor.u32 1.1754944e-38, %v3327_v46  ;;  %v3370_v17 = vand.u32 2147483647, %v9659_v23  ;;  %v3372_v26 = vand.u32 2147483648, %v9659_v23 }
 0x29a   : > { %v8122_v39 = vpop.eup %4614  ;;  %4626 = vrcp.f32 %v8098_v29  ;;  %v4320_v50 = vmul.f32 -1.442695, %v8096_v61  ;;  %vm3326_vm13 = vcmp.eq.f32.partialorder %v3325_v13, 8.507059e+37  ;;  %vm3366_vm14 = vweird.f32 %v9659_v23 }
 0x29b   : > { %v8127_v32 = vpop.eup %4616  ;;  %4628 = vpow2.f32 %v4318_v11  ;;  %v8133_v31 = vsel %vm3326_vm13, %v3328_v44, %v3324_v38  ;;  %v8136_v2 = vor.u32 1.1754944e-38, %v3357_v59  ;;  %vm8140_vm0 = vmor %vm3366_vm14, %vm3367_vm11  ;;  %v8148_v23 = vadd.f32 1.0, %v8058_v43 }
 0x29c   : > { %v8131_v55 = vpop.eup %4618  ;;  %4630 = vrcp.f32 %v8107_v36  ;;  %v8151_v46 = vadd.f32 1.0, %v8065_v51  ;;  %v3369_v11 = vsel %vm8140_vm0, %v9660_v22, %v3365_v57  ;;  %v8158_v15 = vadd.f32 1.0, %v4599_v34 }
 0x29d   : > { %v8145_v3 = vpop.eup %4620  ;;  %4632 = vpow2.f32 %v4319_v35  ;;  %vm3371_vm1 = vcmp.eq.f32.partialorder %v3370_v17, 8.507059e+37  ;;  %v3373_v59 = vor.u32 1.1754944e-38, %v3372_v26  ;;  %v3387_v38 = vand.u32 2147483648, %v8067_v30 }
 0x29e   : > { %v8156_v13 = vpop.eup %4622  ;;  %v8161_v35 = vadd.f32 1.0, %v4601_v21  ;;  %v8163_v43 = vadd.f32 1.0, %v4603_v45  ;;  %v8165_v19 = vadd.f32 1.0, %v4605_v8  ;;  %v3385_v51 = vand.u32 2147483647, %v8067_v30 }
 0x29f   : > { %v4625_v44 = vpop.eup %4624  ;;  %v3347_v22 = vmul.f32 %v8122_v39, %v8063_v4  ;;  %v8172_v34 = vsel %vm3371_vm1, %v3373_v59, %v3369_v11  ;;  %v3377_v57 = vmul.f32 %v8127_v32, %v8067_v30  ;;  %v3392_v21 = vmul.f32 %v8131_v55, %v8073_v28 }
 0x2a0   : > { %v8168_v40 = vpop.eup %4626  ;;  %4634 = vpow2.f32 %v4320_v50  ;;  %v3402_v45 = vand.u32 2147483648, %v8073_v28  ;;  %v3407_v8 = vmul.f32 %v8145_v3, %v8081_v18  ;;  %v3422_v26 = vmul.f32 %v8156_v13, %v8087_v60 }
 0x2a1   : > { %v4629_v17 = vpop.eup %4628  ;;  %v8185_v11 = vadd.f32 1.0, %v4607_v49  ;;  %v8187_v59 = vadd.f32 1.0, %v4609_v9  ;;  %v8189_v27 = vor.u32 1.1754944e-38, %v3387_v38  ;;  %v3400_v61 = vand.u32 2147483647, %v8073_v28 }
 0x2a2   : > { %v8183_v1 = vpop.eup %4630  ;;  %v8192_v50 = vadd.f32 1.0, %v4611_v42  ;;  %vm3351_vm2 = vweird.f32 %v8063_v4  ;;  %v3415_v20 = vand.u32 2147483647, %v8081_v18  ;;  %v3417_v33 = vand.u32 2147483648, %v8081_v18 }
 0x2a3   : > { %v4633_v47 = vpop.eup %4632  ;;  %v3437_v62 = vmul.f32 %v8168_v40, %v8098_v29  ;;  %v8199_v49 = vadd.f32 1.0, %v4613_v6  ;;  %v3348_v9 = vsub.f32 1.0, %v3347_v22  ;;  %v3378_v0 = vsub.f32 1.0, %v3377_v57 }
 0x2a4   : > { %vm3381_vm3 = vweird.f32 %v8067_v30  ;;  %v3393_v38 = vsub.f32 1.0, %v3392_v21  ;;  %vm3396_vm10 = vweird.f32 %v8073_v28  ;;  %v8203_v42 = vor.u32 1.1754944e-38, %v3402_v45 }
 0x2a5   : > { %v3408_v7 = vsub.f32 1.0, %v3407_v8  ;;  %v3423_v16 = vsub.f32 1.0, %v3422_v26  ;;  %v3452_v52 = vmul.f32 %v8183_v1, %v8107_v36  ;;  %v8207_v53 = vadd.f32 1.0, %v4625_v44 }
 0x2a6   : > { %v8209_v58 = vadd.f32 1.0, %v4629_v17  ;;  %v8211_v6 = vadd.f32 1.0, %v4633_v47  ;;  %vm3411_vm12 = vweird.f32 %v8081_v18  ;;  %v3430_v22 = vand.u32 2147483647, %v8087_v60  ;;  %v4635_v57 = vpop.eup %4634 }
 0x2a7   : > { %vm3352_vm4 = vweird.f32 %v8122_v39  ;;  %v8216_v21 = vor.u32 1.1754944e-38, %v3417_v33  ;;  %vm3426_vm5 = vweird.f32 %v8087_v60  ;;  %v3432_v45 = vand.u32 2147483648, %v8087_v60 }
 0x2a8   : > { %v3438_v8 = vsub.f32 1.0, %v3437_v62  ;;  %v3349_v44 = vmul.f32 %v8122_v39, %v3348_v9  ;;  %v3379_v17 = vmul.f32 %v8127_v32, %v3378_v0  ;;  %v3394_v47 = vmul.f32 %v8131_v55, %v3393_v38  ;;  %vm8259_vm0 = vmor %vm3351_vm2, %vm3352_vm4 }
 0x2a9   : > { %4636 = vrcp.f32 %v8148_v23  ;;  %v3409_v26 = vmul.f32 %v8145_v3, %v3408_v7  ;;  %v3424_v5 = vmul.f32 %v8156_v13, %v3423_v16  ;;  %v3453_v10 = vsub.f32 1.0, %v3452_v52 }
 0x2aa   : > { %4638 = vrcp.f32 %v8151_v46  ;;  %v8227_v33 = vadd.f32 1.0, %v4635_v57  ;;  %v9681_v41 = vand.u32 2147483647, %v8063_v4  ;;  %vm3382_vm6 = vweird.f32 %v8127_v32 }
 0x2ab   : > { %vm8236_vm15 = vcmp.eq.f32.partialorder %v3385_v51, 8.507059e+37  ;;  %v3445_v7 = vand.u32 2147483647, %v8098_v29  ;;  %v3447_v52 = vand.u32 2147483648, %v8098_v29  ;;  %vm3397_vm8 = vweird.f32 %v8131_v55  ;;  %vm8270_vm1 = vmor %vm3381_vm3, %vm3382_vm6 }
 0x2ac   : > { %vm8231_vm7 = vcmp.eq.f32.partialorder %v9681_v41, 8.507059e+37  ;;  %vm8243_vm9 = vcmp.eq.f32.partialorder %v3400_v61, 8.507059e+37  ;;  %vm3412_vm11 = vweird.f32 %v8145_v3  ;;  %vm8248_vm13 = vcmp.eq.f32.partialorder %v3415_v20, 8.507059e+37  ;;  %vm8284_vm2 = vmor %vm3396_vm10, %vm3397_vm8 }
 0x2ad   : > { %vm3427_vm14 = vweird.f32 %v8156_v13  ;;  %v3439_v51 = vmul.f32 %v8168_v40, %v3438_v8  ;;  %v3350_v9 = vadd.f32 %v8122_v39, %v3349_v44  ;;  %v3380_v38 = vadd.f32 %v8127_v32, %v3379_v17  ;;  %vm8300_vm6 = vmor %vm3411_vm12, %vm3412_vm11 }
 0x2ae   : > { %v3395_v20 = vadd.f32 %v8131_v55, %v3394_v47  ;;  %4640 = vrcp.f32 %v8158_v15  ;;  %v3410_v4 = vadd.f32 %v8145_v3, %v3409_v26  ;;  %v3425_v8 = vadd.f32 %v8156_v13, %v3424_v5  ;;  %vm8323_vm12 = vmor %vm3426_vm5, %vm3427_vm14 }
 0x2af   : > { %v3454_v44 = vmul.f32 %v8183_v1, %v3453_v10  ;;  %4642 = vrcp.f32 %v8161_v35  ;;  %v8278_v17 = vpop.eup %4636  ;;  %vm8288_vm3 = vcmp.eq.f32.partialorder %v3430_v22, 8.507059e+37  ;;  %v3433_v26 = vor.u32 1.1754944e-38, %v3432_v45 }
 0x2b0   : > { %vm3441_vm4 = vweird.f32 %v8098_v29  ;;  %4644 = vrcp.f32 %v8163_v43  ;;  %v8294_v10 = vpop.eup %4638  ;;  %v3440_v28 = vadd.f32 %v8168_v40, %v3439_v51  ;;  %vm3442_vm10 = vweird.f32 %v8168_v40 }
 0x2b1   : > { %vm8306_vm8 = vcmp.eq.f32.partialorder %v3445_v7, 8.507059e+37  ;;  %v3448_v45 = vor.u32 1.1754944e-38, %v3447_v52  ;;  %v3354_v12 = vsel %vm8259_vm0, %v8122_v39, %v3350_v9  ;;  %v3384_v18 = vsel %vm8270_vm1, %v8127_v32, %v3380_v38  ;;  %vm8340_vm5 = vmor %vm3441_vm4, %vm3442_vm10 }
 0x2b2   : > { %v3399_v37 = vsel %vm8284_vm2, %v8131_v55, %v3395_v20  ;;  %v3460_v52 = vand.u32 2147483647, %v8107_v36  ;;  %v3414_v39 = vsel %vm8300_vm6, %v8145_v3, %v3410_v4  ;;  %v3429_v32 = vsel %vm8323_vm12, %v8156_v13, %v3425_v8 }
 0x2b3   : > { %v3455_v55 = vadd.f32 %v8183_v1, %v3454_v44  ;;  %vm3457_vm11 = vweird.f32 %v8183_v1  ;;  %vm3456_vm14 = vweird.f32 %v8107_v36  ;;  %v3462_v3 = vand.u32 2147483648, %v8107_v36 }
 0x2b4   : > { %v8336_v51 = vpop.eup %4640  ;;  %v3467_v9 = vmul.f32 %v8278_v17, %v8148_v23  ;;  %v3482_v13 = vmul.f32 %v8294_v10, %v8151_v46  ;;  %v8355_v29 = vsel %vm8231_vm7, %v8136_v2, %v3354_v12  ;;  %v8360_v38 = vsel %vm8236_vm15, %v8189_v27, %v3384_v18  ;;  %vm3458_vm7 = vmor %vm3456_vm14, %vm3457_vm11 }
 0x2b5   : > { %v8350_v61 = vpop.eup %4642  ;;  %v3444_v36 = vsel %vm8340_vm5, %v8168_v40, %v3440_v28  ;;  %4646 = vrcp.f32 %v8165_v19  ;;  %v8371_v57 = vsel %vm8243_vm9, %v8203_v42, %v3399_v37  ;;  %v8376_v12 = vsel %vm8248_vm13, %v8216_v21, %v3414_v39 }
 0x2b6   : > { %v8366_v20 = vpop.eup %4644  ;;  %v8380_v27 = vsel %vm8288_vm3, %v3433_v26, %v3429_v32  ;;  %vm3461_vm15 = vcmp.eq.f32.partialorder %v3460_v52, 8.507059e+37  ;;  %v3459_v40 = vsel %vm3458_vm7, %v8183_v1, %v3455_v55  ;;  %v3477_v2 = vand.u32 2147483648, %v8148_v23 }
 0x2b7   : > { %v3492_v37 = vand.u32 2147483648, %v8151_v46  ;;  %v3497_v42 = vmul.f32 %v8336_v51, %v8158_v15  ;;  %v8391_v21 = vsel %vm8306_vm8, %v3448_v45, %v3444_v36  ;;  %v3463_v62 = vor.u32 1.1754944e-38, %v3462_v3 }
 0x2b8   : > { %v3468_v0 = vsub.f32 1.0, %v3467_v9  ;;  %v3483_v16 = vsub.f32 1.0, %v3482_v13  ;;  %vm3471_vm9 = vweird.f32 %v8148_v23  ;;  %v3475_v41 = vand.u32 2147483647, %v8148_v23  ;;  %v9708_v13 = vld [vmem:[#allocation49_spill] sm:$0xff] }
 0x2b9   : > { %v3512_v1 = vmul.f32 %v8350_v61, %v8161_v35  ;;  %v3527_v4 = vmul.f32 %v8366_v20, %v8163_v43  ;;  %v8399_v8 = vsel %vm3461_vm15, %v3463_v62, %v3459_v40  ;;  %vm3486_vm13 = vweird.f32 %v8151_v46 }
 0x2ba   : > { %v3490_v44 = vand.u32 2147483647, %v8151_v46  ;;  %v3507_v30 = vand.u32 2147483648, %v8158_v15  ;;  %v3478_v26 = vor.u32 1.1754944e-38, %v3477_v2  ;;  %v8406_v5 = vor.u32 1.1754944e-38, %v3492_v37 }
 0x2bb   : > { %v8404_v47 = vpop.eup %4646  ;;  %v3498_v28 = vsub.f32 1.0, %v3497_v42  ;;  %v3522_v22 = vand.u32 2147483648, %v8161_v35  ;;  %v3469_v45 = vmul.f32 %v8278_v17, %v3468_v0  ;;  %v3484_v18 = vmul.f32 %v8294_v10, %v3483_v16 }
 0x2bc   : > { %v3505_v7 = vand.u32 2147483647, %v8158_v15  ;;  %4648 = vrcp.f32 %v8185_v11  ;;  %vm3501_vm0 = vweird.f32 %v8158_v15  ;;  %v3513_v52 = vsub.f32 1.0, %v3512_v1 }
 0x2bd   : > { %v3520_v39 = vand.u32 2147483647, %v8161_v35  ;;  %v3528_v32 = vsub.f32 1.0, %v3527_v4  ;;  %v3537_v55 = vand.u32 2147483648, %v8163_v43  ;;  %vm3472_vm1 = vweird.f32 %v8278_v17 }
 0x2be   : > { %vm8417_vm2 = vcmp.eq.f32.partialorder %v3475_v41, 8.507059e+37  ;;  %v3508_v3 = vor.u32 1.1754944e-38, %v3507_v30  ;;  %vm3516_vm3 = vweird.f32 %v8161_v35  ;;  %v3542_v9 = vmul.f32 %v8404_v47, %v8165_v19  ;;  %vm8454_vm5 = vmor %vm3471_vm9, %vm3472_vm1 }
 0x2bf   : > { %v8426_v36 = vmul.f32 %v8133_v31, %v9708_v13  ;;  %v3499_v40 = vmul.f32 %v8336_v51, %v3498_v28  ;;  %v8429_v2 = vor.u32 1.1754944e-38, %v3522_v22  ;;  %vm3531_vm4 = vweird.f32 %v8163_v43 }
 0x2c0   : > { %v3535_v37 = vand.u32 2147483647, %v8163_v43  ;;  %v3470_v42 = vadd.f32 %v8278_v17, %v3469_v45  ;;  %v3485_v62 = vadd.f32 %v8294_v10, %v3484_v18  ;;  %vm3487_vm6 = vweird.f32 %v8294_v10 }
 0x2c1   : > { %vm8436_vm10 = vcmp.eq.f32.partialorder %v3490_v44, 8.507059e+37  ;;  %vm3502_vm8 = vweird.f32 %v8336_v51  ;;  %vm8441_vm12 = vcmp.eq.f32.partialorder %v3505_v7, 8.507059e+37  ;;  %v3514_v16 = vmul.f32 %v8350_v61, %v3513_v52  ;;  %vm8467_vm14 = vmor %vm3486_vm13, %vm3487_vm6  ;;  %v9721_v52 = vld [vmem:[#allocation67_spill] sm:$0xff] }
 0x2c2   : > { %vm3517_vm11 = vweird.f32 %v8350_v61  ;;  %v3529_v41 = vmul.f32 %v8366_v20, %v3528_v32  ;;  %v3538_v1 = vor.u32 1.1754944e-38, %v3537_v55  ;;  %v8448_v4 = vpop.eup %4648  ;;  %v3543_v30 = vsub.f32 1.0, %v3542_v9  ;;  %vm8503_vm13 = vmor %vm3501_vm0, %vm3502_vm8 }
 0x2c3   : > { %4650 = vrcp.f32 %v8187_v59  ;;  %v8461_v28 = vmul.f32 %v8355_v29, %v7947_v54  ;;  %v3715_v22 = vadd.f32 %v8071_v24, %v8426_v36  ;;  %v3500_v23 = vadd.f32 %v8336_v51, %v3499_v40  ;;  %vm8525_vm0 = vmor %vm3516_vm3, %vm3517_vm11 }
 0x2c4   : > { %vm8472_vm7 = vcmp.eq.f32.partialorder %v3520_v39, 8.507059e+37  ;;  %vm3532_vm15 = vweird.f32 %v8366_v20  ;;  %vm8477_vm9 = vcmp.eq.f32.partialorder %v3535_v37, 8.507059e+37  ;;  %v3550_v24 = vand.u32 2147483647, %v8165_v19 }
 0x2c5   : > { %v3552_v46 = vand.u32 2147483648, %v8165_v19  ;;  %v3474_v29 = vsel %vm8454_vm5, %v8278_v17, %v3470_v42  ;;  %v3489_v7 = vsel %vm8467_vm14, %v8294_v10, %v3485_v62  ;;  %v8491_v39 = vmul.f32 %v8172_v34, %v9721_v52  ;;  %v9734_v52 = vld [vmem:[#allocation83_spill] sm:$0xff]  ;;  %v9735_v42 = vld [vmem:[#allocation84_spill] sm:$0xff] }
 0x2c6   : > { %v3716_v32 = vadd.f32 %v3715_v22, %v8076_v56  ;;  %v3515_v55 = vadd.f32 %v8350_v61, %v3514_v16  ;;  %v3530_v9 = vadd.f32 %v8366_v20, %v3529_v41  ;;  %v3557_v13 = vmul.f32 %v8448_v4, %v8185_v11 }
 0x2c7   : > { %4652 = vrcp.f32 %v8192_v50  ;;  %v3544_v34 = vmul.f32 %v8404_v47, %v3543_v30  ;;  %v8511_v10 = vmul.f32 %v8360_v38, %v7951_v25  ;;  %v8516_v37 = vsel %vm8417_vm2, %v3478_v26, %v3474_v29  ;;  %vm8536_vm2 = vmor %vm3531_vm4, %vm3532_vm15  ;;  %v9749_v29 = vld [vmem:[#allocation12_spill] sm:$0xff] }
 0x2c8   : > { %4654 = vrcp.f32 %v8199_v49  ;;  %v3717_v40 = vadd.f32 %v3716_v32, %v8461_v28  ;;  %v3504_v15 = vsel %vm8503_vm13, %v8336_v51, %v3500_v23  ;;  %vm3546_vm1 = vweird.f32 %v8165_v19 }
 0x2c9   : > { %v3553_v25 = vor.u32 1.1754944e-38, %v3552_v46  ;;  %v8530_v38 = vpop.eup %4650  ;;  %vm3547_vm6 = vweird.f32 %v8404_v47  ;;  %vm8541_vm8 = vcmp.eq.f32.partialorder %v3550_v24, 8.507059e+37  ;;  %4656 = vrcp.f32 %v8207_v53 }
 0x2ca   : > { %v8548_v51 = vmul.f32 %v8371_v57, %v7958_v48  ;;  %v3718_v60 = vadd.f32 %v3717_v40, %v8491_v39  ;;  %v8554_v43 = vsel %vm8436_vm10, %v8406_v5, %v3489_v7  ;;  %v3519_v62 = vsel %vm8525_vm0, %v8350_v61, %v3515_v55  ;;  %vm8600_vm4 = vmor %vm3546_vm1, %vm3547_vm6 }
 0x2cb   : > { %v3534_v16 = vsel %vm8536_vm2, %v8366_v20, %v3530_v9  ;;  %v3558_v41 = vsub.f32 1.0, %v3557_v13  ;;  %v8564_v48 = vsel %vm8441_vm12, %v3508_v3, %v3504_v15  ;;  %v3545_v57 = vadd.f32 %v8404_v47, %v3544_v34 }
 0x2cc   : > { %v8569_v0 = vmul.f32 %v8376_v12, %v7964_v14  ;;  %v3719_v5 = vadd.f32 %v3718_v60, %v8511_v10  ;;  %vm3561_vm3 = vweird.f32 %v8185_v11  ;;  %v3565_v61 = vand.u32 2147483647, %v8185_v11 }
 0x2cd   : > { %v8572_v44 = vpop.eup %4652  ;;  %v3567_v20 = vand.u32 2147483648, %v8185_v11  ;;  %v3572_v3 = vmul.f32 %v8530_v38, %v8187_v59  ;;  %4658 = vrcp.f32 %v8209_v58  ;;  %v8585_v14 = vsel %vm8472_vm7, %v8429_v2, %v3519_v62 }
 0x2ce   : > { %v8580_v31 = vpop.eup %4654  ;;  %v8589_v12 = vsel %vm8477_vm9, %v3538_v1, %v3534_v16  ;;  %v8593_v30 = vmul.f32 %v8380_v27, %v7969_v63  ;;  %v3720_v22 = vadd.f32 %v3719_v5, %v8548_v51  ;;  %v3559_v2 = vmul.f32 %v8448_v4, %v3558_v41  ;;  %v9738_v5 = vld [vmem:[#allocation4_spill] sm:$0xff] }
 0x2cf   : > { %vm3562_vm10 = vweird.f32 %v8448_v4  ;;  %v3582_v1 = vand.u32 2147483648, %v8187_v59  ;;  %4660 = vrcp.f32 %v8211_v6  ;;  %v8608_v63 = vpop.eup %4656  ;;  %v3549_v27 = vsel %vm8600_vm4, %v8404_v47, %v3545_v57 }
 0x2d0   : > { %v3587_v19 = vmul.f32 %v8572_v44, %v8192_v50  ;;  %v3597_v23 = vand.u32 2147483648, %v8192_v50  ;;  %v3721_v18 = vadd.f32 %v3720_v22, %v8569_v0  ;;  %v3568_v54 = vor.u32 1.1754944e-38, %v3567_v20  ;;  %vm8659_vm14 = vmor %vm3561_vm3, %vm3562_vm10 }
 0x2d1   : > { %v3573_v24 = vsub.f32 1.0, %v3572_v3  ;;  %v3602_v46 = vmul.f32 %v8580_v31, %v8199_v49  ;;  %4662 = vrcp.f32 %v8227_v33  ;;  %vm8620_vm12 = vcmp.eq.f32.partialorder %v3565_v61, 8.507059e+37 }
 0x2d2   : > { %v3580_v47 = vand.u32 2147483647, %v8187_v59  ;;  %v3595_v7 = vand.u32 2147483647, %v8192_v50  ;;  %v8628_v32 = vmul.f32 %v8391_v21, %v9734_v52  ;;  %v3722_v55 = vadd.f32 %v3721_v18, %v8593_v30 }
 0x2d3   : > { %v8631_v9 = vpop.eup %4658  ;;  %v8635_v13 = vsel %vm8541_vm8, %v3553_v25, %v3549_v27  ;;  %v3560_v17 = vadd.f32 %v8448_v4, %v3559_v2  ;;  %vm3576_vm11 = vweird.f32 %v8187_v59  ;;  %v8639_v34 = vor.u32 1.1754944e-38, %v3582_v1 }
 0x2d4   : > { %v3617_v40 = vmul.f32 %v8608_v63, %v8207_v53  ;;  %v3588_v15 = vsub.f32 1.0, %v3587_v19  ;;  %v8643_v21 = vor.u32 1.1754944e-38, %v3597_v23  ;;  %v8647_v26 = vmul.f32 %v8399_v8, %v9735_v42  ;;  %v9741_v19 = vld [vmem:[#allocation55_spill] sm:$0xff] }
 0x2d5   : > { %v3723_v35 = vadd.f32 %v3722_v55, %v8628_v32  ;;  %v8650_v25 = vpop.eup %4660  ;;  %v3574_v60 = vmul.f32 %v8530_v38, %v3573_v24  ;;  %vm3577_vm5 = vweird.f32 %v8530_v38  ;;  %v3603_v62 = vsub.f32 1.0, %v3602_v46  ;;  %v9744_v55 = vld [vmem:[#allocation56_spill] sm:$0xff] }
 0x2d6   : > { %v3612_v16 = vand.u32 2147483648, %v8199_v49  ;;  %vm3591_vm7 = vweird.f32 %v8192_v50  ;;  %v3610_v8 = vand.u32 2147483647, %v8199_v49  ;;  %v3632_v57 = vmul.f32 %v8631_v9, %v8209_v58  ;;  %vm8715_vm6 = vmor %vm3576_vm11, %vm3577_vm5  ;;  %v9771_v50 = vld [vmem:[#allocation9_spill] sm:$0xff] }
 0x2d7   : > { %v8669_v61 = vmul.f32 %v8516_v37, %v9738_v5  ;;  %v3724_v20 = vadd.f32 %v3723_v35, %v8647_v26  ;;  %v8672_v3 = vpop.eup %4662  ;;  %v3564_v11 = vsel %vm8659_vm14, %v8448_v4, %v3560_v17  ;;  %vm3606_vm15 = vweird.f32 %v8199_v49 }
 0x2d8   : > { %v3618_v22 = vsub.f32 1.0, %v3617_v40  ;;  %v3625_v45 = vand.u32 2147483647, %v8207_v53  ;;  %v3627_v2 = vand.u32 2147483648, %v8207_v53  ;;  %vm8680_vm9 = vcmp.eq.f32.partialorder %v3580_v47, 8.507059e+37 }
 0x2d9   : > { %v3589_v37 = vmul.f32 %v8572_v44, %v3588_v15  ;;  %v3647_v27 = vmul.f32 %v8650_v25, %v8211_v6  ;;  %v8689_v23 = vmul.f32 %v8554_v43, %v9741_v19  ;;  %v3725_v4 = vadd.f32 %v3724_v20, %v8669_v61  ;;  %v9752_v20 = vld [vmem:[#allocation17_spill] sm:$0xff] }
 0x2da   : > { %v3575_v18 = vadd.f32 %v8530_v38, %v3574_v60  ;;  %vm3592_vm13 = vweird.f32 %v8572_v44  ;;  %v3604_v24 = vmul.f32 %v8580_v31, %v3603_v62  ;;  %v3613_v46 = vor.u32 1.1754944e-38, %v3612_v16  ;;  %v9766_v60 = vld [vmem:[#allocation69_spill] sm:$0xff] }
 0x2db   : > { %vm3621_vm0 = vweird.f32 %v8207_v53  ;;  %vm8696_vm1 = vcmp.eq.f32.partialorder %v3595_v7, 8.507059e+37  ;;  %v3633_v52 = vsub.f32 1.0, %v3632_v57  ;;  %v3662_v43 = vmul.f32 %v8672_v3, %v8227_v33  ;;  %vm8749_vm10 = vmor %vm3591_vm7, %vm3592_vm13 }
 0x2dc   : > { %v8704_v17 = vmul.f32 %v8564_v48, %v9744_v55  ;;  %v3726_v40 = vadd.f32 %v3725_v4, %v8689_v23  ;;  %v3569_v15 = vsel %vm8620_vm12, %v3568_v54, %v3564_v11  ;;  %vm3607_vm2 = vweird.f32 %v8580_v31 }
 0x2dd   : > { %v3619_v7 = vmul.f32 %v8608_v63, %v3618_v22  ;;  %v3628_v42 = vor.u32 1.1754944e-38, %v3627_v2  ;;  %v3590_v48 = vadd.f32 %v8572_v44, %v3589_v37  ;;  %vm8720_vm8 = vcmp.eq.f32.partialorder %v3610_v8, 8.507059e+37  ;;  %vm8764_vm5 = vmor %vm3606_vm15, %vm3607_vm2 }
 0x2de   : > { %v3648_v54 = vsub.f32 1.0, %v3647_v27  ;;  %v8726_v62 = vmul.f32 %v8585_v14, %v9749_v29  ;;  %v3727_v16 = vadd.f32 %v3726_v40, %v8704_v17  ;;  %v3579_v59 = vsel %vm8715_vm6, %v8530_v38, %v3575_v18  ;;  %v9757_v27 = vld [vmem:[#allocation14_spill] sm:$0xff]  ;;  %v9763_v40 = vld [vmem:[#allocation39_spill] sm:$0xff] }
 0x2df   : > { %v3605_v41 = vadd.f32 %v8580_v31, %v3604_v24  ;;  %vm3636_vm3 = vweird.f32 %v8209_v58  ;;  %v3640_v8 = vand.u32 2147483647, %v8209_v58  ;;  %vm8735_vm4 = vcmp.eq.f32.partialorder %v3625_v45, 8.507059e+37 }
 0x2e0   : > { %v3634_v5 = vmul.f32 %v8631_v9, %v3633_v52  ;;  %v3663_v14 = vsub.f32 1.0, %v3662_v43  ;;  %v8742_v11 = vmul.f32 %v8589_v12, %v9752_v20  ;;  %v3728_v22 = vadd.f32 %v3727_v16, %v8726_v62  ;;  %v9760_v52 = vld [vmem:[#allocation33_spill] sm:$0xff] }
 0x2e1   : > { %v3620_v45 = vadd.f32 %v8608_v63, %v3619_v7  ;;  %vm3622_vm12 = vweird.f32 %v8608_v63  ;;  %v3642_v2 = vand.u32 2147483648, %v8209_v58  ;;  %vm3651_vm11 = vweird.f32 %v8211_v6 }
 0x2e2   : > { %v3594_v12 = vsel %vm8749_vm10, %v8572_v44, %v3590_v48  ;;  %v3649_v37 = vmul.f32 %v8650_v25, %v3648_v54  ;;  %v8771_v19 = vmul.f32 %v8635_v13, %v9757_v27  ;;  %v3729_v4 = vadd.f32 %v3728_v22, %v8742_v11  ;;  %vm8783_vm7 = vmor %vm3621_vm0, %vm3622_vm12 }
 0x2e3   : > { %v3584_v44 = vsel %vm8680_vm9, %v8639_v34, %v3579_v59  ;;  %v3609_v49 = vsel %vm8764_vm5, %v8580_v31, %v3605_v41  ;;  %vm3637_vm14 = vweird.f32 %v8631_v9  ;;  %v3635_v13 = vadd.f32 %v8631_v9, %v3634_v5 }
 0x2e4   : > { %v3664_v24 = vmul.f32 %v8672_v3, %v3663_v14  ;;  %v8790_v43 = vmul.f32 %v3569_v15, %v9760_v52  ;;  %v3730_v34 = vadd.f32 %v3729_v4, %v8771_v19  ;;  %v3599_v31 = vsel %vm8696_vm1, %v8643_v21, %v3594_v12  ;;  %vm8815_vm13 = vmor %vm3636_vm3, %vm3637_vm14 }
 0x2e5   : > { %v3624_v53 = vsel %vm8783_vm7, %v8608_v63, %v3620_v45  ;;  %vm8799_vm15 = vcmp.eq.f32.partialorder %v3640_v8, 8.507059e+37  ;;  %vm3652_vm9 = vweird.f32 %v8650_v25  ;;  %v3650_v55 = vadd.f32 %v8650_v25, %v3649_v37  ;;  %v9770_v45 = vld [vmem:[#allocation27_spill] sm:$0xff] }
 0x2e6   : > { %v8806_v15 = vmul.f32 %v3584_v44, %v9763_v40  ;;  %v3731_v7 = vadd.f32 %v3730_v34, %v8790_v43  ;;  %v4706_v35 = vmov 256.0   ;;  %v3614_v21 = vsel %vm8720_vm8, %v3613_v46, %v3609_v49  ;;  %vm8836_vm1 = vmor %vm3651_vm11, %vm3652_vm9  ;;  %v9772_v49 = vld [vmem:[#allocation19_spill] sm:$0xff] }
 0x2e7   : > { %4664 = vrcp.f32 %v4706_v35  ;;  %v3655_v47 = vand.u32 2147483647, %v8211_v6  ;;  %v3657_v48 = vand.u32 2147483648, %v8211_v6  ;;  %vm3667_vm0 = vweird.f32 %v8672_v3 }
 0x2e8   : > { %v3639_v54 = vsel %vm8815_vm13, %v8631_v9, %v3635_v13  ;;  %v3665_v46 = vadd.f32 %v8672_v3, %v3664_v24  ;;  %v8827_v29 = vmul.f32 %v3599_v31, %v9766_v60  ;;  %v3732_v58 = vadd.f32 %v3731_v7, %v8806_v15  ;;  %v9773_v13 = vld [vmem:[#allocation15_spill] sm:$0xff] }
 0x2e9   : > { %v3629_v16 = vsel %vm8735_vm4, %v3628_v42, %v3624_v53  ;;  %v3643_v59 = vor.u32 1.1754944e-38, %v3642_v2  ;;  %vm3666_vm2 = vweird.f32 %v8227_v33  ;;  %v3672_v9 = vand.u32 2147483648, %v8227_v33  ;;  %v9769_v42 = vld [vmem:[#allocation52_spill] sm:$0xff] }
 0x2ea   : > { %v3654_v8 = vsel %vm8836_vm1, %v8650_v25, %v3650_v55  ;;  %v3670_v57 = vand.u32 2147483647, %v8227_v33  ;;  %v8847_v5 = vmul.f32 %v3614_v21, %v9769_v42  ;;  %v3733_v14 = vadd.f32 %v3732_v58, %v8827_v29  ;;  %vm3668_vm6 = vmor %vm3666_vm2, %vm3667_vm0  ;;  %v3759_v58 = vld [vmem:[#allocation3] sm:$0x1] }
 0x2eb   : > { %v3644_v6 = vsel %vm8799_vm15, %v3643_v59, %v3639_v54  ;;  %v3658_v20 = vor.u32 1.1754944e-38, %v3657_v48  ;;  %vm3656_vm8 = vcmp.eq.f32.partialorder %v3655_v47, 8.507059e+37  ;;  %v3669_v38 = vsel %vm3668_vm6, %v8672_v3, %v3665_v46  ;;  %v3753_v48 = vld [vmem:[%s9068_s5] sm:$0x1] }
 0x2ec   : > { %v8856_v25 = vmul.f32 %v3629_v16, %v9770_v45  ;;  %v3734_v33 = vadd.f32 %v3733_v14, %v8847_v5  ;;  %v3673_v12 = vor.u32 1.1754944e-38, %v3672_v9  ;;  %vm3671_vm3 = vcmp.eq.f32.partialorder %v3670_v57, 8.507059e+37 }
 0x2ed   : > { %v4665_v22 = vpop.eup %4664  ;;  %v3659_v2 = vsel %vm3656_vm8, %v3658_v20, %v3654_v8  ;;  %v8860_v37 = vmul.f32 %v3644_v6, %v9771_v50  ;;  %vm3755_vm10 = vcmask 1040384   ;;  %v4707_v59 = vmov 0  }
 0x2ee   : > { %v3735_v27 = vadd.f32 %v3734_v33, %v8856_v25  ;;  %v3674_v4 = vsel %vm3671_vm3, %v3673_v12, %v3669_v38  ;;  %v3746_v44 = vmul.f32 256.0, %v4665_v22  ;;  %v8864_v18 = vmul.f32 %v3659_v2, %v9772_v49  ;;  %4403 = vset.pattern.permute.xlu0 %v4707_v59 }
 0x2ef   : > { %v8868_v24 = vmul.f32 %v3674_v4, %v9773_v13  ;;  %vm3750_vm4 = vweird.f32 %v4665_v22  ;;  %v3789_v4 = vld [vmem:[%s9071_s8] sm:$0x1]  ;;  %vm4080_vm0 = vcmask 31744  }
 0x2f0   : > { %v3736_v3 = vadd.f32 %v3735_v27, %v8860_v37  ;;  %v3747_v34 = vsub.f32 1.0, %v3746_v44  ;;  %v3781_v27 = vld [vmem:[%s9070_s7] sm:$0x1] }
 0x2f2   : > { %v3737_v52 = vadd.f32 %v3736_v3, %v8864_v18  ;;  %v3748_v1 = vmul.f32 %v4665_v22, %v3747_v34  ;;  %v4382_v3 = vld [vmem:[%s9072_s9 + $0x38] sm:$0xff] }
 0x2f3   : > { %3927 = vmatpush.bf16.msra.mxu1 %v4382_v3  ;;  %4384 = vmatpush.bf16.msra.mxu2 %v4382_v3  ;;  %v9779_v3 = vld [vmem:[#allocation40_spill] sm:$0xff] }
 0x2f4   : > { %v3738_v31 = vadd.f32 %v3737_v52, %v8868_v24  ;;  %v3749_v7 = vadd.f32 %v4665_v22, %v3748_v1  ;;  %v4381_v52 = vld [vmem:[%s9072_s9 + $0x30] sm:$0xff] }
 0x2f6   : > { %v3739_v53 = vrot.slane %v3738_v31, 4  ;;  %v3751_v63 = vsel %vm3750_vm4, %v4665_v22, %v3749_v7  ;;  %v4377_v7 = vld [vmem:[%s9072_s9 + $0x10] sm:$0xff] }
 0x2f7   : > { %3928 = vmatpush.bf16.msra.mxu1 %v4381_v52  ;;  %4385 = vmatpush.bf16.msra.mxu2 %v4381_v52 }
 0x2f8   : > { %v3740_v55 = vadd.f32 %v3739_v53, %v3738_v31  ;;  %v4380_v31 = vld [vmem:[%s9072_s9 + $0x28] sm:$0xff]  ;;  %v4379_v53 = vld [vmem:[%s9072_s9 + $0x20] sm:$0xff] }
 0x2fa   : > { %v3741_v40 = vrot.slane %v3740_v55, 2 }
 0x2fb   : > { %3929 = vmatpush.bf16.msra.mxu1 %v4380_v31  ;;  %4386 = vmatpush.bf16.msra.mxu2 %v4380_v31 }
 0x2fc   : > { %v3742_v35 = vadd.f32 %v3741_v40, %v3740_v55  ;;  %v4378_v40 = vld [vmem:[%s9072_s9 + $0x18] sm:$0xff] }
 0x2fe   : > { %v3743_v21 = vrot.slane %v3742_v35, 1 }
 0x2ff   : > { %3930 = vmatpush.bf16.msra.mxu1 %v4379_v53  ;;  %4387 = vmatpush.bf16.msra.mxu2 %v4379_v53  ;;  %v9780_v53 = vld [vmem:[#allocation5_spill] sm:$0xff] }
 0x300   : > { %v3744_v47 = vadd.f32 %v3743_v21, %v3742_v35 }
 0x302   : > { %v3752_v54 = vmul.f32 %v3751_v63, %v3744_v47  ;;  %v4376_v63 = vld [vmem:[%s9072_s9 + $0x8] sm:$0xff] }
 0x303   : > { %3931 = vmatpush.bf16.msra.mxu1 %v4378_v40  ;;  %4388 = vmatpush.bf16.msra.mxu2 %v4378_v40 }
 0x304   : > { %v3754_v46 = vmul.f32 %v3753_v48, %v3752_v54 }
 0x306   : > { %v3756_v60 = vsel %vm3755_vm10, %v3754_v46, 0.0 }
 0x307   : > { %3757 = vadd.xlane.f32.xlu0 %v3756_v60  ;;  %3932 = vmatpush.bf16.msra.mxu1 %v4377_v7  ;;  %v4375_v60 = vld [vmem:[%s9072_s9] sm:$0xff] }
 0x308   : > { %4389 = vmatpush.bf16.msra.mxu2 %v4377_v7 }
 0x30b   : > { %3933 = vmatpush.bf16.msra.mxu1 %v4376_v63 }
 0x30c   : > { %4390 = vmatpush.bf16.msra.mxu2 %v4376_v63 }
 0x30f   : > { %3934 = vmatpush.bf16.msra.mxu1 %v4375_v60 }
 0x310   : > { %4391 = vmatpush.bf16.msra.mxu2 %v4375_v60 }
 0x37a   : > { %v3758_v16 = vpop.xlane.xlu0 %3757 }
 0x37b   : > { %v3760_v41 = vadd.f32 %v3759_v58, %v3758_v16 }
 0x37d   : > { %v4321_v9 = vmul.f32 -1.442695, %v3760_v41 }
 0x37f   : > { %4666 = vpow2.f32 %v4321_v9 }
 0x385   : > { %v4667_v8 = vpop.eup %4666 }
 0x386   : > { %v3764_v57 = vadd.f32 1.0, %v4667_v8  ;;  %v9774_v8 = vld [vmem:[#allocation18_spill] sm:$0xff] }
 0x388   : > { %4668 = vrcp.f32 %v3764_v57  ;;  %v3776_v20 = vand.u32 2147483648, %v3764_v57  ;;  %v3774_v38 = vand.u32 2147483647, %v3764_v57  ;;  %vm3770_vm11 = vweird.f32 %v3764_v57 }
 0x38a   : > { %v3777_v33 = vor.u32 1.1754944e-38, %v3776_v20  ;;  %vm3775_vm14 = vcmp.eq.f32.partialorder %v3774_v38, 8.507059e+37 }
 0x38e   : > { %v4669_v42 = vpop.eup %4668 }
 0x38f   : > { %v3766_v14 = vmul.f32 %v4669_v42, %v3764_v57  ;;  %vm3771_vm12 = vweird.f32 %v4669_v42 }
 0x390   : > { %vm3772_vm5 = vmor %vm3770_vm11, %vm3771_vm12 }
 0x391   : > { %v3767_v6 = vsub.f32 1.0, %v3766_v14 }
 0x393   : > { %v3768_v22 = vmul.f32 %v4669_v42, %v3767_v6 }
 0x395   : > { %v3769_v45 = vadd.f32 %v4669_v42, %v3768_v22 }
 0x397   : > { %v3773_v2 = vsel %vm3772_vm5, %v4669_v42, %v3769_v45  ;;  %v9775_v42 = vld [vmem:[#allocation20_spill] sm:$0xff] }
 0x398   : > { %v3778_v12 = vsel %vm3775_vm14, %v3777_v33, %v3773_v2  ;;  %v9776_v45 = vld [vmem:[#allocation44_spill] sm:$0xff]  ;;  %v9777_v2 = vld [vmem:[#allocation45_spill] sm:$0xff] }
 0x399   : > { %v3780_v50 = vmul.f32 %v3778_v12, %v3760_v41 }
 0x39b   : > { %3784 = vperm.xlu0 %4403, %v3780_v50  }
 0x40d   : > { %v3785_v44 = vpop.permute.xlu0 %3784 }
 0x40e   : > { %v3787_v49 = vmul.f32 %v3785_v44, %v3781_v27 }
 0x410   : > { %v3790_v13 = vadd.f32 %v3789_v4, %v3787_v49  ;;  %v9778_v49 = vld [vmem:[#allocation38_spill] sm:$0xff] }
 0x412   : > { %v4322_v34 = vmul.f32 -1.442695, %v3790_v13 }
 0x414   : > { %4670 = vpow2.f32 %v4322_v34 }
 0x41a   : > { %v4671_v1 = vpop.eup %4670 }
 0x41b   : > { %v3794_v55 = vadd.f32 1.0, %v4671_v1  ;;  %v9781_v1 = vld [vmem:[#allocation29_spill] sm:$0xff] }
 0x41d   : > { %4672 = vrcp.f32 %v3794_v55  ;;  %v3806_v48 = vand.u32 2147483648, %v3794_v55  ;;  %v3804_v46 = vand.u32 2147483647, %v3794_v55  ;;  %vm3800_vm15 = vweird.f32 %v3794_v55 }
 0x41f   : > { %v3807_v16 = vor.u32 1.1754944e-38, %v3806_v48  ;;  %vm3805_vm13 = vcmp.eq.f32.partialorder %v3804_v46, 8.507059e+37 }
 0x423   : > { %v4673_v35 = vpop.eup %4672 }
 0x424   : > { %v3796_v21 = vmul.f32 %v4673_v35, %v3794_v55  ;;  %vm3801_vm7 = vweird.f32 %v4673_v35 }
 0x425   : > { %vm3802_vm9 = vmor %vm3800_vm15, %vm3801_vm7 }
 0x426   : > { %v3797_v47 = vsub.f32 1.0, %v3796_v21 }
 0x428   : > { %v3798_v54 = vmul.f32 %v4673_v35, %v3797_v47 }
 0x42a   : > { %v3799_v58 = vadd.f32 %v4673_v35, %v3798_v54 }
 0x42c   : > { %v3803_v59 = vsel %vm3802_vm9, %v4673_v35, %v3799_v58 }
 0x42d   : > { %v3808_v41 = vsel %vm3805_vm13, %v3807_v16, %v3803_v59 }
 0x42e   : > { %v3810_v9 = vperm.slane %v3808_v41, 0 }
 0x430   : > { %v3811_v57 = vmul.f32 %v3810_v9, %v9774_v8  ;;  %v3812_v14 = vmul.f32 %v3810_v9, %v9775_v42  ;;  %v3827_v6 = vmul.f32 %v3810_v9, %v8628_v32  ;;  %v3828_v20 = vmul.f32 %v3810_v9, %v8647_v26 }
 0x431   : > { %v3813_v33 = vmul.f32 %v3810_v9, %v9776_v45  ;;  %v3814_v12 = vmul.f32 %v3810_v9, %v9777_v2  ;;  %v3829_v50 = vmul.f32 %v3810_v9, %v8669_v61  ;;  %v3830_v27 = vmul.f32 %v3810_v9, %v8689_v23 }
 0x432   : > { %v3843_v22 = vpack.c.bf16 %v3812_v14, %v3811_v57  ;;  %v3851_v38 = vpack.c.bf16 %v3828_v20, %v3827_v6  ;;  %v3815_v32 = vmul.f32 %v3810_v9, %v9778_v49  ;;  %v3816_v26 = vmul.f32 %v3810_v9, %v9779_v3 }
 0x433   : > { %v3844_v4 = vpack.c.bf16 %v3814_v12, %v3813_v33  ;;  %v3852_v44 = vpack.c.bf16 %v3830_v27, %v3829_v50  ;;  %v3831_v13 = vmul.f32 %v3810_v9, %v8704_v17  ;;  %v3832_v52 = vmul.f32 %v3810_v9, %v8726_v62 }
 0x434   : > { %3935 = vmatmul.bf16.vlgmr.msra.gmra.mxu1 %v3843_v22  ;;  %3975 = vmatmul.bf16.vlgmr.msra.gmra.mxu2 %v3851_v38  ;;  %v3845_v34 = vpack.c.bf16 %v3816_v26, %v3815_v32  ;;  %v3817_v61 = vmul.f32 %v3810_v9, %v9780_v53  ;;  %v3818_v23 = vmul.f32 %v3810_v9, %v9781_v1  ;;  %v392_v38 = vld [vmem:[%s4788_s25 + $0x8] sm:$0xff]  }
 0x435   : > { %v3853_v31 = vpack.c.bf16 %v3832_v52, %v3831_v13  ;;  %v3833_v55 = vmul.f32 %v3810_v9, %v8742_v11  ;;  %v3834_v40 = vmul.f32 %v3810_v9, %v8771_v19  ;;  %v3819_v17 = vmul.f32 %v3810_v9, %v8426_v36 }
 0x436   : > { %v3846_v7 = vpack.c.bf16 %v3818_v23, %v3817_v61  ;;  %v3820_v62 = vmul.f32 %v3810_v9, %v8076_v56  ;;  %v3835_v21 = vmul.f32 %v3810_v9, %v8790_v43  ;;  %v3836_v63 = vmul.f32 %v3810_v9, %v8806_v15  ;;  %v394_v61 = vld [vmem:[%s4788_s25 + $0x10] sm:$0xff]  }
 0x437   : > { %v3854_v35 = vpack.c.bf16 %v3834_v40, %v3833_v55  ;;  %v3821_v11 = vmul.f32 %v3810_v9, %v8461_v28  ;;  %v3822_v19 = vmul.f32 %v3810_v9, %v8491_v39  ;;  %v3837_v54 = vmul.f32 %v3810_v9, %v8827_v29 }
 0x438   : > { %v3847_v47 = vpack.c.bf16 %v3820_v62, %v3819_v17  ;;  %v3855_v48 = vpack.c.bf16 %v3836_v63, %v3835_v21  ;;  %v3838_v46 = vmul.f32 %v3810_v9, %v8847_v5  ;;  %v3823_v56 = vmul.f32 %v3810_v9, %v8511_v10  ;;  %v410_v62 = vld [vmem:[%s4788_s25 + $0x50] sm:$0xff]  }
 0x439   : > { %v3848_v60 = vpack.c.bf16 %v3822_v19, %v3821_v11  ;;  %v3824_v43 = vmul.f32 %v3810_v9, %v8548_v51  ;;  %v3839_v15 = vmul.f32 %v3810_v9, %v8856_v25  ;;  %v3840_v28 = vmul.f32 %v3810_v9, %v8860_v37  ;;  %v390_v25 = vld [vmem:[%s4788_s25] sm:$0xff]  }
 0x43a   : > { %v3856_v36 = vpack.c.bf16 %v3838_v46, %v3837_v54  ;;  %v3825_v29 = vmul.f32 %v3810_v9, %v8569_v0  ;;  %v3826_v5 = vmul.f32 %v3810_v9, %v8593_v30  ;;  %v3841_v16 = vmul.f32 %v3810_v9, %v8864_v18  ;;  %v8941_v37 = vld [vmem:[%s9073_s10] ss:$0 sm:$0xff] }
 0x43b   : > { %v3849_v58 = vpack.c.bf16 %v3824_v43, %v3823_v56  ;;  %v3857_v39 = vpack.c.bf16 %v3840_v28, %v3839_v15  ;;  %v3842_v10 = vmul.f32 %v3810_v9, %v8868_v24  ;;  %v4016_v41 = vunpack.c.l.bf16 %v390_v25  ;;  %v406_v18 = vld [vmem:[%s4788_s25 + $0x40] sm:$0xff]  }
 0x43c   : > { %v3850_v59 = vpack.c.bf16 %v3826_v5, %v3825_v29  ;;  %v4032_v9 = vunpack.c.l.bf16 %v406_v18  ;;  %v4017_v42 = vunpack.c.h.bf16 %v390_v25  ;;  %v4033_v45 = vunpack.c.h.bf16 %v406_v18  ;;  %v412_v5 = vld [vmem:[%s4788_s25 + $0x58] sm:$0xff]  }
 0x43d   : > { %v3858_v51 = vpack.c.bf16 %v3842_v10, %v3841_v16  ;;  %v4018_v12 = vunpack.c.l.bf16 %v392_v38  ;;  %v4019_v13 = vunpack.c.h.bf16 %v392_v38  ;;  %v4020_v40 = vunpack.c.l.bf16 %v394_v61 }
 0x43e   : > { %v4036_v63 = vunpack.c.l.bf16 %v410_v62  ;;  %v4021_v11 = vunpack.c.h.bf16 %v394_v61  ;;  %v4037_v56 = vunpack.c.h.bf16 %v410_v62  ;;  %v4038_v10 = vunpack.c.l.bf16 %v412_v5 }
 0x444   : > { %3940 = vmatmul.bf16.gmra.mxu1 %v3844_v4  ;;  %3980 = vmatmul.bf16.gmra.mxu2 %v3852_v44  ;;  %v408_v44 = vld [vmem:[%s4788_s25 + $0x48] sm:$0xff]  }
 0x445   : > { %v4034_v32 = vunpack.c.l.bf16 %v408_v44  ;;  %v4035_v1 = vunpack.c.h.bf16 %v408_v44 }
 0x454   : > { %3945 = vmatmul.bf16.gmra.mxu1 %v3845_v34  ;;  %3985 = vmatmul.bf16.gmra.mxu2 %v3853_v31 }
 0x464   : > { %3950 = vmatmul.bf16.gmra.mxu1 %v3846_v7  ;;  %3990 = vmatmul.bf16.gmra.mxu2 %v3854_v35 }
 0x474   : > { %3955 = vmatmul.bf16.gmra.mxu1 %v3847_v47  ;;  %3995 = vmatmul.bf16.gmra.mxu2 %v3855_v48 }
 0x484   : > { %3960 = vmatmul.bf16.gmra.mxu1 %v3848_v60  ;;  %4000 = vmatmul.bf16.gmra.mxu2 %v3856_v36  ;;  %v396_v36 = vld [vmem:[%s4788_s25 + $0x18] sm:$0xff]  }
 0x485   : > { %v4022_v28 = vunpack.c.l.bf16 %v396_v36  ;;  %v4023_v25 = vunpack.c.h.bf16 %v396_v36 }
 0x494   : > { %3965 = vmatmul.bf16.gmra.mxu1 %v3849_v58  ;;  %4005 = vmatmul.bf16.gmra.mxu2 %v3857_v39 }
 0x4a4   : > { %3970 = vmatmul.bf16.gmra.mxu1 %v3850_v59  ;;  %4010 = vmatmul.bf16.gmra.mxu2 %v3858_v51 }
 0x4b1   : > { %v3936_v0 = vpop.f32.mrf.mxu1 }
 0x4b2   : > { %v3937_v30 = vadd.f32 %v8941_v37, %v3936_v0 }
 0x4b4   : > { %v4048_v24 = vadd.f32 %v4016_v41, %v3937_v30 }
 0x4b6   : > { %4081 = vst.msk [vmem:[%s8948_s23] sm:$0xff] %vm4080_vm0, %v4048_v24  ;;  %v398_v24 = vld [vmem:[%s4788_s25 + $0x20] sm:$0xff]  }
 0x4b7   : > { %v3976_v8 = vpop.f32.mrf.mxu2 }
 0x4b8   : > { %v3977_v57 = vadd.f32 %v8941_v37, %v3976_v8 }
 0x4b9   : > { %v3938_v14 = vpop.f32.mrf.mxu1 }
 0x4ba   : > { %v4064_v6 = vadd.f32 %v4032_v9, %v3977_v57  ;;  %v3939_v20 = vadd.f32 %v8941_v37, %v3938_v14  ;;  %v4039_v9 = vunpack.c.h.bf16 %v412_v5 }
 0x4bc   : > { %4097 = vst.msk [vmem:[%s8948_s23 + $0x80] sm:$0xff] %vm4080_vm0, %v4064_v6  ;;  %v4049_v22 = vadd.f32 %v4017_v42, %v3939_v20  ;;  %v4024_v42 = vunpack.c.l.bf16 %v398_v24 }
 0x4be   : > { %4082 = vst.msk [vmem:[%s8948_s23 + $0x8] sm:$0xff] %vm4080_vm0, %v4049_v22  ;;  %v414_v22 = vld [vmem:[%s4788_s25 + $0x60] sm:$0xff]  }
 0x4bf   : > { %v3978_v33 = vpop.f32.mrf.mxu2 }
 0x4c0   : > { %v3979_v2 = vadd.f32 %v8941_v37, %v3978_v33 }
 0x4c1   : > { %v3941_v50 = vpop.f32.mrf.mxu1 }
 0x4c2   : > { %v4065_v27 = vadd.f32 %v4033_v45, %v3979_v2  ;;  %v3942_v4 = vadd.f32 %v8941_v37, %v3941_v50  ;;  %v4040_v45 = vunpack.c.l.bf16 %v414_v22 }
 0x4c4   : > { %4098 = vst.msk [vmem:[%s8948_s23 + $0x88] sm:$0xff] %vm4080_vm0, %v4065_v27  ;;  %v4050_v49 = vadd.f32 %v4018_v12, %v3942_v4  ;;  %v4025_v12 = vunpack.c.h.bf16 %v398_v24 }
 0x4c6   : > { %4083 = vst.msk [vmem:[%s8948_s23 + $0x10] sm:$0xff] %vm4080_vm0, %v4050_v49  ;;  %v400_v49 = vld [vmem:[%s4788_s25 + $0x28] sm:$0xff]  }
 0x4c7   : > { %v3981_v3 = vpop.f32.mrf.mxu2 }
 0x4c8   : > { %v3982_v26 = vadd.f32 %v8941_v37, %v3981_v3 }
 0x4c9   : > { %v3943_v52 = vpop.f32.mrf.mxu1 }
 0x4ca   : > { %v4066_v34 = vadd.f32 %v4034_v32, %v3982_v26  ;;  %v3944_v31 = vadd.f32 %v8941_v37, %v3943_v52  ;;  %v4041_v32 = vunpack.c.h.bf16 %v414_v22 }
 0x4cc   : > { %4099 = vst.msk [vmem:[%s8948_s23 + $0x90] sm:$0xff] %vm4080_vm0, %v4066_v34  ;;  %v4051_v53 = vadd.f32 %v4019_v13, %v3944_v31  ;;  %v4026_v13 = vunpack.c.l.bf16 %v400_v49 }
 0x4ce   : > { %4084 = vst.msk [vmem:[%s8948_s23 + $0x18] sm:$0xff] %vm4080_vm0, %v4051_v53  ;;  %v416_v53 = vld [vmem:[%s4788_s25 + $0x68] sm:$0xff]  }
 0x4cf   : > { %v3983_v23 = vpop.f32.mrf.mxu2 }
 0x4d0   : > { %v3984_v55 = vadd.f32 %v8941_v37, %v3983_v23 }
 0x4d1   : > { %v3946_v7 = vpop.f32.mrf.mxu1 }
 0x4d2   : > { %v4067_v35 = vadd.f32 %v4035_v1, %v3984_v55  ;;  %v3947_v17 = vadd.f32 %v8941_v37, %v3946_v7  ;;  %v4042_v1 = vunpack.c.l.bf16 %v416_v53 }
 0x4d4   : > { %4100 = vst.msk [vmem:[%s8948_s23 + $0x98] sm:$0xff] %vm4080_vm0, %v4067_v35  ;;  %v4052_v21 = vadd.f32 %v4020_v40, %v3947_v17  ;;  %v4027_v40 = vunpack.c.h.bf16 %v400_v49 }
 0x4d6   : > { %4085 = vst.msk [vmem:[%s8948_s23 + $0x20] sm:$0xff] %vm4080_vm0, %v4052_v21  ;;  %v402_v21 = vld [vmem:[%s4788_s25 + $0x30] sm:$0xff]  }
 0x4d7   : > { %v3986_v47 = vpop.f32.mrf.mxu2 }
 0x4d8   : > { %v3987_v48 = vadd.f32 %v8941_v37, %v3986_v47 }
 0x4d9   : > { %v3948_v19 = vpop.f32.mrf.mxu1 }
 0x4da   : > { %v4068_v54 = vadd.f32 %v4036_v63, %v3987_v48  ;;  %v3949_v46 = vadd.f32 %v8941_v37, %v3948_v19  ;;  %v4043_v63 = vunpack.c.h.bf16 %v416_v53 }
 0x4dc   : > { %4101 = vst.msk [vmem:[%s8948_s23 + $0xa0] sm:$0xff] %vm4080_vm0, %v4068_v54  ;;  %v4053_v60 = vadd.f32 %v4021_v11, %v3949_v46  ;;  %v4028_v11 = vunpack.c.l.bf16 %v402_v21 }
 0x4de   : > { %4086 = vst.msk [vmem:[%s8948_s23 + $0x28] sm:$0xff] %vm4080_vm0, %v4053_v60  ;;  %v418_v60 = vld [vmem:[%s4788_s25 + $0x70] sm:$0xff]  }
 0x4df   : > { %v3988_v43 = vpop.f32.mrf.mxu2 }
 0x4e0   : > { %v3989_v15 = vadd.f32 %v8941_v37, %v3988_v43 }
 0x4e1   : > { %v3951_v58 = vpop.f32.mrf.mxu1 }
 0x4e2   : > { %v4069_v39 = vadd.f32 %v4037_v56, %v3989_v15  ;;  %v3952_v29 = vadd.f32 %v8941_v37, %v3951_v58  ;;  %v4044_v56 = vunpack.c.l.bf16 %v418_v60 }
 0x4e4   : > { %4102 = vst.msk [vmem:[%s8948_s23 + $0xa8] sm:$0xff] %vm4080_vm0, %v4069_v39  ;;  %v4054_v16 = vadd.f32 %v4022_v28, %v3952_v29  ;;  %v4029_v28 = vunpack.c.h.bf16 %v402_v21 }
 0x4e6   : > { %4087 = vst.msk [vmem:[%s8948_s23 + $0x30] sm:$0xff] %vm4080_vm0, %v4054_v16  ;;  %v404_v16 = vld [vmem:[%s4788_s25 + $0x38] sm:$0xff]  }
 0x4e7   : > { %v3991_v59 = vpop.f32.mrf.mxu2 }
 0x4e8   : > { %v3992_v51 = vadd.f32 %v8941_v37, %v3991_v59 }
 0x4e9   : > { %v3953_v41 = vpop.f32.mrf.mxu1 }
 0x4ea   : > { %v4070_v0 = vadd.f32 %v4038_v10, %v3992_v51  ;;  %v3954_v30 = vadd.f32 %v8941_v37, %v3953_v41  ;;  %v4045_v10 = vunpack.c.h.bf16 %v418_v60 }
 0x4ec   : > { %4103 = vst.msk [vmem:[%s8948_s23 + $0xb0] sm:$0xff] %vm4080_vm0, %v4070_v0  ;;  %v4055_v18 = vadd.f32 %v4023_v25, %v3954_v30  ;;  %v4030_v25 = vunpack.c.l.bf16 %v404_v16 }
 0x4ee   : > { %4088 = vst.msk [vmem:[%s8948_s23 + $0x38] sm:$0xff] %vm4080_vm0, %v4055_v18  ;;  %v420_v18 = vld [vmem:[%s4788_s25 + $0x78] sm:$0xff]  }
 0x4ef   : > { %v3993_v8 = vpop.f32.mrf.mxu2 }
 0x4f0   : > { %v3994_v57 = vadd.f32 %v8941_v37, %v3993_v8 }
 0x4f1   : > { %v3956_v14 = vpop.f32.mrf.mxu1 }
 0x4f2   : > { %v4071_v6 = vadd.f32 %v4039_v9, %v3994_v57  ;;  %v3957_v20 = vadd.f32 %v8941_v37, %v3956_v14  ;;  %v4046_v9 = vunpack.c.l.bf16 %v420_v18 }
 0x4f4   : > { %4104 = vst.msk [vmem:[%s8948_s23 + $0xb8] sm:$0xff] %vm4080_vm0, %v4071_v6  ;;  %v4056_v38 = vadd.f32 %v4024_v42, %v3957_v20  ;;  %v4031_v42 = vunpack.c.h.bf16 %v404_v16 }
 0x4f6   : > { %4089 = vst.msk [vmem:[%s8948_s23 + $0x40] sm:$0xff] %vm4080_vm0, %v4056_v38  ;;  %v4047_v38 = vunpack.c.h.bf16 %v420_v18 }
 0x4f7   : > { %v3996_v33 = vpop.f32.mrf.mxu2 }
 0x4f8   : > { %v3997_v2 = vadd.f32 %v8941_v37, %v3996_v33 }
 0x4f9   : > { %v3958_v50 = vpop.f32.mrf.mxu1 }
 0x4fa   : > { %v4072_v27 = vadd.f32 %v4040_v45, %v3997_v2  ;;  %v3959_v4 = vadd.f32 %v8941_v37, %v3958_v50 }
 0x4fc   : > { %4105 = vst.msk [vmem:[%s8948_s23 + $0xc0] sm:$0xff] %vm4080_vm0, %v4072_v27  ;;  %v4057_v44 = vadd.f32 %v4025_v12, %v3959_v4 }
 0x4fe   : > { %4090 = vst.msk [vmem:[%s8948_s23 + $0x48] sm:$0xff] %vm4080_vm0, %v4057_v44 }
 0x4ff   : > { %v3998_v3 = vpop.f32.mrf.mxu2 }
 0x500   : > { %v3999_v26 = vadd.f32 %v8941_v37, %v3998_v3 }
 0x501   : > { %v3961_v52 = vpop.f32.mrf.mxu1 }
 0x502   : > { %v4073_v34 = vadd.f32 %v4041_v32, %v3999_v26  ;;  %v3962_v31 = vadd.f32 %v8941_v37, %v3961_v52 }
 0x504   : > { %4106 = vst.msk [vmem:[%s8948_s23 + $0xc8] sm:$0xff] %vm4080_vm0, %v4073_v34  ;;  %v4058_v61 = vadd.f32 %v4026_v13, %v3962_v31 }
 0x506   : > { %4091 = vst.msk [vmem:[%s8948_s23 + $0x50] sm:$0xff] %vm4080_vm0, %v4058_v61 }
 0x507   : > { %v4001_v23 = vpop.f32.mrf.mxu2 }
 0x508   : > { %v4002_v55 = vadd.f32 %v8941_v37, %v4001_v23 }
 0x509   : > { %v3963_v7 = vpop.f32.mrf.mxu1 }
 0x50a   : > { %v4074_v35 = vadd.f32 %v4042_v1, %v4002_v55  ;;  %v3964_v17 = vadd.f32 %v8941_v37, %v3963_v7 }
 0x50c   : > { %4107 = vst.msk [vmem:[%s8948_s23 + $0xd0] sm:$0xff] %vm4080_vm0, %v4074_v35  ;;  %v4059_v62 = vadd.f32 %v4027_v40, %v3964_v17 }
 0x50e   : > { %4092 = vst.msk [vmem:[%s8948_s23 + $0x58] sm:$0xff] %vm4080_vm0, %v4059_v62 }
 0x50f   : > { %v4003_v47 = vpop.f32.mrf.mxu2 }
 0x510   : > { %v4004_v48 = vadd.f32 %v8941_v37, %v4003_v47 }
 0x511   : > { %v3966_v19 = vpop.f32.mrf.mxu1 }
 0x512   : > { %v4075_v54 = vadd.f32 %v4043_v63, %v4004_v48  ;;  %v3967_v46 = vadd.f32 %v8941_v37, %v3966_v19 }
 0x514   : > { %4108 = vst.msk [vmem:[%s8948_s23 + $0xd8] sm:$0xff] %vm4080_vm0, %v4075_v54  ;;  %v4060_v36 = vadd.f32 %v4028_v11, %v3967_v46 }
 0x516   : > { %4093 = vst.msk [vmem:[%s8948_s23 + $0x60] sm:$0xff] %vm4080_vm0, %v4060_v36 }
 0x517   : > { %v4006_v43 = vpop.f32.mrf.mxu2 }
 0x518   : > { %v4007_v15 = vadd.f32 %v8941_v37, %v4006_v43 }
 0x519   : > { %v3968_v58 = vpop.f32.mrf.mxu1 }
 0x51a   : > { %v4076_v39 = vadd.f32 %v4044_v56, %v4007_v15  ;;  %v3969_v29 = vadd.f32 %v8941_v37, %v3968_v58 }
 0x51c   : > { %4109 = vst.msk [vmem:[%s8948_s23 + $0xe0] sm:$0xff] %vm4080_vm0, %v4076_v39  ;;  %v4061_v5 = vadd.f32 %v4029_v28, %v3969_v29 }
 0x51e   : > { %4094 = vst.msk [vmem:[%s8948_s23 + $0x68] sm:$0xff] %vm4080_vm0, %v4061_v5 }
 0x51f   : > { %v4008_v59 = vpop.f32.mrf.mxu2 }
 0x520   : > { %v4009_v51 = vadd.f32 %v8941_v37, %v4008_v59 }
 0x521   : > { %v3971_v41 = vpop.f32.mrf.mxu1 }
 0x522   : > { %v4077_v0 = vadd.f32 %v4045_v10, %v4009_v51  ;;  %v3972_v30 = vadd.f32 %v8941_v37, %v3971_v41 }
 0x524   : > { %4110 = vst.msk [vmem:[%s8948_s23 + $0xe8] sm:$0xff] %vm4080_vm0, %v4077_v0  ;;  %v4062_v24 = vadd.f32 %v4030_v25, %v3972_v30 }
 0x526   : > { %4095 = vst.msk [vmem:[%s8948_s23 + $0x70] sm:$0xff] %vm4080_vm0, %v4062_v24 }
 0x527   : > { %v4011_v8 = vpop.f32.mrf.mxu2 }
 0x528   : > { %v4012_v57 = vadd.f32 %v8941_v37, %v4011_v8 }
 0x529   : > { %v3973_v14 = vpop.f32.mrf.mxu1 }
 0x52a   : > { %v4078_v6 = vadd.f32 %v4046_v9, %v4012_v57  ;;  %v3974_v20 = vadd.f32 %v8941_v37, %v3973_v14 }
 0x52c   : > { %4111 = vst.msk [vmem:[%s8948_s23 + $0xf0] sm:$0xff] %vm4080_vm0, %v4078_v6  ;;  %v4063_v22 = vadd.f32 %v4031_v42, %v3974_v20 }
 0x52e   : > { %4096 = vst.msk [vmem:[%s8948_s23 + $0x78] sm:$0xff] %vm4080_vm0, %v4063_v22 }
 0x52f   : > { %v4013_v45 = vpop.f32.mrf.mxu2 }
 0x530   : > { %v4014_v33 = vadd.f32 %v8941_v37, %v4013_v45 }
 0x532   : > { %v4079_v2 = vadd.f32 %v4047_v38, %v4014_v33 }
 0x534   : > { %4112 = vst.msk [vmem:[%s8948_s23 + $0xf8] sm:$0xff] %vm4080_vm0, %v4079_v2 }
 0x535 PF: > { %s23_s19 = sadd.s32 1, %s4703_s19  }
 0x536   : > { %p20_p4 = scmp.ge.s32.totalorder %s23_s19, 4  }
 0x538   :  { %22 = sbr.rel (!%p20_p4) target bundleno = 3 (0x3), region = 96 }

</bundles_post_ra>
